<compile_context>
chip_gen: v5e
topology: v5e:2x2
jax: 0.10.0
libtpu: 0.0.40
codegen_flags: <defaults>
</compile_context>

<pallas_src>
import functools
import math

import jax
import jax.numpy as jnp
from jax.experimental import pallas as pl
from jax.experimental.pallas import tpu as pltpu


# --------------------------------- kernels ----------------------------------


def _maxout_kernel_strided(x_ref, o_ref, *, pool_size: int):
    """Dense formulation: pool_size lane-strided loads, max-accumulated.

    x_ref: (tm, tg * pool_size) VMEM tile;  o_ref: (tm, tg).
    Never materializes a lane-sparse (tm, tg, pool_size) intermediate.
    """
    tg = o_ref.shape[-1]
    acc = x_ref[:, pl.ds(0, tg, stride=pool_size)]
    for k in range(1, pool_size):
        acc = jnp.maximum(acc, x_ref[:, pl.ds(k, tg, stride=pool_size)])
    o_ref[...] = acc


def _maxout_kernel_reshape(x_ref, o_ref, *, pool_size: int):
    """Fallback formulation (always lowers): reshape + reduce over minor dim."""
    x = x_ref[...]
    tm, th = x.shape
    tg = th // pool_size
    o_ref[...] = jnp.max(x.reshape(tm, tg, pool_size), axis=-1)


# ------------------------------ pallas wrapper -------------------------------


def _pallas_maxout_2d(x2, g, pool_size, row_tile, group_tile, use_strided,
                      vmem_limit_bytes):
    rows = x2.shape[0]
    body = _maxout_kernel_strided if use_strided else _maxout_kernel_reshape
    kernel = functools.partial(body, pool_size=pool_size)
    grid = (pl.cdiv(rows, row_tile), pl.cdiv(g, group_tile))
    return pl.pallas_call(
        kernel,
        out_shape=jax.ShapeDtypeStruct((rows, g), x2.dtype),
        grid_spec=pltpu.PrefetchScalarGridSpec(
            num_scalar_prefetch=0,
            grid=grid,
            in_specs=[
                pl.BlockSpec((row_tile, group_tile * pool_size),
                             lambda i, j: (i, j))
            ],
            out_specs=pl.BlockSpec((row_tile, group_tile), lambda i, j: (i, j)),
        ),
        compiler_params=pltpu.CompilerParams(
            dimension_semantics=("parallel", "parallel"),
            vmem_limit_bytes=vmem_limit_bytes,
        ),
    )(x2)


@functools.lru_cache(maxsize=None)
def _strided_lane_loads_ok(dtype_name: str, pool_size: int) -> bool:
    """One-time capability + correctness probe for lane-strided ref loads."""
    try:
        dtype = jnp.dtype(dtype_name)
        sub = {4: 8, 2: 16, 1: 32}.get(dtype.itemsize, 8)
        tg = 128
        x = jnp.arange(sub * tg * pool_size, dtype=jnp.float32)
        x = ((x * 2654435761.0) % 1021.0).astype(dtype).reshape(sub, tg * pool_size)
        out = _pallas_maxout_2d(x, tg, pool_size, sub, tg, True, 32 * 1024 * 1024)
        ref = jnp.max(x.reshape(sub, tg, pool_size), axis=-1)
        return bool(jax.block_until_ready(jnp.array_equal(out, ref)))
    except Exception:
        return False


# ------------------------------ tiling helpers --------------------------------


def _round_up(n: int, m: int) -> int:
    return ((n + m - 1) // m) * m


def _vmem_capacity_bytes() -> int:
    try:
        return int(pltpu.get_tpu_info().vmem_capacity_bytes)
    except Exception:
        return 64 * 1024 * 1024  # conservative (v7x-sized) default


def _fold_rows(rows: int, g: int) -> int:
    """Fold factor r (divides rows): (rows, H) -> (rows // r, r * H).

    Used when g < 128 so the output last dim becomes lane-dense.  Pure,
    HBM-contiguous reshape; group boundaries stay aligned to pool_size.
    """
    if g >= 128 or rows <= 1:
        return 1
    need = 128 // math.gcd(g, 128)  # smallest r with (r * g) % 128 == 0
    r = need
    while r <= rows and r <= need * 4096:
        if rows % r == 0:
            return r  # smallest lane-dense fold keeps the most rows
        r += need
    # No exact lane-dense fold divides rows: take the largest divisor of rows
    # that keeps the folded group count modest (still far better than g lanes).
    cap = max(1, 256 // g)
    for cand in range(min(rows, cap), 0, -1):
        if rows % cand == 0:
            return cand
    return 1


def _choose_tiles(rows, g, pool_size, itemsize, budget_bytes, target_block_bytes):
    """Pick (row_tile, group_tile): sublane/lane friendly, fits the VMEM budget."""
    sub = {4: 8, 2: 16, 1: 32}.get(itemsize, 8)  # dtype-aware sublane packing
    max_rows = min(1024, _round_up(max(rows, 1), sub))

    group_bytes = pool_size * itemsize            # input bytes per row per group
    full_row_bytes = g * group_bytes

    if g > 128 and sub * full_row_bytes > target_block_bytes:
        # Feature dim too wide even at the minimal row tile: split it on a
        # lane-dense (multiple-of-128-groups) boundary; partial last block OK.
        group_tile = (target_block_bytes // (sub * group_bytes)) // 128 * 128
        group_tile = max(128, min(group_tile, _round_up(g, 128)))
    else:
        group_tile = g                            # full extent (always legal)

    in_row_bytes = group_tile * group_bytes
    out_row_bytes = group_tile * itemsize

    # Target a fixed input-block byte size to amortize per-grid-step overhead.
    row_tile = (target_block_bytes // max(in_row_bytes, 1)) // sub * sub
    row_tile = max(sub, min(max_rows, row_tile))

    def working_set(rt):  # double-buffered input + output blocks
        return 2 * rt * (in_row_bytes + out_row_bytes)

    while row_tile > sub and working_set(row_tile) > budget_bytes:
        row_tile = max(sub, (row_tile // 2) // sub * sub)
    return row_tile, group_tile


# --------------------------------- public op ---------------------------------


def maxout(x: jax.Array, pool_size: int) -> jax.Array:
    """out[..., j] = max_k x[..., j*pool_size + k]  (PyTorch Maxout semantics)."""
    *lead, H = x.shape
    if H % pool_size != 0:
        raise ValueError("last dim must be divisible by pool_size")
    g = H // pool_size

    rows = math.prod(lead) if lead else 1
    x2 = x.reshape(rows, H)

    # Fold rows into the lane axis when g is small so stores stay lane-dense.
    r = _fold_rows(rows, g)
    rows_f, g_f = rows // r, g * r
    x2 = x2.reshape(rows_f, r * H)

    itemsize = jnp.dtype(x.dtype).itemsize
    capacity = _vmem_capacity_bytes()
    budget = min(max(capacity // 4, 8 << 20), 32 << 20)      # 2x(in+out) blocks
    target_block = max(1 << 20, budget // 4)                  # ~2-8 MiB blocks
    vmem_limit = min(max(capacity // 2, 32 << 20), 64 << 20)

    row_tile, group_tile = _choose_tiles(rows_f, g_f, pool_size, itemsize,
                                         budget, target_block)
    use_strided = _strided_lane_loads_ok(jnp.dtype(x.dtype).name, pool_size)

    out2 = _pallas_maxout_2d(x2, g_f, pool_size, row_tile, group_tile,
                             use_strided, vmem_limit)
    return out2.reshape(*lead, g)


def _ref_maxout(x, pool_size):
    return jnp.max(
        x.reshape(*x.shape[:-1], x.shape[-1] // pool_size, pool_size), axis=-1
    )


if __name__ == "__main__":
    key = jax.random.PRNGKey(0)

    # Primary check: small shape consistent with the module's forward.
    pool_size = 4
    x = jax.random.normal(key, (2, 4, 16, 16), dtype=jnp.float32)
    out = jax.block_until_ready(maxout(x, pool_size))
    ref = _ref_maxout(x, pool_size)
    assert out.shape == ref.shape, (out.shape, ref.shape)
    assert jnp.array_equal(out, ref), "Pallas maxout mismatch vs reference (f32)"

    # Lane-dense path with g == 128, bf16 sublane packing.
    k1, k2 = jax.random.split(key)
    xb = jax.random.normal(k1, (8, 16, 512), dtype=jnp.bfloat16)
    outb = jax.block_until_ready(maxout(xb, 4))
    assert jnp.array_equal(outb, _ref_maxout(xb, 4)), "mismatch (bf16 lane-dense)"

    # Irregular rows (row-fold fallback + partial row block; no host-side pad).
    xp = jax.random.normal(k2, (300, 32), dtype=jnp.float32)
    outp = jax.block_until_ready(maxout(xp, 4))
    assert jnp.array_equal(outp, _ref_maxout(xp, 4)), "mismatch (partial block)"

    print("KERNEL_OK")
</pallas_src>

<mosaic_0001>
module attributes {stable_mosaic.version = 11 : i64} {
  func.func @_maxout_kernel_strided(%arg0: i32, %arg1: i32, %arg2: memref<8x512xf32, #tpu.memory_space<vmem>>, %arg3: memref<8x128xf32, #tpu.memory_space<vmem>>) attributes {dimension_semantics = [#tpu.dimension_semantics<parallel>, #tpu.dimension_semantics<parallel>], iteration_bounds = array<i64: 1, 1>, scalar_prefetch = 0 : i64, scratch_operands = 0 : i64, tpu.core_type = #tpu.core_type<tc>, window_params = [{transform_indices = @transform_0, window_bounds = array<i64: 8, 512>}, {transform_indices = @transform_1, window_bounds = array<i64: 8, 128>}]} {
    %c0 = arith.constant 0 : index
    %c0_0 = arith.constant 0 : index
    %0 = tpu.strided_load %arg2[%c0, %c0_0] {strides = array<i32: 1, 4>} : memref<8x512xf32, #tpu.memory_space<vmem>>, vector<8x128xf32>
    %c0_1 = arith.constant 0 : index
    %c1 = arith.constant 1 : index
    %1 = tpu.strided_load %arg2[%c0_1, %c1] {strides = array<i32: 1, 4>} : memref<8x512xf32, #tpu.memory_space<vmem>>, vector<8x128xf32>
    %2 = arith.maximumf %0, %1 : vector<8x128xf32>
    %c0_2 = arith.constant 0 : index
    %c2 = arith.constant 2 : index
    %3 = tpu.strided_load %arg2[%c0_2, %c2] {strides = array<i32: 1, 4>} : memref<8x512xf32, #tpu.memory_space<vmem>>, vector<8x128xf32>
    %4 = arith.maximumf %2, %3 : vector<8x128xf32>
    %c0_3 = arith.constant 0 : index
    %c3 = arith.constant 3 : index
    %5 = tpu.strided_load %arg2[%c0_3, %c3] {strides = array<i32: 1, 4>} : memref<8x512xf32, #tpu.memory_space<vmem>>, vector<8x128xf32>
    %6 = arith.maximumf %4, %5 : vector<8x128xf32>
    %c0_4 = arith.constant 0 : index
    %c0_5 = arith.constant 0 : index
    %7 = vector.load %arg3[%c0_4, %c0_5] : memref<8x128xf32, #tpu.memory_space<vmem>>, vector<8x128xf32>
    tpu.vector_store %arg3[%c0_4, %c0_5], %6 {strides = array<i32>} : memref<8x128xf32, #tpu.memory_space<vmem>>, vector<8x128xf32>,
    return
  }
  func.func @transform_0(%arg0: i32, %arg1: i32) -> (i32, i32) {
    %c0_i32 = arith.constant 0 : i32
    return %arg0, %arg1 : i32, i32
  }
  func.func @transform_1(%arg0: i32, %arg1: i32) -> (i32, i32) {
    %c0_i32 = arith.constant 0 : i32
    return %arg0, %arg1 : i32, i32
  }
}

module attributes {stable_mosaic.version = 11 : i64} {
  func.func @_maxout_kernel_reshape(%arg0: i32, %arg1: i32, %arg2: memref<8x512xf32, #tpu.memory_space<vmem>>, %arg3: memref<8x128xf32, #tpu.memory_space<vmem>>) attributes {dimension_semantics = [#tpu.dimension_semantics<parallel>, #tpu.dimension_semantics<parallel>], iteration_bounds = array<i64: 1, 1>, scalar_prefetch = 0 : i64, scratch_operands = 0 : i64, tpu.core_type = #tpu.core_type<tc>, window_params = [{transform_indices = @transform_0, window_bounds = array<i64: 8, 512>}, {transform_indices = @transform_1, window_bounds = array<i64: 8, 128>}]} {
    %c0 = arith.constant 0 : index
    %c0_0 = arith.constant 0 : index
    %0 = vector.load %arg2[%c0, %c0_0] : memref<8x512xf32, #tpu.memory_space<vmem>>, vector<8x512xf32>
    %1 = vector.shape_cast %0 : vector<8x512xf32> to vector<8x128x4xf32>
    %cst = arith.constant dense<0xFF800000> : vector<8x128xf32>
    %2 = vector.multi_reduction <maximumf>, %1, %cst [2] : vector<8x128x4xf32> to vector<8x128xf32>
    %c0_1 = arith.constant 0 : index
    %c0_2 = arith.constant 0 : index
    %3 = vector.load %arg3[%c0_1, %c0_2] : memref<8x128xf32, #tpu.memory_space<vmem>>, vector<8x128xf32>
    tpu.vector_store %arg3[%c0_1, %c0_2], %2 {strides = array<i32>} : memref<8x128xf32, #tpu.memory_space<vmem>>, vector<8x128xf32>,
    return
  }
  func.func @transform_0(%arg0: i32, %arg1: i32) -> (i32, i32) {
    %c0_i32 = arith.constant 0 : i32
    return %arg0, %arg1 : i32, i32
  }
  func.func @transform_1(%arg0: i32, %arg1: i32) -> (i32, i32) {
    %c0_i32 = arith.constant 0 : i32
    return %arg0, %arg1 : i32, i32
  }
}

</mosaic_0001>

<bundles_post_ra>
// kernel: tpu_custom_call.1
= control target key start
LH: loop header
LB: loop body
LE: loop exit
PB: predicated region body
PF: predicated region fallthrough
CT: control target
= control target key end

     0   :  { %6 = vsyncpa [#allocation3], 0  ;;  %s7095_s0 = inlined_call_operand.hbm [shape: f32[4,512], index: 0, kind: input, shape index: {}]   ;;  %s7096_s1 = inlined_call_operand.hbm [shape: f32[4,128], index: 1, kind: output, shape index: {}]  }
   0x1   :  { %7 = vsyncpa [#allocation4], 0 }
   0x2   :  { %11 = vsyncadd [#allocation3], 256  ;;  %s12_s8 = sshll.u32 %s7095_s0, 4  ;;  %s4209_s9 = smov [#allocation2]   ;;  %s13_s8 = int_to_ptr.hbm [resolvable:$true] %s12_s8 }
   0x3   :  { %s14_s10 = sshll.u32 %s4209_s9, 4  ;;  %s4210_s11 = smov 256   ;;  %s15_s10 = int_to_ptr.vmem [resolvable:$true] %s14_s10 }
   0x4   :  { %s4211_s12 = smov 16  }
   0x5   :  { %20 = dma.hbm_to_vmem [thread:$0]  %s13_s8, 256, %s15_s10, [#allocation3], %s4210_s11, %s4210_s11, %s4211_s12  }
   0x6   :  { %4205 = dma.done.wait [#allocation3], 512  }
   0x7   :  { %4206 = vsyncadd [#allocation3], 4294966784  ;;  %v4259_v0 = vld [vmem:[#allocation2] sm:$0xff]  ;;  %s4212_s13 = smov 116   ;;  %s4213_s14 = smov 120   ;;  %v4267_v1 = vld [vmem:[#allocation2 + $0x10] sm:$0xff] }
   0x8   :  { %51 = vrot.lane.b32.xlu2 %v4259_v0, %s4212_s13  ;;  %43 = vrot.lane.b32.xlu1 %v4259_v0, %s4213_s14  ;;  %s4214_s0 = smov 124   ;;  %s4215_s15 = smov 108   ;;  %v4233_v5 = vmov 1983009808   ;;  %v31_v7 = vrot.slane %v4259_v0, 4  ;;  %vm662_vm0 = vcmask 1047556  }
   0x9   :  { %35 = vrot.lane.b32.xlu0 %v4259_v0, %s4214_s0  ;;  %s4216_s16 = smov 112   ;;  %s4217_s17 = smov 104   ;;  %v665_v6 = vunpack.c.l.s4 %v4233_v5  ;;  %v4236_v11 = vmov 1934713408   ;;  %v32_v28 = vrot.slane %v4267_v1, 4  ;;  %vm3229_vm1 = vcmask 31744  }
   0xa   :  { %s4218_s18 = smov 96   ;;  %s4219_s19 = smov 100   ;;  %v679_v12 = vunpack.c.l.s4 %v4236_v11  ;;  %vm3747_vm2 = vcmask 130112   ;;  %vm3751_vm3 = vcmask 195712   ;;  %vm3755_vm4 = vcmask 261312  }
   0xb   :  { %s4220_s20 = smov 92   ;;  %s4221_s21 = smov 84   ;;  %v4354_v9 = vunpack.c.0.s8 %v665_v6  ;;  %vm3759_vm5 = vcmask 326912   ;;  %vm3763_vm6 = vcmask 392512   ;;  %vm3767_vm7 = vcmask 458112  }
   0xc   :  { %s4222_s22 = smov 88   ;;  %s4223_s23 = smov 80   ;;  %v4370_v24 = vunpack.c.0.s8 %v679_v12  ;;  %vm3771_vm8 = vcmask 523712   ;;  %vm3775_vm9 = vcmask 589312   ;;  %vm3779_vm10 = vcmask 654912  }
   0xd   :  { %s4224_s24 = smov 72   ;;  %s4225_s25 = smov 76   ;;  %vm7158_vm11 = vcmask 720512   ;;  %vm7157_vm12 = vcmask 786112   ;;  %vm7156_vm13 = vcmask 851712   ;;  %vm7155_vm14 = vcmask 917312  }
   0xe   :  { %s4226_s26 = smov 68   ;;  %s4227_s27 = smov 60   ;;  %vm3799_vm15 = vcmask 982912  }
   0xf   :  { %s4228_s28 = smov 64   ;;  %s4229_s29 = smov 56  }
  0x10   :  { %53 = vrot.lane.b32.xlu2 %v4267_v1, %s4212_s13  ;;  %45 = vrot.lane.b32.xlu1 %v4267_v1, %s4213_s14  ;;  %s4230_s30 = smov 48   ;;  %s4231_s2 = smov 52  }
  0x11   :  { %37 = vrot.lane.b32.xlu0 %v4267_v1, %s4214_s0  ;;  %s4232_s3 = smov 44   ;;  %s4234_s4 = smov 36  }
  0x12   :  { %s4235_s5 = smov 40   ;;  %s4237_s6 = smov 32  }
  0x13   :  { %s4238_s7 = smov 24   ;;  %s4239_s8 = smov 28  }
  0x14   :  { %s4240_s9 = smov 20   ;;  %s4241_s10 = smov 12  }
  0x15   :  { %s7097_s11 = smov 8  }
  0x18   :  { %67 = vrot.lane.b32.xlu2 %v4259_v0, %s4215_s15  ;;  %61 = vrot.lane.b32.xlu1 %v4267_v1, %s4216_s16 }
  0x19   :  { %59 = vrot.lane.b32.xlu0 %v4259_v0, %s4216_s16 }
  0x20   :  { %77 = vrot.lane.b32.xlu2 %v4267_v1, %s4217_s17  ;;  %75 = vrot.lane.b32.xlu1 %v4259_v0, %s4217_s17 }
  0x21   :  { %69 = vrot.lane.b32.xlu0 %v4267_v1, %s4215_s15 }
  0x28   :  { %91 = vrot.lane.b32.xlu2 %v4259_v0, %s4218_s18  ;;  %85 = vrot.lane.b32.xlu1 %v4267_v1, %s4219_s19 }
  0x29   :  { %83 = vrot.lane.b32.xlu0 %v4259_v0, %s4219_s19 }
  0x30   :  { %101 = vrot.lane.b32.xlu2 %v4267_v1, %s4220_s20  ;;  %99 = vrot.lane.b32.xlu1 %v4259_v0, %s4220_s20 }
  0x31   :  { %93 = vrot.lane.b32.xlu0 %v4267_v1, %s4218_s18 }
  0x38   :  { %115 = vrot.lane.b32.xlu2 %v4259_v0, %s4221_s21  ;;  %109 = vrot.lane.b32.xlu1 %v4267_v1, %s4222_s22 }
  0x39   :  { %107 = vrot.lane.b32.xlu0 %v4259_v0, %s4222_s22 }
  0x40   :  { %125 = vrot.lane.b32.xlu2 %v4267_v1, %s4223_s23  ;;  %123 = vrot.lane.b32.xlu1 %v4259_v0, %s4223_s23 }
  0x41   :  { %117 = vrot.lane.b32.xlu0 %v4267_v1, %s4221_s21 }
  0x48   :  { %139 = vrot.lane.b32.xlu2 %v4259_v0, %s4224_s24  ;;  %133 = vrot.lane.b32.xlu1 %v4267_v1, %s4225_s25 }
  0x49   :  { %131 = vrot.lane.b32.xlu0 %v4259_v0, %s4225_s25 }
  0x50   :  { %149 = vrot.lane.b32.xlu2 %v4267_v1, %s4226_s26  ;;  %147 = vrot.lane.b32.xlu1 %v4259_v0, %s4226_s26 }
  0x51   :  { %141 = vrot.lane.b32.xlu0 %v4267_v1, %s4224_s24 }
  0x58   :  { %163 = vrot.lane.b32.xlu2 %v4259_v0, %s4227_s27  ;;  %157 = vrot.lane.b32.xlu1 %v4267_v1, %s4228_s28 }
  0x59   :  { %155 = vrot.lane.b32.xlu0 %v4259_v0, %s4228_s28 }
  0x60   :  { %173 = vrot.lane.b32.xlu2 %v4267_v1, %s4229_s29  ;;  %171 = vrot.lane.b32.xlu1 %v4259_v0, %s4229_s29 }
  0x61   :  { %165 = vrot.lane.b32.xlu0 %v4267_v1, %s4227_s27 }
  0x62   :  { %v52_v2 = vpop.permute.xlu2 %51 }
  0x63   :  { %v668_v8 = vrot.slane %v52_v2, 4 }
  0x68   :  { %187 = vrot.lane.b32.xlu2 %v4259_v0, %s4230_s30  ;;  %181 = vrot.lane.b32.xlu1 %v4267_v1, %s4231_s2 }
  0x69   :  { %179 = vrot.lane.b32.xlu0 %v4259_v0, %s4231_s2 }
  0x6a   :  { %v54_v3 = vpop.permute.xlu2 %53 }
  0x6b   :  { %v1564_v32 = vrot.slane %v54_v3, 4 }
  0x70   :  { %197 = vrot.lane.b32.xlu2 %v4267_v1, %s4232_s3  ;;  %195 = vrot.lane.b32.xlu1 %v4259_v0, %s4232_s3 }
  0x71   :  { %189 = vrot.lane.b32.xlu0 %v4267_v1, %s4230_s30 }
  0x72   :  { %v4347_v4 = vpop.permute.xlu2 %67 }
  0x78   :  { %211 = vrot.lane.b32.xlu2 %v4259_v0, %s4234_s4  ;;  %205 = vrot.lane.b32.xlu1 %v4267_v1, %s4235_s5 }
  0x79   :  { %203 = vrot.lane.b32.xlu0 %v4259_v0, %s4235_s5 }
  0x7a   :  { %v44_v10 = vpop.permute.xlu1 %43  ;;  %v4358_v13 = vpop.permute.xlu2 %77 }
  0x7b   :  { %v661_v14 = vrot.slane %v44_v10, 4  ;;  %v887_v15 = vsel %vm662_vm0, %v44_v10, %v31_v7  ;;  %v36_v16 = vpop.permute.xlu0 %35  ;;  %v1586_v58 = vrot.slane %v4358_v13, 4 }
  0x7c   :  { %v4362_v17 = vperm.slane %v887_v15, %v4354_v9  ;;  %v39_v18 = vrot.slane %v36_v16, 4  ;;  %v669_v19 = vsel %vm662_vm0, %v668_v8, %v36_v16  ;;  %v71_v8 = vrot.slane %v4347_v4, 4 }
  0x7d   :  { %v663_v20 = vsel %vm662_vm0, %v661_v14, %v4259_v0  ;;  %v673_v21 = vperm.slane %v669_v19, %v4354_v9 }
  0x7e   :  { %v667_v22 = vperm.slane %v663_v20, %v4354_v9  ;;  %v900_v23 = vrot.slane %v4362_v17, 4  ;;  %v893_v25 = vsel %vm662_vm0, %v52_v2, %v39_v18 }
  0x7f   :  { %v674_v26 = vrot.slane %v673_v21, 4  ;;  %v4374_v27 = vperm.slane %v893_v25, %v4354_v9 }
  0x80   :  { %v676_v29 = vrot.slane %v667_v22, 4  ;;  %221 = vrot.lane.b32.xlu2 %v4267_v1, %s4237_s6  ;;  %219 = vrot.lane.b32.xlu1 %v4259_v0, %s4237_s6 }
  0x81   :  { %v675_v30 = vsel %vm662_vm0, %v674_v26, %v667_v22  ;;  %v4384_v31 = vsel %vm662_vm0, %v4374_v27, %v900_v23  ;;  %213 = vrot.lane.b32.xlu0 %v4267_v1, %s4234_s4 }
  0x82   :  { %v4389_v33 = vsel %vm662_vm0, %v673_v21, %v676_v29  ;;  %v4392_v34 = vperm.slane %v675_v30, %v4370_v24  ;;  %v46_v35 = vpop.permute.xlu1 %45  ;;  %v4394_v36 = vpop.permute.xlu2 %91 }
  0x83   :  { %v1558_v37 = vrot.slane %v46_v35, 4  ;;  %v1783_v38 = vsel %vm662_vm0, %v46_v35, %v32_v28  ;;  %v38_v39 = vpop.permute.xlu0 %37 }
  0x84   :  { %2710 = vst [vmem:[#allocation1] ss:$2 sm:$0xff] %v4392_v34  ;;  %v4399_v40 = vperm.slane %v1783_v38, %v4354_v9  ;;  %v40_v42 = vrot.slane %v38_v39, 4  ;;  %v1565_v43 = vsel %vm662_vm0, %v1564_v32, %v38_v39 }
  0x85   :  { %v1559_v41 = vsel %vm662_vm0, %v1558_v37, %v4267_v1  ;;  %v4411_v48 = vperm.slane %v1565_v43, %v4354_v9 }
  0x86   :  { %7159 = vst [vmem:[#allocation8_spill] sm:$0xff] %v4399_v40  ;;  %v4405_v44 = vperm.slane %v1559_v41, %v4354_v9  ;;  %v1796_v45 = vrot.slane %v4399_v40, 4  ;;  %v1789_v46 = vsel %vm662_vm0, %v54_v3, %v40_v42 }
  0x87   :  { %v4414_v49 = vperm.slane %v1789_v46, %v4354_v9 }
  0x88   :  { %v1572_v47 = vrot.slane %v4405_v44, 4  ;;  %235 = vrot.lane.b32.xlu2 %v4259_v0, %s4238_s7  ;;  %229 = vrot.lane.b32.xlu1 %v4267_v1, %s4239_s8 }
  0x89   :  { %7160 = vst [vmem:[#allocation9_spill] sm:$0xff] %v4414_v49  ;;  %227 = vrot.lane.b32.xlu0 %v4259_v0, %s4239_s8  ;;  %v4428_v51 = vsel %vm662_vm0, %v4414_v49, %v1796_v45 }
  0x8a   :  { %v4424_v50 = vsel %vm662_vm0, %v4411_v48, %v1572_v47  ;;  %7162 = vst [vmem:[#allocation11_spill] sm:$0xff] %v4428_v51  ;;  %v62_v52 = vpop.permute.xlu1 %61  ;;  %v4430_v53 = vpop.permute.xlu2 %101  ;;  %v898_v47 = vrot.slane %v4374_v27, 4 }
  0x8b   :  { %7161 = vst [vmem:[#allocation10_spill] sm:$0xff] %v4424_v50  ;;  %v60_v54 = vpop.permute.xlu0 %59  ;;  %v64_v55 = vrot.slane %v62_v52, 4  ;;  %v1587_v2 = vsel %vm662_vm0, %v1586_v58, %v62_v52 }
  0x8c   :  { %v63_v60 = vrot.slane %v60_v54, 4  ;;  %v4458_v10 = vperm.slane %v1587_v2, %v4354_v9  ;;  %v899_v27 = vsel %vm662_vm0, %v898_v47, %v4362_v17 }
  0x8d   :  { %v1811_v61 = vsel %vm662_vm0, %v4358_v13, %v64_v55 }
  0x8e   :  { %v4446_v3 = vperm.slane %v1811_v61, %v4354_v9  ;;  %7164 = vst [vmem:[#allocation13_spill] sm:$0xff] %v4458_v10  ;;  %v1600_v26 = vrot.slane %v4458_v10, 4 }
  0x90   :  { %245 = vrot.lane.b32.xlu2 %v4267_v1, %s4240_s9  ;;  %243 = vrot.lane.b32.xlu1 %v4259_v0, %s4240_s9  ;;  %7163 = vst [vmem:[#allocation12_spill] sm:$0xff] %v4446_v3  ;;  %v1824_v13 = vrot.slane %v4446_v3, 4 }
  0x91   :  { %237 = vrot.lane.b32.xlu0 %v4267_v1, %s4238_s7 }
  0x92   :  { %v76_v56 = vpop.permute.xlu1 %75  ;;  %v4438_v57 = vpop.permute.xlu2 %115 }
  0x93   :  { %v70_v59 = vpop.permute.xlu0 %69  ;;  %v690_v62 = vrot.slane %v76_v56, 4  ;;  %v915_v63 = vsel %vm662_vm0, %v76_v56, %v63_v60  ;;  %v724_v45 = vrot.slane %v4438_v57, 4  ;;  %v95_v60 = vrot.slane %v4394_v36, 4 }
  0x94   :  { %v919_v6 = vperm.slane %v915_v63, %v4354_v9  ;;  %v72_v7 = vrot.slane %v70_v59, 4 }
  0x95   :  { %v691_v5 = vsel %vm662_vm0, %v690_v62, %v60_v54  ;;  %v4506_v54 = vld [vmem:[#allocation2 + $0x8] sm:$0xff] }
  0x96   :  { %v695_v18 = vperm.slane %v691_v5, %v4354_v9  ;;  %v928_v22 = vrot.slane %v919_v6, 4  ;;  %v4524_v5 = vperm.slane %v899_v27, %v4370_v24 }
  0x98   :  { %259 = vrot.lane.b32.xlu2 %v4259_v0, %s4241_s10  ;;  %253 = vrot.lane.b32.xlu1 %v4267_v1, %s4211_s12  ;;  %v704_v37 = vrot.slane %v695_v18, 4 }
  0x99   :  { %251 = vrot.lane.b32.xlu0 %v4259_v0, %s4211_s12 }
  0x9a   :  { %v86_v11 = vpop.permute.xlu1 %85  ;;  %v4460_v12 = vpop.permute.xlu2 %125 }
  0x9b   :  { %v1592_v14 = vrot.slane %v86_v11, 4  ;;  %v1817_v15 = vsel %vm662_vm0, %v86_v11, %v72_v7  ;;  %v84_v16 = vpop.permute.xlu0 %83 }
  0x9c   :  { %v4466_v19 = vperm.slane %v1817_v15, %v4354_v9  ;;  %v696_v20 = vrot.slane %v84_v16, 4  ;;  %v921_v21 = vsel %vm662_vm0, %v84_v16, %v71_v8 }
  0x9d   :  { %v1593_v23 = vsel %vm662_vm0, %v1592_v14, %v70_v59  ;;  %v925_v25 = vperm.slane %v921_v21, %v4354_v9  ;;  %v4532_v14 = vld [vmem:[#allocation2 + $0x18] sm:$0xff] }
  0x9e   :  { %7165 = vst [vmem:[#allocation14_spill] sm:$0xff] %v4466_v19  ;;  %v4473_v28 = vperm.slane %v1593_v23, %v4354_v9  ;;  %v4477_v29 = vsel %vm662_vm0, %v4466_v19, %v1824_v13  ;;  %v697_v30 = vsel %vm662_vm0, %v696_v20, %v4347_v4 }
  0x9f   :  { %7166 = vst [vmem:[#allocation15_spill] sm:$0xff] %v4477_v29  ;;  %v701_v32 = vperm.slane %v697_v30, %v4354_v9  ;;  %v4483_v35 = vsel %vm662_vm0, %v925_v25, %v928_v22  ;;  %v926_v55 = vrot.slane %v925_v25, 4 }
  0xa0   :  { %v4487_v38 = vsel %vm662_vm0, %v4473_v28, %v1600_v26  ;;  %269 = vrot.lane.b32.xlu2 %v4267_v1, %s7097_s11  ;;  %267 = vrot.lane.b32.xlu1 %v4259_v0, %s7097_s11  ;;  %s4243_s11 = smov 4  }
  0xa1   :  { %7167 = vst [vmem:[#allocation16_spill] sm:$0xff] %v4487_v38  ;;  %v702_v39 = vrot.slane %v701_v32, 4  ;;  %261 = vrot.lane.b32.xlu0 %v4267_v1, %s4241_s10  ;;  %v4496_v4 = vsel %vm662_vm0, %v701_v32, %v704_v37  ;;  %v927_v63 = vsel %vm662_vm0, %v926_v55, %v919_v6 }
  0xa2   :  { %v100_v41 = vpop.permute.xlu1 %99  ;;  %v4498_v42 = vpop.permute.xlu2 %139  ;;  %v4535_v6 = vperm.slane %v927_v63, %v4370_v24 }
  0xa3   :  { %v94_v43 = vpop.permute.xlu0 %93  ;;  %v703_v46 = vsel %vm662_vm0, %v702_v39, %v695_v18  ;;  %v725_v56 = vsel %vm662_vm0, %v724_v45, %v100_v41  ;;  %v103_v58 = vrot.slane %v100_v41, 4  ;;  %v104_v39 = vrot.slane %v4430_v53, 4 }
  0xa4   :  { %v4504_v52 = vperm.slane %v703_v46, %v4370_v24  ;;  %v729_v59 = vperm.slane %v725_v56, %v4354_v9  ;;  %v96_v8 = vrot.slane %v94_v43, 4 }
  0xa6   :  { %2712 = vst [vmem:[#allocation1 + $0x1] ss:$2 sm:$0xff] %v4504_v52  ;;  %v730_v11 = vrot.slane %v729_v59, 4 }
  0xa8   :  { %289 = vrot.lane.b32.xlu2 %v4506_v54, %s4214_s0  ;;  %277 = vrot.lane.b32.xlu1 %v4267_v1, %s4243_s11  ;;  %v949_v1 = vsel %vm662_vm0, %v4438_v57, %v103_v58 }
  0xa9   :  { %275 = vrot.lane.b32.xlu0 %v4259_v0, %s4243_s11  ;;  %v4543_v57 = vperm.slane %v949_v1, %v4354_v9  ;;  %v746_v1 = vrot.slane %v4498_v42, 4 }
  0xaa   :  { %v110_v61 = vpop.permute.xlu1 %109  ;;  %v4520_v62 = vpop.permute.xlu2 %149 }
  0xab   :  { %v108_v2 = vpop.permute.xlu0 %107  ;;  %v1614_v0 = vrot.slane %v110_v61, 4  ;;  %v1839_v18 = vsel %vm662_vm0, %v110_v61, %v96_v8 }
  0xac   :  { %v718_v17 = vrot.slane %v108_v2, 4  ;;  %v943_v7 = vsel %vm662_vm0, %v108_v2, %v95_v60  ;;  %v4562_v26 = vperm.slane %v1839_v18, %v4354_v9  ;;  %v128_v18 = vrot.slane %v4460_v12, 4 }
  0xad   :  { %v4530_v13 = vperm.slane %v943_v7, %v4354_v9  ;;  %v4537_v15 = vld.sshfl [vmem:[#allocation1] sm:$0xff pattern:$0x75316420] }
  0xae   :  { %v719_v16 = vsel %vm662_vm0, %v718_v17, %v4394_v36  ;;  %2729 = vst [vmem:[#allocation1] ss:$2 sm:$0xff] %v4524_v5  ;;  %v1615_v36 = vsel %vm662_vm0, %v1614_v0, %v94_v43  ;;  %v1852_v55 = vrot.slane %v4562_v26, 4 }
  0xaf   :  { %v723_v20 = vperm.slane %v719_v16, %v4354_v9  ;;  %v956_v21 = vrot.slane %v4530_v13, 4  ;;  %2730 = vst [vmem:[#allocation1 + $0x1] ss:$2 sm:$0xff] %v4535_v6  ;;  %v4574_v45 = vperm.slane %v1615_v36, %v4354_v9  ;;  %v1648_v36 = vrot.slane %v4520_v62, 4 }
  0xb0   :  { %299 = vrot.lane.b32.xlu2 %v4532_v14, %s4213_s14  ;;  %297 = vrot.lane.b32.xlu1 %v4506_v54, %s4213_s14  ;;  %7168 = vst [vmem:[#allocation17_spill] sm:$0xff] %v4562_v26 }
  0xb1   :  { %v731_v22 = vsel %vm662_vm0, %v730_v11, %v723_v20  ;;  %v732_v23 = vrot.slane %v723_v20, 4  ;;  %v4557_v25 = vsel %vm662_vm0, %v4543_v57, %v956_v21  ;;  %291 = vrot.lane.b32.xlu0 %v4532_v14, %s4214_s0  ;;  %7169 = vst [vmem:[#allocation18_spill] sm:$0xff] %v4574_v45  ;;  %v1628_v27 = vrot.slane %v4574_v45, 4 }
  0xb2   :  { %v4565_v30 = vperm.slane %v731_v22, %v4370_v24  ;;  %v124_v32 = vpop.permute.xlu1 %123  ;;  %v4567_v37 = vpop.permute.xlu2 %163 }
  0xb3   :  { %v4571_v41 = vsel %vm662_vm0, %v729_v59, %v732_v23  ;;  %v118_v43 = vpop.permute.xlu0 %117  ;;  %v127_v61 = vrot.slane %v124_v32, 4  ;;  %v747_v8 = vsel %vm662_vm0, %v746_v1, %v124_v32 }
  0xb4   :  { %2714 = vst [vmem:[#allocation1 + $0x10] ss:$2 sm:$0xff] %v4565_v30  ;;  %v1620_v46 = vrot.slane %v118_v43, 4  ;;  %v1845_v47 = vsel %vm662_vm0, %v118_v43, %v104_v39  ;;  %v751_v20 = vperm.slane %v747_v8, %v4354_v9 }
  0xb5   :  { %v4580_v56 = vperm.slane %v1845_v47, %v4354_v9  ;;  %v971_v7 = vsel %vm662_vm0, %v4498_v42, %v127_v61 }
  0xb6   :  { %v1621_v58 = vsel %vm662_vm0, %v1620_v46, %v4430_v53  ;;  %v975_v11 = vperm.slane %v971_v7, %v4354_v9  ;;  %v760_v61 = vrot.slane %v751_v20, 4 }
  0xb7   :  { %7170 = vst [vmem:[#allocation19_spill] sm:$0xff] %v4580_v56  ;;  %v4586_v59 = vperm.slane %v1621_v58, %v4354_v9  ;;  %v4590_v60 = vsel %vm662_vm0, %v4580_v56, %v1852_v55 }
  0xb8   :  { %7172 = vst [vmem:[#allocation21_spill] sm:$0xff] %v4590_v60  ;;  %313 = vrot.lane.b32.xlu2 %v4506_v54, %s4216_s16  ;;  %307 = vrot.lane.b32.xlu1 %v4532_v14, %s4212_s13  ;;  %v984_v39 = vrot.slane %v975_v11, 4 }
  0xb9   :  { %7171 = vst [vmem:[#allocation20_spill] sm:$0xff] %v4586_v59  ;;  %305 = vrot.lane.b32.xlu0 %v4506_v54, %s4212_s13  ;;  %v4600_v53 = vsel %vm662_vm0, %v4586_v59, %v1628_v27 }
  0xba   :  { %7173 = vst [vmem:[#allocation22_spill] sm:$0xff] %v4600_v53  ;;  %v134_v63 = vpop.permute.xlu1 %133  ;;  %v4602_v2 = vpop.permute.xlu2 %173 }
  0xbb   :  { %v132_v17 = vpop.permute.xlu0 %131  ;;  %v136_v0 = vrot.slane %v134_v63, 4 }
  0xbc   :  { %v135_v16 = vrot.slane %v132_v17, 4 }
  0xbd   :  { %v1873_v55 = vsel %vm662_vm0, %v4520_v62, %v136_v0 }
  0xc0   :  { %323 = vrot.lane.b32.xlu2 %v4532_v14, %s4215_s15  ;;  %321 = vrot.lane.b32.xlu1 %v4506_v54, %s4215_s15 }
  0xc1   :  { %315 = vrot.lane.b32.xlu0 %v4532_v14, %s4216_s16 }
  0xc2   :  { %v148_v42 = vpop.permute.xlu1 %147  ;;  %v4617_v21 = vpop.permute.xlu2 %187 }
  0xc3   :  { %v752_v22 = vrot.slane %v148_v42, 4  ;;  %v977_v23 = vsel %vm662_vm0, %v148_v42, %v135_v16  ;;  %v142_v32 = vpop.permute.xlu0 %141  ;;  %v1649_v16 = vsel %vm662_vm0, %v1648_v36, %v134_v63 }
  0xc4   :  { %v981_v43 = vperm.slane %v977_v23, %v4354_v9  ;;  %v1642_v46 = vrot.slane %v142_v32, 4  ;;  %v1867_v47 = vsel %vm662_vm0, %v142_v32, %v128_v18 }
  0xc5   :  { %v753_v58 = vsel %vm662_vm0, %v752_v22, %v132_v17  ;;  %v4627_v27 = vperm.slane %v1867_v47, %v4354_v9  ;;  %v4641_v17 = vperm.slane %v1873_v55, %v4354_v9  ;;  %v954_v47 = vrot.slane %v4543_v57, 4 }
  0xc6   :  { %v757_v1 = vperm.slane %v753_v58, %v4354_v9  ;;  %v4631_v7 = vsel %vm662_vm0, %v981_v43, %v984_v39  ;;  %v1643_v8 = vsel %vm662_vm0, %v1642_v46, %v4460_v12  ;;  %v4653_v12 = vperm.slane %v1649_v16, %v4354_v9 }
  0xc7   :  { %7174 = vst [vmem:[#allocation23_spill] sm:$0xff] %v4627_v27  ;;  %v4637_v18 = vperm.slane %v1643_v8, %v4354_v9  ;;  %v1880_v62 = vrot.slane %v4627_v27, 4  ;;  %v955_v58 = vsel %vm662_vm0, %v954_v47, %v4530_v13  ;;  %v1670_v13 = vrot.slane %v4602_v2, 4 }
  0xc8   :  { %7176 = vst [vmem:[#allocation25_spill] sm:$0xff] %v4641_v17  ;;  %v758_v0 = vrot.slane %v757_v1, 4  ;;  %v4644_v42 = vsel %vm662_vm0, %v757_v1, %v760_v61  ;;  %337 = vrot.lane.b32.xlu2 %v4506_v54, %s4219_s19  ;;  %331 = vrot.lane.b32.xlu1 %v4532_v14, %s4217_s17 }
  0xc9   :  { %7175 = vst [vmem:[#allocation24_spill] sm:$0xff] %v4637_v18  ;;  %329 = vrot.lane.b32.xlu0 %v4506_v54, %s4217_s17  ;;  %v1656_v36 = vrot.slane %v4637_v18, 4  ;;  %v4659_v22 = vsel %vm662_vm0, %v4641_v17, %v1880_v62 }
  0xca   :  { %7177 = vst [vmem:[#allocation26_spill] sm:$0xff] %v4653_v12  ;;  %v759_v63 = vsel %vm662_vm0, %v758_v0, %v751_v20  ;;  %v158_v23 = vpop.permute.xlu1 %157  ;;  %v4661_v32 = vpop.permute.xlu2 %197  ;;  %v982_v20 = vrot.slane %v981_v43, 4  ;;  %v4684_v43 = vperm.slane %v955_v58, %v4370_v24 }
  0xcb   :  { %7178 = vst [vmem:[#allocation27_spill] sm:$0xff] %v4659_v22  ;;  %v4664_v39 = vperm.slane %v759_v63, %v4370_v24  ;;  %v156_v46 = vpop.permute.xlu0 %155  ;;  %v4669_v55 = vsel %vm662_vm0, %v4653_v12, %v1656_v36  ;;  %v160_v61 = vrot.slane %v158_v23, 4 }
  0xcc   :  { %7179 = vst [vmem:[#allocation28_spill] sm:$0xff] %v4669_v55  ;;  %v983_v1 = vsel %vm662_vm0, %v982_v20, %v975_v11  ;;  %v159_v63 = vrot.slane %v156_v46, 4  ;;  %v1671_v20 = vsel %vm662_vm0, %v1670_v13, %v158_v23  ;;  %v167_v23 = vrot.slane %v4567_v37, 4 }
  0xcd   :  { %2716 = vst [vmem:[#allocation1 + $0x11] ss:$2 sm:$0xff] %v4664_v39  ;;  %v4688_v62 = vperm.slane %v983_v1, %v4370_v24  ;;  %v1895_v11 = vsel %vm662_vm0, %v4602_v2, %v160_v61 }
  0xce   :  { %v4699_v58 = vperm.slane %v1895_v11, %v4354_v9 }
  0xd0   :  { %347 = vrot.lane.b32.xlu2 %v4532_v14, %s4218_s18  ;;  %345 = vrot.lane.b32.xlu1 %v4506_v54, %s4218_s18  ;;  %7180 = vst [vmem:[#allocation29_spill] sm:$0xff] %v4699_v58  ;;  %v1908_v11 = vrot.slane %v4699_v58, 4 }
  0xd1   :  { %339 = vrot.lane.b32.xlu0 %v4532_v14, %s4219_s19 }
  0xd2   :  { %v172_v57 = vpop.permute.xlu1 %171  ;;  %v4681_v8 = vpop.permute.xlu2 %211 }
  0xd3   :  { %v166_v16 = vpop.permute.xlu0 %165  ;;  %v774_v36 = vrot.slane %v172_v57, 4  ;;  %v999_v47 = vsel %vm662_vm0, %v172_v57, %v159_v63  ;;  %v4713_v57 = vperm.slane %v1671_v20, %v4354_v9 }
  0xd4   :  { %v4690_v0 = vld.sshfl [vmem:[#allocation1 + $0x10] sm:$0xff pattern:$0x75316420]  ;;  %v4707_v61 = vperm.slane %v999_v47, %v4354_v9  ;;  %v168_v1 = vrot.slane %v166_v16, 4 }
  0xd5   :  { %2731 = vst [vmem:[#allocation1 + $0x10] ss:$2 sm:$0xff] %v4684_v43  ;;  %v775_v2 = vsel %vm662_vm0, %v774_v36, %v156_v46  ;;  %v1684_v58 = vrot.slane %v4713_v57, 4 }
  0xd6   :  { %2732 = vst [vmem:[#allocation1 + $0x11] ss:$2 sm:$0xff] %v4688_v62  ;;  %v779_v47 = vperm.slane %v775_v2, %v4354_v9  ;;  %v1012_v20 = vrot.slane %v4707_v61, 4 }
  0xd7   :  { %7181 = vst [vmem:[#allocation30_spill] sm:$0xff] %v4713_v57 }
  0xd8   :  { %361 = vrot.lane.b32.xlu2 %v4506_v54, %s4222_s22  ;;  %355 = vrot.lane.b32.xlu1 %v4532_v14, %s4220_s20 }
  0xd9   :  { %353 = vrot.lane.b32.xlu0 %v4506_v54, %s4220_s20 }
  0xda   :  { %v182_v13 = vpop.permute.xlu1 %181  ;;  %v4715_v63 = vpop.permute.xlu2 %221 }
  0xdb   :  { %v1676_v22 = vrot.slane %v182_v13, 4  ;;  %v1901_v46 = vsel %vm662_vm0, %v182_v13, %v168_v1  ;;  %v180_v36 = vpop.permute.xlu0 %179 }
  0xdc   :  { %v4721_v60 = vperm.slane %v1901_v46, %v4354_v9  ;;  %v780_v55 = vrot.slane %v180_v36, 4  ;;  %v1005_v53 = vsel %vm662_vm0, %v180_v36, %v167_v23 }
  0xdd   :  { %v1677_v29 = vsel %vm662_vm0, %v1676_v22, %v166_v16  ;;  %v4727_v51 = vperm.slane %v1005_v53, %v4354_v9  ;;  %v788_v53 = vrot.slane %v779_v47, 4 }
  0xde   :  { %7182 = vst [vmem:[#allocation31_spill] sm:$0xff] %v4721_v60  ;;  %v4731_v1 = vperm.slane %v1677_v29, %v4354_v9  ;;  %v4735_v2 = vsel %vm662_vm0, %v4721_v60, %v1908_v11  ;;  %v781_v13 = vsel %vm662_vm0, %v780_v55, %v4567_v37 }
  0xdf   :  { %7184 = vst [vmem:[#allocation33_spill] sm:$0xff] %v4735_v2  ;;  %v785_v23 = vperm.slane %v781_v13, %v4354_v9  ;;  %v4742_v22 = vsel %vm662_vm0, %v4727_v51, %v1012_v20 }
  0xe0   :  { %7183 = vst [vmem:[#allocation32_spill] sm:$0xff] %v4731_v1  ;;  %v4746_v16 = vsel %vm662_vm0, %v4731_v1, %v1684_v58  ;;  %371 = vrot.lane.b32.xlu2 %v4532_v14, %s4221_s21  ;;  %369 = vrot.lane.b32.xlu1 %v4506_v54, %s4221_s21  ;;  %v808_v58 = vrot.slane %v4681_v8, 4 }
  0xe1   :  { %7185 = vst [vmem:[#allocation34_spill] sm:$0xff] %v4742_v22  ;;  %v786_v29 = vrot.slane %v785_v23, 4  ;;  %363 = vrot.lane.b32.xlu0 %v4532_v14, %s4222_s22  ;;  %v4755_v37 = vsel %vm662_vm0, %v785_v23, %v788_v53 }
  0xe2   :  { %7186 = vst [vmem:[#allocation35_spill] sm:$0xff] %v4746_v16  ;;  %v196_v55 = vpop.permute.xlu1 %195  ;;  %v4757_v11 = vpop.permute.xlu2 %235 }
  0xe3   :  { %7187 = vst [vmem:[#allocation36_spill] sm:$0xff] %v4755_v37  ;;  %v190_v46 = vpop.permute.xlu0 %189  ;;  %v787_v36 = vsel %vm662_vm0, %v786_v29, %v779_v47  ;;  %v809_v13 = vsel %vm662_vm0, %v808_v58, %v196_v55  ;;  %v199_v2 = vrot.slane %v196_v55, 4  ;;  %v191_v47 = vrot.slane %v4617_v21, 4 }
  0xe4   :  { %v4762_v20 = vperm.slane %v787_v36, %v4370_v24  ;;  %v813_v23 = vperm.slane %v809_v13, %v4354_v9  ;;  %v192_v60 = vrot.slane %v190_v46, 4 }
  0xe5   :  { %v1033_v55 = vsel %vm662_vm0, %v4681_v8, %v199_v2 }
  0xe6   :  { %2718 = vst [vmem:[#allocation1 + $0x20] ss:$2 sm:$0xff] %v4762_v20  ;;  %v814_v57 = vrot.slane %v813_v23, 4  ;;  %v1037_v50 = vperm.slane %v1033_v55, %v4354_v9 }
  0xe8   :  { %385 = vrot.lane.b32.xlu2 %v4506_v54, %s4225_s25  ;;  %379 = vrot.lane.b32.xlu1 %v4532_v14, %s4223_s23 }
  0xe9   :  { %377 = vrot.lane.b32.xlu0 %v4506_v54, %s4223_s23 }
  0xea   :  { %v206_v53 = vpop.permute.xlu1 %205  ;;  %v4774_v29 = vpop.permute.xlu2 %245 }
  0xeb   :  { %v204_v36 = vpop.permute.xlu0 %203  ;;  %v1698_v1 = vrot.slane %v206_v53, 4  ;;  %v1923_v27 = vsel %vm662_vm0, %v206_v53, %v192_v60 }
  0xec   :  { %v802_v58 = vrot.slane %v204_v36, 4  ;;  %v1027_v16 = vsel %vm662_vm0, %v204_v36, %v191_v47 }
  0xed   :  { %v1031_v13 = vperm.slane %v1027_v16, %v4354_v9  ;;  %v1699_v8 = vsel %vm662_vm0, %v1698_v1, %v190_v46  ;;  %v1010_v1 = vrot.slane %v4727_v51, 4  ;;  %v1038_v46 = vrot.slane %v1037_v50, 4 }
  0xee   :  { %v803_v38 = vsel %vm662_vm0, %v802_v58, %v4617_v21  ;;  %v4810_v36 = vperm.slane %v1699_v8, %v4354_v9 }
  0xef   :  { %v807_v26 = vperm.slane %v803_v38, %v4354_v9  ;;  %v1040_v18 = vrot.slane %v1031_v13, 4  ;;  %v4797_v38 = vperm.slane %v1923_v27, %v4354_v9  ;;  %v1011_v51 = vsel %vm662_vm0, %v1010_v1, %v4707_v61 }
  0xf0   :  { %395 = vrot.lane.b32.xlu2 %v4532_v14, %s4224_s24  ;;  %393 = vrot.lane.b32.xlu1 %v4506_v54, %s4224_s24  ;;  %7191 = vst [vmem:[#allocation40_spill] sm:$0xff] %v4810_v36  ;;  %v1039_v8 = vsel %vm662_vm0, %v1038_v46, %v1031_v13 }
  0xf1   :  { %v815_v2 = vsel %vm662_vm0, %v814_v57, %v807_v26  ;;  %v816_v16 = vrot.slane %v807_v26, 4  ;;  %v4792_v21 = vsel %vm662_vm0, %v1037_v50, %v1040_v18  ;;  %387 = vrot.lane.b32.xlu0 %v4532_v14, %s4225_s25  ;;  %7189 = vst [vmem:[#allocation38_spill] sm:$0xff] %v4797_v38  ;;  %v200_v57 = vrot.slane %v4661_v32, 4 }
  0xf2   :  { %7188 = vst [vmem:[#allocation37_spill] sm:$0xff] %v4792_v21  ;;  %v4800_v60 = vperm.slane %v815_v2, %v4370_v24  ;;  %v220_v47 = vpop.permute.xlu1 %219  ;;  %v4802_v53 = vpop.permute.xlu2 %259  ;;  %v1936_v58 = vrot.slane %v4797_v38, 4  ;;  %v1712_v50 = vrot.slane %v4810_v36, 4  ;;  %v4847_v46 = vperm.slane %v1039_v8, %v4370_v24 }
  0xf3   :  { %v4807_v26 = vsel %vm662_vm0, %v813_v23, %v816_v16  ;;  %v214_v18 = vpop.permute.xlu0 %213  ;;  %v223_v61 = vrot.slane %v220_v47, 4 }
  0xf4   :  { %7190 = vst [vmem:[#allocation39_spill] sm:$0xff] %v4807_v26  ;;  %v1704_v27 = vrot.slane %v214_v18, 4  ;;  %v1929_v55 = vsel %vm662_vm0, %v214_v18, %v200_v57 }
  0xf5   :  { %2720 = vst [vmem:[#allocation1 + $0x21] ss:$2 sm:$0xff] %v4800_v60  ;;  %v4816_v2 = vperm.slane %v1929_v55, %v4354_v9  ;;  %v830_v55 = vrot.slane %v4757_v11, 4 }
  0xf6   :  { %v1705_v23 = vsel %vm662_vm0, %v1704_v27, %v4661_v32  ;;  %v4838_v32 = vperm.slane %v1011_v51, %v4370_v24  ;;  %v1055_v51 = vsel %vm662_vm0, %v4757_v11, %v223_v61 }
  0xf7   :  { %7192 = vst [vmem:[#allocation41_spill] sm:$0xff] %v4816_v2  ;;  %v4825_v16 = vperm.slane %v1705_v23, %v4354_v9  ;;  %v4829_v57 = vsel %vm662_vm0, %v4816_v2, %v1936_v58  ;;  %v831_v23 = vsel %vm662_vm0, %v830_v55, %v220_v47  ;;  %v1732_v55 = vrot.slane %v4774_v29, 4 }
  0xf8   :  { %7194 = vst [vmem:[#allocation43_spill] sm:$0xff] %v4829_v57  ;;  %409 = vrot.lane.b32.xlu2 %v4506_v54, %s4228_s28  ;;  %403 = vrot.lane.b32.xlu1 %v4532_v14, %s4226_s26  ;;  %v835_v11 = vperm.slane %v831_v23, %v4354_v9 }
  0xf9   :  { %7193 = vst [vmem:[#allocation42_spill] sm:$0xff] %v4825_v16  ;;  %401 = vrot.lane.b32.xlu0 %v4506_v54, %s4226_s26  ;;  %v4842_v13 = vsel %vm662_vm0, %v4825_v16, %v1712_v50  ;;  %v4858_v50 = vperm.slane %v1055_v51, %v4354_v9 }
  0xfa   :  { %7195 = vst [vmem:[#allocation44_spill] sm:$0xff] %v4842_v13  ;;  %v230_v1 = vpop.permute.xlu1 %229  ;;  %v4844_v18 = vpop.permute.xlu2 %269  ;;  %v224_v13 = vrot.slane %v4715_v63, 4  ;;  %v844_v59 = vrot.slane %v835_v11, 4 }
  0xfb   :  { %v228_v58 = vpop.permute.xlu0 %227  ;;  %v232_v8 = vrot.slane %v230_v1, 4  ;;  %v1068_v36 = vrot.slane %v4858_v50, 4 }
  0xfc   :  { %v4849_v27 = vld.sshfl [vmem:[#allocation1 + $0x20] sm:$0xff pattern:$0x75316420]  ;;  %v231_v57 = vrot.slane %v228_v58, 4 }
  0xfd   :  { %2733 = vst [vmem:[#allocation1 + $0x20] ss:$2 sm:$0xff] %v4838_v32  ;;  %v1957_v23 = vsel %vm662_vm0, %v4774_v29, %v232_v8 }
  0xfe   :  { %2734 = vst [vmem:[#allocation1 + $0x21] ss:$2 sm:$0xff] %v4847_v46 }
 0x100   :  { %419 = vrot.lane.b32.xlu2 %v4532_v14, %s4227_s27  ;;  %417 = vrot.lane.b32.xlu1 %v4506_v54, %s4227_s27 }
 0x101   :  { %411 = vrot.lane.b32.xlu0 %v4532_v14, %s4228_s28 }
 0x102   :  { %v244_v61 = vpop.permute.xlu1 %243  ;;  %v4868_v47 = vpop.permute.xlu2 %289 }
 0x103   :  { %v836_v51 = vrot.slane %v244_v61, 4  ;;  %v1061_v38 = vsel %vm662_vm0, %v244_v61, %v231_v57  ;;  %v238_v2 = vpop.permute.xlu0 %237 }
 0x104   :  { %v4874_v16 = vperm.slane %v1061_v38, %v4354_v9  ;;  %v1726_v17 = vrot.slane %v238_v2, 4  ;;  %v1951_v45 = vsel %vm662_vm0, %v238_v2, %v224_v13  ;;  %v1733_v2 = vsel %vm662_vm0, %v1732_v55, %v230_v1 }
 0x105   :  { %v837_v56 = vsel %vm662_vm0, %v836_v51, %v228_v58  ;;  %v4881_v12 = vperm.slane %v1951_v45, %v4354_v9  ;;  %v4896_v45 = vperm.slane %v1957_v23, %v4354_v9 }
 0x106   :  { %v841_v57 = vperm.slane %v837_v56, %v4354_v9  ;;  %v4886_v61 = vsel %vm662_vm0, %v4874_v16, %v1068_v36  ;;  %v1727_v38 = vsel %vm662_vm0, %v1726_v17, %v4715_v63  ;;  %v4908_v17 = vperm.slane %v1733_v2, %v4354_v9 }
 0x107   :  { %7196 = vst [vmem:[#allocation45_spill] sm:$0xff] %v4881_v12  ;;  %v4892_v13 = vperm.slane %v1727_v38, %v4354_v9  ;;  %v1964_v29 = vrot.slane %v4881_v12, 4  ;;  %v1754_v2 = vrot.slane %v4844_v18, 4 }
 0x108   :  { %7197 = vst [vmem:[#allocation46_spill] sm:$0xff] %v4886_v61  ;;  %v842_v58 = vrot.slane %v841_v57, 4  ;;  %v4899_v56 = vsel %vm662_vm0, %v841_v57, %v844_v59  ;;  %433 = vrot.lane.b32.xlu2 %v4506_v54, %s4231_s2  ;;  %427 = vrot.lane.b32.xlu1 %v4532_v14, %s4229_s29 }
 0x109   :  { %7198 = vst [vmem:[#allocation47_spill] sm:$0xff] %v4892_v13  ;;  %425 = vrot.lane.b32.xlu0 %v4506_v54, %s4229_s29  ;;  %v1740_v36 = vrot.slane %v4892_v13, 4  ;;  %v4914_v59 = vsel %vm662_vm0, %v4896_v45, %v1964_v29 }
 0x10a   :  { %7199 = vst [vmem:[#allocation48_spill] sm:$0xff] %v4896_v45  ;;  %v843_v63 = vsel %vm662_vm0, %v842_v58, %v835_v11  ;;  %v254_v1 = vpop.permute.xlu1 %253  ;;  %v4916_v8 = vpop.permute.xlu2 %299 }
 0x10b   :  { %7200 = vst [vmem:[#allocation49_spill] sm:$0xff] %v4899_v56  ;;  %v4919_v55 = vperm.slane %v843_v63, %v4370_v24  ;;  %v252_v51 = vpop.permute.xlu0 %251  ;;  %v4923_v23 = vsel %vm662_vm0, %v4908_v17, %v1740_v36  ;;  %v256_v11 = vrot.slane %v254_v1, 4 }
 0x10c   :  { %7201 = vst [vmem:[#allocation50_spill] sm:$0xff] %v4908_v17  ;;  %v255_v58 = vrot.slane %v252_v51, 4 }
 0x10d   :  { %7202 = vst [vmem:[#allocation51_spill] sm:$0xff] %v4914_v59  ;;  %v1979_v63 = vsel %vm662_vm0, %v4844_v18, %v256_v11  ;;  %v263_v18 = vrot.slane %v4802_v53, 4 }
 0x10e   :  { %7203 = vst [vmem:[#allocation52_spill] sm:$0xff] %v4919_v55  ;;  %v4940_v12 = vperm.slane %v1979_v63, %v4354_v9 }
 0x10f   :  { %7204 = vst [vmem:[#allocation53_spill] sm:$0xff] %v4923_v23  ;;  %v1755_v23 = vsel %vm662_vm0, %v1754_v2, %v254_v1 }
 0x110   :  { %2722 = vst [vmem:[#allocation1 + $0x30] ss:$2 sm:$0xff] %v4919_v55  ;;  %443 = vrot.lane.b32.xlu2 %v4532_v14, %s4230_s30  ;;  %441 = vrot.lane.b32.xlu1 %v4506_v54, %s4230_s30  ;;  %v4952_v1 = vperm.slane %v1755_v23, %v4354_v9 }
 0x111   :  { %435 = vrot.lane.b32.xlu0 %v4532_v14, %s4231_s2  ;;  %7205 = vst [vmem:[#allocation54_spill] sm:$0xff] %v4940_v12 }
 0x112   :  { %v268_v57 = vpop.permute.xlu1 %267  ;;  %v4932_v38 = vpop.permute.xlu2 %313  ;;  %7206 = vst [vmem:[#allocation55_spill] sm:$0xff] %v4952_v1 }
 0x113   :  { %v262_v29 = vpop.permute.xlu0 %261  ;;  %v858_v36 = vrot.slane %v268_v57, 4  ;;  %v1083_v59 = vsel %vm662_vm0, %v268_v57, %v255_v58  ;;  %v1992_v57 = vrot.slane %v4940_v12, 4  ;;  %v1768_v12 = vrot.slane %v4952_v1, 4 }
 0x114   :  { %v1087_v13 = vperm.slane %v1083_v59, %v4354_v9  ;;  %v264_v17 = vrot.slane %v262_v29, 4 }
 0x115   :  { %v859_v45 = vsel %vm662_vm0, %v858_v36, %v252_v51 }
 0x116   :  { %v863_v51 = vperm.slane %v859_v45, %v4354_v9  ;;  %v1096_v21 = vrot.slane %v1087_v13, 4 }
 0x118   :  { %457 = vrot.lane.b32.xlu2 %v4506_v54, %s4235_s5  ;;  %451 = vrot.lane.b32.xlu1 %v4532_v14, %s4232_s3 }
 0x119   :  { %449 = vrot.lane.b32.xlu0 %v4506_v54, %s4232_s3 }
 0x11a   :  { %v278_v11 = vpop.permute.xlu1 %277  ;;  %v4961_v56 = vpop.permute.xlu2 %323 }
 0x11b   :  { %v1760_v2 = vrot.slane %v278_v11, 4  ;;  %v1985_v58 = vsel %vm662_vm0, %v278_v11, %v264_v17  ;;  %v276_v63 = vpop.permute.xlu0 %275 }
 0x11c   :  { %v4958_v59 = vperm.slane %v1985_v58, %v4354_v9  ;;  %v864_v36 = vrot.slane %v276_v63, 4  ;;  %v1089_v61 = vsel %vm662_vm0, %v276_v63, %v263_v18 }
 0x11d   :  { %v1761_v23 = vsel %vm662_vm0, %v1760_v2, %v262_v29  ;;  %v1093_v22 = vperm.slane %v1089_v61, %v4354_v9  ;;  %v872_v29 = vrot.slane %v863_v51, 4  ;;  %v286_v2 = vrot.slane %v4532_v14, 4 }
 0x11e   :  { %7207 = vst [vmem:[#allocation56_spill] sm:$0xff] %v4958_v59  ;;  %v4967_v17 = vperm.slane %v1761_v23, %v4354_v9  ;;  %v4971_v45 = vsel %vm662_vm0, %v4958_v59, %v1992_v57  ;;  %v865_v11 = vsel %vm662_vm0, %v864_v36, %v4802_v53  ;;  %v2006_v53 = vrot.slane %v4916_v8, 4 }
 0x11f   :  { %7209 = vst [vmem:[#allocation58_spill] sm:$0xff] %v4971_v45  ;;  %v869_v18 = vperm.slane %v865_v11, %v4354_v9  ;;  %v4977_v58 = vsel %vm662_vm0, %v1093_v22, %v1096_v21  ;;  %v1066_v23 = vrot.slane %v4874_v16, 4  ;;  %v1094_v59 = vrot.slane %v1093_v22, 4 }
 0x120   :  { %7208 = vst [vmem:[#allocation57_spill] sm:$0xff] %v4967_v17  ;;  %v4981_v61 = vsel %vm662_vm0, %v4967_v17, %v1768_v12  ;;  %467 = vrot.lane.b32.xlu2 %v4532_v14, %s4234_s4  ;;  %465 = vrot.lane.b32.xlu1 %v4506_v54, %s4234_s4  ;;  %v285_v12 = vrot.slane %v4506_v54, 4 }
 0x121   :  { %7210 = vst [vmem:[#allocation59_spill] sm:$0xff] %v4977_v58  ;;  %v870_v57 = vrot.slane %v869_v18, 4  ;;  %459 = vrot.lane.b32.xlu0 %v4532_v14, %s4235_s5  ;;  %v4991_v21 = vsel %vm662_vm0, %v869_v18, %v872_v29  ;;  %v2007_v18 = vsel %vm662_vm0, %v2006_v53, %v4532_v14 }
 0x122   :  { %7211 = vst [vmem:[#allocation60_spill] sm:$0xff] %v4981_v61  ;;  %v298_v63 = vpop.permute.xlu1 %297  ;;  %v2231_v61 = vsel %vm662_vm0, %v4916_v8, %v286_v2  ;;  %v338_v17 = vpop.permute.xlu2 %337  ;;  %v5021_v8 = vperm.slane %v2007_v18, %v4354_v9 }
 0x123   :  { %7212 = vst [vmem:[#allocation61_spill] sm:$0xff] %v4991_v21  ;;  %v292_v36 = vpop.permute.xlu0 %291  ;;  %v871_v11 = vsel %vm662_vm0, %v870_v57, %v863_v51  ;;  %v1110_v29 = vrot.slane %v298_v63, 4  ;;  %v1335_v1 = vsel %vm662_vm0, %v298_v63, %v285_v12  ;;  %v1067_v51 = vsel %vm662_vm0, %v1066_v23, %v4858_v50 }
 0x124   :  { %v4998_v45 = vperm.slane %v871_v11, %v4370_v24  ;;  %v5007_v16 = vperm.slane %v1335_v1, %v4354_v9  ;;  %v5012_v57 = vperm.slane %v2231_v61, %v4354_v9  ;;  %7215 = vst [vmem:[#allocation64_spill] sm:$0xff] %v5021_v8  ;;  %v294_v1 = vrot.slane %v292_v36, 4 }
 0x125   :  { %v1111_v22 = vsel %vm662_vm0, %v1110_v29, %v4506_v54  ;;  %v293_v50 = vrot.slane %v4868_v47, 4  ;;  %v1095_v61 = vsel %vm662_vm0, %v1094_v59, %v1087_v13  ;;  %v5029_v12 = vperm.slane %v1067_v51, %v4370_v24 }
 0x126   :  { %7213 = vst [vmem:[#allocation62_spill] sm:$0xff] %v4998_v45  ;;  %v1115_v2 = vperm.slane %v1111_v22, %v4354_v9  ;;  %v1348_v63 = vrot.slane %v5007_v16, 4  ;;  %v2244_v29 = vrot.slane %v5012_v57, 4  ;;  %v5039_v59 = vperm.slane %v1095_v61, %v4370_v24 }
 0x127   :  { %2724 = vst [vmem:[#allocation1 + $0x31] ss:$2 sm:$0xff] %v4998_v45  ;;  %v2020_v51 = vrot.slane %v5021_v8, 4 }
 0x128   :  { %7214 = vst [vmem:[#allocation63_spill] sm:$0xff] %v5012_v57  ;;  %481 = vrot.lane.b32.xlu2 %v4506_v54, %s4239_s8  ;;  %475 = vrot.lane.b32.xlu1 %v4532_v14, %s4237_s6 }
 0x129   :  { %473 = vrot.lane.b32.xlu0 %v4506_v54, %s4237_s6  ;;  %7216 = vst [vmem:[#allocation65_spill] sm:$0xff] %v5029_v12 }
 0x12a   :  { %v308_v53 = vpop.permute.xlu1 %307  ;;  %7218 = vst [vmem:[#allocation67_spill] sm:$0xff] %v5039_v59 }
 0x12b   :  { %v2012_v23 = vrot.slane %v308_v53, 4  ;;  %v2237_v11 = vsel %vm662_vm0, %v308_v53, %v294_v1  ;;  %v306_v18 = vpop.permute.xlu0 %305  ;;  %v1124_v53 = vrot.slane %v1115_v2, 4 }
 0x12c   :  { %v5035_v58 = vperm.slane %v2237_v11, %v4354_v9  ;;  %v1116_v21 = vrot.slane %v306_v18, 4  ;;  %v1341_v13 = vsel %vm662_vm0, %v306_v18, %v293_v50  ;;  %v5070_v18 = vpop.permute.xlu2 %347 }
 0x12d   :  { %v2013_v22 = vsel %vm662_vm0, %v2012_v23, %v292_v36  ;;  %v5044_v26 = vperm.slane %v1341_v13, %v4354_v9  ;;  %v1144_v13 = vrot.slane %v338_v17, 4 }
 0x12e   :  { %7217 = vst [vmem:[#allocation66_spill] sm:$0xff] %v5035_v58  ;;  %v5046_v1 = vld.sshfl [vmem:[#allocation1 + $0x30] sm:$0xff pattern:$0x75316420]  ;;  %v5049_v57 = vperm.slane %v2013_v22, %v4354_v9  ;;  %v5053_v11 = vsel %vm662_vm0, %v5035_v58, %v2244_v29  ;;  %v1117_v50 = vsel %vm662_vm0, %v1116_v21, %v4868_v47 }
 0x12f   :  { %7220 = vst [vmem:[#allocation69_spill] sm:$0xff] %v5053_v11  ;;  %v1121_v36 = vperm.slane %v1117_v50, %v4354_v9  ;;  %v5061_v61 = vsel %vm662_vm0, %v5044_v26, %v1348_v63  ;;  %v5083_v50 = vld.sshfl [vmem:[#allocation1] sm:$0xff pattern:$0x75316420] }
 0x130   :  { %7219 = vst [vmem:[#allocation68_spill] sm:$0xff] %v5049_v57  ;;  %v5066_v23 = vsel %vm662_vm0, %v5049_v57, %v2020_v51  ;;  %491 = vrot.lane.b32.xlu2 %v4532_v14, %s4238_s7  ;;  %489 = vrot.lane.b32.xlu1 %v4506_v54, %s4238_s7 }
 0x131   :  { %2735 = vst [vmem:[#allocation1 + $0x30] ss:$2 sm:$0xff] %v5029_v12  ;;  %v1122_v47 = vrot.slane %v1121_v36, 4  ;;  %483 = vrot.lane.b32.xlu0 %v4532_v14, %s4239_s8  ;;  %v5077_v21 = vsel %vm662_vm0, %v1121_v36, %v1124_v53 }
 0x132   :  { %2736 = vst [vmem:[#allocation1 + $0x31] ss:$2 sm:$0xff] %v5039_v59  ;;  %v322_v63 = vpop.permute.xlu1 %321 }
 0x133   :  { %7221 = vst [vmem:[#allocation70_spill] sm:$0xff] %v5066_v23  ;;  %v316_v29 = vpop.permute.xlu0 %315  ;;  %v1123_v51 = vsel %vm662_vm0, %v1122_v47, %v1115_v2  ;;  %v1145_v11 = vsel %vm662_vm0, %v1144_v13, %v322_v63  ;;  %v325_v23 = vrot.slane %v322_v63, 4  ;;  %v317_v2 = vrot.slane %v4932_v38, 4 }
 0x134   :  { %v5081_v22 = vperm.slane %v1123_v51, %v4370_v24  ;;  %v5089_v53 = vpop.permute.xlu2 %361  ;;  %v1149_v36 = vperm.slane %v1145_v11, %v4354_v9  ;;  %v318_v12 = vrot.slane %v316_v29, 4 }
 0x135   :  { %v1369_v51 = vsel %vm662_vm0, %v338_v17, %v325_v23 }
 0x136   :  { %2741 = vst [vmem:[#allocation1] ss:$2 sm:$0xff] %v5081_v22  ;;  %v1150_v58 = vrot.slane %v1149_v36, 4  ;;  %v1373_v55 = vperm.slane %v1369_v51, %v4354_v9 }
 0x138   :  { %505 = vrot.lane.b32.xlu2 %v4506_v54, %s4211_s12  ;;  %499 = vrot.lane.b32.xlu1 %v4532_v14, %s4240_s9 }
 0x139   :  { %497 = vrot.lane.b32.xlu0 %v4506_v54, %s4240_s9 }
 0x13a   :  { %v332_v47 = vpop.permute.xlu1 %331 }
 0x13b   :  { %v330_v13 = vpop.permute.xlu0 %329  ;;  %v2034_v45 = vrot.slane %v332_v47, 4  ;;  %v2259_v8 = vsel %vm662_vm0, %v332_v47, %v318_v12 }
 0x13c   :  { %v1138_v63 = vrot.slane %v330_v13, 4  ;;  %v1363_v59 = vsel %vm662_vm0, %v330_v13, %v317_v2  ;;  %v5107_v17 = vpop.permute.xlu2 %371 }
 0x13d   :  { %v1367_v11 = vperm.slane %v1363_v59, %v4354_v9  ;;  %v2035_v23 = vsel %vm662_vm0, %v2034_v45, %v316_v29  ;;  %v1346_v45 = vrot.slane %v5044_v26, 4  ;;  %v1374_v29 = vrot.slane %v1373_v55, 4 }
 0x13e   :  { %v1139_v37 = vsel %vm662_vm0, %v1138_v63, %v4932_v38  ;;  %v5130_v47 = vperm.slane %v2035_v23, %v4354_v9 }
 0x13f   :  { %v1143_v57 = vperm.slane %v1139_v37, %v4354_v9  ;;  %v1376_v3 = vrot.slane %v1367_v11, 4  ;;  %v5119_v37 = vperm.slane %v2259_v8, %v4354_v9  ;;  %v1347_v26 = vsel %vm662_vm0, %v1346_v45, %v5007_v16 }
 0x140   :  { %515 = vrot.lane.b32.xlu2 %v4532_v14, %s4241_s10  ;;  %513 = vrot.lane.b32.xlu1 %v4506_v54, %s4241_s10  ;;  %7223 = vst [vmem:[#allocation72_spill] sm:$0xff] %v5130_v47  ;;  %v1375_v23 = vsel %vm662_vm0, %v1374_v29, %v1367_v11 }
 0x141   :  { %v1151_v2 = vsel %vm662_vm0, %v1150_v58, %v1143_v57  ;;  %v1152_v59 = vrot.slane %v1143_v57, 4  ;;  %v5112_v13 = vsel %vm662_vm0, %v1373_v55, %v1376_v3  ;;  %507 = vrot.lane.b32.xlu0 %v4532_v14, %s4211_s12  ;;  %7222 = vst [vmem:[#allocation71_spill] sm:$0xff] %v5119_v37  ;;  %v326_v58 = vrot.slane %v4961_v56, 4  ;;  %s7227_s12 = smov 8  }
 0x142   :  { %v5122_v38 = vperm.slane %v1151_v2, %v4370_v24  ;;  %v346_v12 = vpop.permute.xlu1 %345  ;;  %v2272_v63 = vrot.slane %v5119_v37, 4  ;;  %v2048_v55 = vrot.slane %v5130_v47, 4  ;;  %v5167_v29 = vperm.slane %v1375_v23, %v4370_v24 }
 0x143   :  { %v5127_v3 = vsel %vm662_vm0, %v1149_v36, %v1152_v59  ;;  %v340_v57 = vpop.permute.xlu0 %339  ;;  %v349_v16 = vrot.slane %v346_v12, 4 }
 0x144   :  { %2742 = vst [vmem:[#allocation1 + $0x1] ss:$2 sm:$0xff] %v5122_v38  ;;  %v2040_v8 = vrot.slane %v340_v57, 4  ;;  %v2265_v51 = vsel %vm662_vm0, %v340_v57, %v326_v58  ;;  %v5153_v57 = vpop.permute.xlu2 %385 }
 0x145   :  { %v5136_v2 = vperm.slane %v2265_v51, %v4354_v9  ;;  %v1166_v51 = vrot.slane %v5089_v53, 4 }
 0x146   :  { %v2041_v36 = vsel %vm662_vm0, %v2040_v8, %v4961_v56  ;;  %v5160_v56 = vperm.slane %v1347_v26, %v4370_v24  ;;  %v686_v26 = vrot.slane %v4392_v34, 4 }
 0x147   :  { %7224 = vst [vmem:[#allocation73_spill] sm:$0xff] %v5136_v2  ;;  %v5145_v59 = vperm.slane %v2041_v36, %v4354_v9  ;;  %v5149_v58 = vsel %vm662_vm0, %v5136_v2, %v2272_v63  ;;  %v1167_v36 = vsel %vm662_vm0, %v1166_v51, %v346_v12  ;;  %v350_v2 = vrot.slane %v5070_v18, 4 }
 0x148   :  { %7226 = vst [vmem:[#allocation75_spill] sm:$0xff] %v5149_v58  ;;  %529 = vrot.lane.b32.xlu2 %v4506_v54, %s4243_s11  ;;  %523 = vrot.lane.b32.xlu1 %v4532_v14, %s7227_s12  ;;  %v714_v58 = vrot.slane %v4504_v52, 4  ;;  %v687_v34 = vsel %vm662_vm0, 0.0, %v686_v26  ;;  %v2068_v12 = vrot.slane %v5107_v17, 4 }
 0x149   :  { %7225 = vst [vmem:[#allocation74_spill] sm:$0xff] %v5145_v59  ;;  %521 = vrot.lane.b32.xlu0 %v4506_v54, %s7227_s12  ;;  %v5164_v11 = vsel %vm662_vm0, %v5145_v59, %v2048_v55  ;;  %v1391_v54 = vsel %vm662_vm0, %v5089_v53, %v349_v16  ;;  %v1171_v53 = vperm.slane %v1167_v36, %v4354_v9 }
 0x14a   :  { %7228 = vst [vmem:[#allocation76_spill] sm:$0xff] %v5164_v11  ;;  %v356_v45 = vpop.permute.xlu1 %355  ;;  %v5179_v55 = vperm.slane %v1391_v54, %v4354_v9  ;;  %v715_v36 = vsel %vm662_vm0, 0.0, %v714_v58 }
 0x14b   :  { %v5169_v8 = vld.sshfl [vmem:[#allocation1] sm:$0xff pattern:$0x75316420]  ;;  %v354_v63 = vpop.permute.xlu0 %353  ;;  %v358_v11 = vrot.slane %v356_v45, 4 }
 0x14c   :  { %2753 = vst [vmem:[#allocation1] ss:$2 sm:$0xff] %v5160_v56  ;;  %v5181_v23 = vpop.permute.xlu2 %395  ;;  %v357_v37 = vrot.slane %v354_v63, 4  ;;  %v1404_v52 = vrot.slane %v5179_v55, 4 }
 0x14d   :  { %2754 = vst [vmem:[#allocation1 + $0x1] ss:$2 sm:$0xff] %v5167_v29  ;;  %v2293_v26 = vsel %vm662_vm0, %v5107_v17, %v358_v11 }
 0x151   :  { %531 = vrot.lane.b32.xlu0 %v4532_v14, %s4243_s11 }
 0x152   :  { %v370_v16 = vpop.permute.xlu1 %369 }
 0x153   :  { %v1172_v51 = vrot.slane %v370_v16, 4  ;;  %v1397_v54 = vsel %vm662_vm0, %v370_v16, %v357_v37  ;;  %v364_v47 = vpop.permute.xlu0 %363  ;;  %v1180_v16 = vrot.slane %v1171_v53, 4 }
 0x154   :  { %v5191_v59 = vld.sshfl [vmem:[#allocation1] sm:$0xff pattern:$0x75316420]  ;;  %v5195_v40 = vperm.slane %v1397_v54, %v4354_v9  ;;  %v2062_v14 = vrot.slane %v364_v47, 4  ;;  %v2287_v19 = vsel %vm662_vm0, %v364_v47, %v350_v2  ;;  %v2069_v2 = vsel %vm662_vm0, %v2068_v12, %v356_v45 }
 0x155   :  { %2765 = vst [vmem:[#allocation1] ss:$2 sm:$0xff] %v687_v34  ;;  %v1173_v49 = vsel %vm662_vm0, %v1172_v51, %v354_v63  ;;  %v5203_v37 = vperm.slane %v2287_v19, %v4354_v9  ;;  %v5218_v19 = vperm.slane %v2293_v26, %v4354_v9  ;;  %v5223_v63 = vpop.permute.xlu2 %409  ;;  %v910_v34 = vrot.slane %v4524_v5, 4 }
 0x156   :  { %2766 = vst [vmem:[#allocation1 + $0x1] ss:$2 sm:$0xff] %v715_v36  ;;  %v1177_v10 = vperm.slane %v1173_v49, %v4354_v9  ;;  %v5208_v54 = vsel %vm662_vm0, %v5195_v40, %v1404_v52  ;;  %v2063_v47 = vsel %vm662_vm0, %v2062_v14, %v5070_v18  ;;  %v938_v18 = vrot.slane %v4535_v6, 4 }
 0x157   :  { %7229 = vst [vmem:[#allocation77_spill] sm:$0xff] %v5203_v37  ;;  %v5214_v17 = vperm.slane %v2063_v47, %v4354_v9  ;;  %v2300_v58 = vrot.slane %v5203_v37, 4  ;;  %v5228_v45 = vperm.slane %v2069_v2, %v4354_v9  ;;  %v911_v6 = vsel %vm662_vm0, 0.0, %v910_v34 }
 0x158   :  { %7230 = vst [vmem:[#allocation78_spill] sm:$0xff] %v5208_v54  ;;  %v1178_v11 = vrot.slane %v1177_v10, 4  ;;  %v5221_v49 = vsel %vm662_vm0, %v1177_v10, %v1180_v16  ;;  %v5247_v16 = vld.sshfl [vmem:[#allocation1 + $0x10] sm:$0xff pattern:$0x75316420]  ;;  %v2090_v34 = vrot.slane %v5181_v23, 4 }
 0x159   :  { %7231 = vst [vmem:[#allocation79_spill] sm:$0xff] %v5214_v17  ;;  %v2076_v51 = vrot.slane %v5214_v17, 4  ;;  %v5234_v52 = vsel %vm662_vm0, %v5218_v19, %v2300_v58  ;;  %v1134_v58 = vrot.slane %v5081_v22, 4 }
 0x15a   :  { %7232 = vst [vmem:[#allocation80_spill] sm:$0xff] %v5218_v19  ;;  %v1179_v12 = vsel %vm662_vm0, %v1178_v11, %v1171_v53  ;;  %v380_v14 = vpop.permute.xlu1 %379  ;;  %v939_v53 = vsel %vm662_vm0, 0.0, %v938_v18 }
 0x15b   :  { %7233 = vst [vmem:[#allocation81_spill] sm:$0xff] %v5228_v45  ;;  %v378_v10 = vpop.permute.xlu0 %377  ;;  %v5237_v36 = vperm.slane %v1179_v12, %v4370_v24  ;;  %v5241_v5 = vsel %vm662_vm0, %v5228_v45, %v2076_v51  ;;  %v382_v47 = vrot.slane %v380_v14, 4  ;;  %v1162_v12 = vrot.slane %v5122_v38, 4 }
 0x15c   :  { %7234 = vst [vmem:[#allocation82_spill] sm:$0xff] %v5234_v52  ;;  %v381_v52 = vrot.slane %v378_v10, 4  ;;  %v2091_v22 = vsel %vm662_vm0, %v2090_v34, %v380_v14  ;;  %v1358_v45 = vrot.slane %v5160_v56, 4 }
 0x15d   :  { %7235 = vst [vmem:[#allocation83_spill] sm:$0xff] %v5241_v5  ;;  %v5244_v26 = vld.sshfl [vmem:[#allocation1] sm:$0xff pattern:$0x75316420]  ;;  %v5250_v2 = vpop.permute.xlu2 %419  ;;  %v2315_v18 = vsel %vm662_vm0, %v5181_v23, %v382_v47  ;;  %v1163_v19 = vsel %vm662_vm0, 0.0, %v1162_v12  ;;  %v1386_v12 = vrot.slane %v5167_v29, 4 }
 0x15e   :  { %2777 = vst [vmem:[#allocation1] ss:$2 sm:$0xff] %v911_v6  ;;  %v5264_v38 = vperm.slane %v2315_v18, %v4354_v9 }
 0x15f   :  { %2778 = vst [vmem:[#allocation1 + $0x1] ss:$2 sm:$0xff] %v939_v53  ;;  %v1135_v53 = vsel %vm662_vm0, 0.0, %v1134_v58 }
 0x160   :  { %2743 = vst [vmem:[#allocation1 + $0x10] ss:$2 sm:$0xff] %v5237_v36 }
 0x161   :  { %7237 = vst [vmem:[#allocation85_spill] sm:$0xff] %v5264_v38 }
 0x162   :  { %v394_v11 = vpop.permute.xlu1 %393 }
 0x163   :  { %v388_v51 = vpop.permute.xlu0 %387  ;;  %v1194_v6 = vrot.slane %v394_v11, 4  ;;  %v1419_v37 = vsel %vm662_vm0, %v394_v11, %v381_v52  ;;  %v389_v52 = vrot.slane %v5153_v57, 4  ;;  %v5275_v11 = vperm.slane %v2091_v22, %v4354_v9 }
 0x164   :  { %v5268_v23 = vperm.slane %v1419_v37, %v4354_v9  ;;  %v390_v47 = vrot.slane %v388_v51, 4 }
 0x165   :  { %v1195_v17 = vsel %vm662_vm0, %v1194_v6, %v378_v10  ;;  %v5270_v58 = vpop.permute.xlu2 %433  ;;  %7238 = vst [vmem:[#allocation86_spill] sm:$0xff] %v5275_v11 }
 0x166   :  { %v5258_v5 = vld.sshfl [vmem:[#allocation1] sm:$0xff pattern:$0x75316420]  ;;  %v1199_v18 = vperm.slane %v1195_v17, %v4354_v9  ;;  %v1432_v22 = vrot.slane %v5268_v23, 4 }
 0x167   :  { %7236 = vst [vmem:[#allocation84_spill] sm:$0xff] %v5258_v5 }
 0x168   :  { %2789 = vst [vmem:[#allocation1] ss:$2 sm:$0xff] %v1135_v53 }
 0x169   :  { %2790 = vst [vmem:[#allocation1 + $0x1] ss:$2 sm:$0xff] %v1163_v19  ;;  %v2328_v19 = vrot.slane %v5264_v38, 4  ;;  %v2104_v38 = vrot.slane %v5275_v11, 4 }
 0x16a   :  { %v404_v14 = vpop.permute.xlu1 %403 }
 0x16b   :  { %v2096_v34 = vrot.slane %v404_v14, 4  ;;  %v2321_v10 = vsel %vm662_vm0, %v404_v14, %v390_v47  ;;  %v402_v37 = vpop.permute.xlu0 %401 }
 0x16c   :  { %v5282_v6 = vperm.slane %v2321_v10, %v4354_v9  ;;  %v1200_v56 = vrot.slane %v402_v37, 4  ;;  %v1425_v53 = vsel %vm662_vm0, %v402_v37, %v389_v52  ;;  %v1359_v52 = vsel %vm662_vm0, 0.0, %v1358_v45 }
 0x16d   :  { %v2097_v5 = vsel %vm662_vm0, %v2096_v34, %v388_v51  ;;  %v1429_v29 = vperm.slane %v1425_v53, %v4354_v9  ;;  %v1208_v10 = vrot.slane %v1199_v18, 4  ;;  %v5312_v37 = vpop.permute.xlu2 %443 }
 0x16e   :  { %7239 = vst [vmem:[#allocation87_spill] sm:$0xff] %v5282_v6  ;;  %v5290_v54 = vperm.slane %v2097_v5, %v4354_v9  ;;  %v5294_v17 = vsel %vm662_vm0, %v5282_v6, %v2328_v19  ;;  %v1201_v47 = vsel %vm662_vm0, %v1200_v56, %v5153_v57  ;;  %v1387_v5 = vsel %vm662_vm0, 0.0, %v1386_v12  ;;  %v2739_v6 = vld.sshfl [vmem:[#allocation1 + $0x20] sm:$0xff pattern:$0x75316420] }
 0x16f   :  { %7240 = vst [vmem:[#allocation88_spill] sm:$0xff] %v5294_v17  ;;  %v1205_v51 = vperm.slane %v1201_v47, %v4354_v9  ;;  %v5303_v34 = vsel %vm662_vm0, %v1429_v29, %v1432_v22  ;;  %v3233_v57 = vsel %vm3229_vm1, %v4690_v0, -inf  ;;  %v3230_v12 = vsel %vm3229_vm1, %v4537_v15, -inf }
 0x170   :  { %v5299_v14 = vld.sshfl [vmem:[#allocation1] sm:$0xff pattern:$0x75316420]  ;;  %v5308_v19 = vsel %vm662_vm0, %v5290_v54, %v2104_v38  ;;  %v1228_v38 = vrot.slane %v5270_v58, 4  ;;  %v1402_v0 = vrot.slane %v5195_v40, 4  ;;  %v3239_v40 = vsel %vm3229_vm1, %v5046_v1, -inf }
 0x171   :  { %2801 = vst [vmem:[#allocation1] ss:$2 sm:$0xff] %v1359_v52  ;;  %v1206_v45 = vrot.slane %v1205_v51, 4  ;;  %3234 = vmax.xlane.f32.xlu2 %v3233_v57  ;;  %v5315_v56 = vsel %vm662_vm0, %v1205_v51, %v1208_v10  ;;  %v1430_v51 = vrot.slane %v1429_v29, 4  ;;  %v5333_v10 = vperm.slane %v4496_v4, %v4370_v24 }
 0x172   :  { %7241 = vst [vmem:[#allocation89_spill] sm:$0xff] %v5308_v19  ;;  %v418_v53 = vpop.permute.xlu1 %417  ;;  %3231 = vmax.xlane.f32.xlu1 %v3230_v12  ;;  %v413_v4 = vrot.slane %v5223_v63, 4  ;;  %v3242_v1 = vsel %vm3229_vm1, %v5083_v50, -inf }
 0x173   :  { %2802 = vst [vmem:[#allocation1 + $0x1] ss:$2 sm:$0xff] %v1387_v5  ;;  %v412_v22 = vpop.permute.xlu0 %411  ;;  %v1207_v47 = vsel %vm662_vm0, %v1206_v45, %v1199_v18  ;;  %v5327_v5 = vperm.slane %v4389_v33, %v4370_v24  ;;  %v1229_v15 = vsel %vm662_vm0, %v1228_v38, %v418_v53  ;;  %v421_v18 = vrot.slane %v418_v53, 4 }
 0x174   :  { %v5323_v52 = vperm.slane %v1207_v47, %v4370_v24  ;;  %v1403_v33 = vsel %vm662_vm0, %v1402_v0, %v5179_v55  ;;  %v1233_v29 = vperm.slane %v1229_v15, %v4354_v9  ;;  %v3236_v53 = vsel %vm3229_vm1, %v4849_v27, -inf }
 0x175   :  { %v5343_v45 = vpop.permute.xlu2 %457  ;;  %v1431_v38 = vsel %vm662_vm0, %v1430_v51, %v5268_v23  ;;  %v5354_v47 = vperm.slane %v1403_v33, %v4370_v24  ;;  %v1453_v0 = vsel %vm662_vm0, %v5270_v58, %v421_v18  ;;  %v414_v17 = vrot.slane %v412_v22, 4 }
 0x176   :  { %2744 = vst [vmem:[#allocation1 + $0x11] ss:$2 sm:$0xff] %v5323_v52  ;;  %v1234_v27 = vrot.slane %v1233_v29, 4  ;;  %v5363_v23 = vperm.slane %v1431_v38, %v4370_v24  ;;  %v5369_v58 = vperm.slane %v1453_v0, %v4354_v9  ;;  %v5376_v38 = vperm.slane %v4384_v31, %v4370_v24 }
 0x177   :  { %v688_v11 = vrot.slane %v5327_v5, 4 }
 0x179   :  { %3240 = vmax.xlane.f32.xlu2 %v3239_v40 }
 0x17a   :  { %v5335_v57 = vld.sshfl [vmem:[#allocation1] sm:$0xff pattern:$0x75316420]  ;;  %v428_v12 = vpop.permute.xlu1 %427  ;;  %3243 = vmax.xlane.f32.xlu1 %v3242_v1 }
 0x17b   :  { %2813 = vst [vmem:[#allocation1] ss:$2 sm:$0xff] %v5327_v5  ;;  %3237 = vmax.xlane.f32.xlu0 %v3236_v53  ;;  %v426_v55 = vpop.permute.xlu0 %425  ;;  %v2118_v19 = vrot.slane %v428_v12, 4  ;;  %v2740_v53 = vld.sshfl [vmem:[#allocation1 + $0x30] sm:$0xff pattern:$0x75316420]  ;;  %v2343_v18 = vsel %vm662_vm0, %v428_v12, %v414_v17 }
 0x17c   :  { %2814 = vst [vmem:[#allocation1 + $0x1] ss:$2 sm:$0xff] %v5333_v10  ;;  %v1222_v15 = vrot.slane %v426_v55, 4  ;;  %v1447_v40 = vsel %vm662_vm0, %v426_v55, %v413_v4  ;;  %v5380_v55 = vperm.slane %v4483_v35, %v4370_v24  ;;  %v5395_v35 = vperm.slane %v2343_v18, %v4354_v9 }
 0x17d   :  { %v5360_v50 = vperm.slane %v1447_v40, %v4354_v9  ;;  %v2750_v51 = vld.sshfl [vmem:[#allocation1 + $0x10] sm:$0xff pattern:$0x75316420]  ;;  %v2119_v17 = vsel %vm662_vm0, %v2118_v19, %v412_v22  ;;  %v468_v40 = vpop.permute.xlu2 %467  ;;  %v3248_v19 = vsel %vm3229_vm1, %v2739_v6, -inf  ;;  %v3251_v22 = vsel %vm3229_vm1, %v2740_v53, -inf }
 0x17e   :  { %v1223_v33 = vsel %vm662_vm0, %v1222_v15, %v5223_v63  ;;  %2755 = vst [vmem:[#allocation1 + $0x10] ss:$2 sm:$0xff] %v5354_v47  ;;  %v3245_v63 = vsel %vm3229_vm1, %v5247_v16, -inf }
 0x17f   :  { %v1227_v4 = vperm.slane %v1223_v33, %v4354_v9  ;;  %v1460_v1 = vrot.slane %v5360_v50, 4  ;;  %2756 = vst [vmem:[#allocation1 + $0x11] ss:$2 sm:$0xff] %v5363_v23 }
 0x180   :  { %7243 = vst [vmem:[#allocation91_spill] sm:$0xff] %v5395_v35 }
 0x181   :  { %v1235_v12 = vsel %vm662_vm0, %v1234_v27, %v1227_v4  ;;  %v1236_v15 = vrot.slane %v1227_v4, 4  ;;  %v5391_v31 = vsel %vm662_vm0, %v5369_v58, %v1460_v1  ;;  %3246 = vmax.xlane.f32.xlu2 %v3245_v63  ;;  %v742_v27 = vrot.slane %v4565_v30, 4 }
 0x182   :  { %v5398_v16 = vperm.slane %v1235_v12, %v4370_v24  ;;  %v442_v33 = vpop.permute.xlu1 %441  ;;  %v770_v4 = vrot.slane %v4664_v39, 4  ;;  %v422_v1 = vrot.slane %v5250_v2, 4  ;;  %3252 = vmax.xlane.f32.xlu1 %v3251_v22  ;;  %v5410_v12 = vperm.slane %v2119_v17, %v4354_v9 }
 0x183   :  { %v5385_v0 = vld.sshfl [vmem:[#allocation1] sm:$0xff pattern:$0x75316420]  ;;  %v5407_v63 = vsel %vm662_vm0, %v1233_v29, %v1236_v15  ;;  %3249 = vmax.xlane.f32.xlu0 %v3248_v19  ;;  %v436_v18 = vpop.permute.xlu0 %435  ;;  %v2356_v39 = vrot.slane %v5395_v35, 4 }
 0x184   :  { %7242 = vst [vmem:[#allocation90_spill] sm:$0xff] %v5385_v0  ;;  %v2124_v6 = vrot.slane %v436_v18, 4  ;;  %v2349_v30 = vsel %vm662_vm0, %v436_v18, %v422_v1  ;;  %v743_v0 = vsel %vm662_vm0, 0.0, %v742_v27  ;;  %v771_v29 = vsel %vm662_vm0, 0.0, %v770_v4 }
 0x185   :  { %2825 = vst [vmem:[#allocation1] ss:$2 sm:$0xff] %v5376_v38  ;;  %v5416_v53 = vperm.slane %v2349_v30, %v4354_v9  ;;  %v2132_v19 = vrot.slane %v5410_v12, 4  ;;  %v3254_v27 = vsel %vm3229_vm1, %v5169_v8, -inf  ;;  %v5436_v4 = vperm.slane %v5077_v21, %v4370_v24 }
 0x186   :  { %2826 = vst [vmem:[#allocation1 + $0x1] ss:$2 sm:$0xff] %v5380_v55  ;;  %v5420_v15 = vld.sshfl [vmem:[#allocation1 + $0x10] sm:$0xff pattern:$0x75316420]  ;;  %v2125_v17 = vsel %vm662_vm0, %v2124_v6, %v5250_v2  ;;  %v445_v18 = vrot.slane %v442_v33, 4  ;;  %v5440_v2 = vperm.slane %v5127_v3, %v4370_v24 }
 0x187   :  { %7244 = vst [vmem:[#allocation92_spill] sm:$0xff] %v5410_v12  ;;  %v5426_v22 = vperm.slane %v2125_v17, %v4354_v9  ;;  %v5430_v1 = vsel %vm662_vm0, %v5416_v53, %v2356_v39  ;;  %v3257_v8 = vsel %vm3229_vm1, %v2750_v51, -inf  ;;  %v2152_v39 = vrot.slane %v468_v40, 4  ;;  %v5449_v17 = vpop.permute.xlu2 %481 }
 0x188   :  { %2745 = vst [vmem:[#allocation1 + $0x20] ss:$2 sm:$0xff] %v5398_v16  ;;  %v1250_v21 = vrot.slane %v5343_v45, 4 }
 0x189   :  { %7245 = vst [vmem:[#allocation93_spill] sm:$0xff] %v5416_v53  ;;  %3255 = vmax.xlane.f32.xlu2 %v3254_v27  ;;  %v5446_v6 = vsel %vm662_vm0, %v5426_v22, %v2132_v19  ;;  %v966_v27 = vrot.slane %v4684_v43, 4  ;;  %v994_v19 = vrot.slane %v4688_v62, 4 }
 0x18a   :  { %2767 = vst [vmem:[#allocation1 + $0x10] ss:$2 sm:$0xff] %v743_v0  ;;  %v452_v30 = vpop.permute.xlu1 %451  ;;  %v1251_v35 = vsel %vm662_vm0, %v1250_v21, %v442_v33  ;;  %v5476_v33 = vperm.slane %v5112_v13, %v4370_v24 }
 0x18b   :  { %7246 = vst [vmem:[#allocation94_spill] sm:$0xff] %v5426_v22  ;;  %3258 = vmax.xlane.f32.xlu0 %v3257_v8  ;;  %v450_v3 = vpop.permute.xlu0 %449  ;;  %v2153_v51 = vsel %vm662_vm0, %v2152_v39, %v452_v30  ;;  %v967_v8 = vsel %vm662_vm0, 0.0, %v966_v27  ;;  %v995_v62 = vsel %vm662_vm0, 0.0, %v994_v19  ;;  %v3266_v39 = vsel %vm3229_vm1, %v5191_v59, -inf }
 0x18c   :  { %7247 = vst [vmem:[#allocation95_spill] sm:$0xff] %v5430_v1  ;;  %v1475_v1 = vsel %vm662_vm0, %v5343_v45, %v445_v18  ;;  %v5471_v45 = vperm.slane %v5061_v61, %v4370_v24  ;;  %v453_v18 = vrot.slane %v450_v3, 4  ;;  %v1218_v22 = vrot.slane %v5323_v52, 4 }
 0x18d   :  { %2768 = vst [vmem:[#allocation1 + $0x11] ss:$2 sm:$0xff] %v771_v29  ;;  %v5442_v0 = vld.sshfl [vmem:[#allocation1] sm:$0xff pattern:$0x75316420]  ;;  %v454_v29 = vrot.slane %v452_v30, 4  ;;  %v5466_v43 = vperm.slane %v1475_v1, %v4354_v9  ;;  %v1255_v1 = vperm.slane %v1251_v35, %v4354_v9 }
 0x18e   :  { %7248 = vst [vmem:[#allocation96_spill] sm:$0xff] %v5442_v0 }
 0x18f   :  { %7249 = vst [vmem:[#allocation97_spill] sm:$0xff] %v5446_v6  ;;  %v2377_v6 = vsel %vm662_vm0, %v468_v40, %v454_v29  ;;  %v2157_v40 = vperm.slane %v2153_v51, %v4354_v9  ;;  %v492_v21 = vpop.permute.xlu2 %491  ;;  %v1190_v29 = vrot.slane %v5237_v36, 4 }
 0x190   :  { %2837 = vst [vmem:[#allocation1] ss:$2 sm:$0xff] %v5436_v4  ;;  %v2381_v53 = vperm.slane %v2377_v6, %v4354_v9  ;;  %v446_v6 = vrot.slane %v5312_v37, 4 }
 0x191   :  { %2838 = vst [vmem:[#allocation1 + $0x1] ss:$2 sm:$0xff] %v5440_v2  ;;  %v2158_v36 = vrot.slane %v2157_v40, 4 }
 0x192   :  { %v466_v30 = vpop.permute.xlu1 %465  ;;  %v2382_v27 = vrot.slane %v2381_v53, 4 }
 0x193   :  { %v1256_v19 = vrot.slane %v466_v30, 4  ;;  %v1481_v51 = vsel %vm662_vm0, %v466_v30, %v453_v18  ;;  %v460_v13 = vpop.permute.xlu0 %459  ;;  %3267 = vmax.xlane.f32.xlu0 %v3266_v39  ;;  %v1264_v30 = vrot.slane %v1255_v1, 4 }
 0x194   :  { %v5463_v12 = vld.sshfl [vmem:[#allocation1 + $0x10] sm:$0xff pattern:$0x75316420]  ;;  %v1485_v35 = vperm.slane %v1481_v51, %v4354_v9  ;;  %v2371_v59 = vsel %vm662_vm0, %v460_v13, %v446_v6 }
 0x195   :  { %2779 = vst [vmem:[#allocation1 + $0x10] ss:$2 sm:$0xff] %v967_v8  ;;  %v1488_v8 = vrot.slane %v5466_v43, 4  ;;  %v2375_v18 = vperm.slane %v2371_v59, %v4354_v9 }
 0x196   :  { %2780 = vst [vmem:[#allocation1 + $0x11] ss:$2 sm:$0xff] %v995_v62  ;;  %v2146_v62 = vrot.slane %v460_v13, 4 }
 0x197   :  { %v5496_v0 = vsel %vm662_vm0, %v1485_v35, %v1488_v8  ;;  %v5502_v13 = vsel %vm662_vm0, %v2382_v27, %v2375_v18  ;;  %v2384_v52 = vrot.slane %v2375_v18, 4  ;;  %v1191_v8 = vsel %vm662_vm0, 0.0, %v1190_v29 }
 0x198   :  { %v5482_v61 = vld.sshfl [vmem:[#allocation1] sm:$0xff pattern:$0x75316420]  ;;  %v2147_v51 = vsel %vm662_vm0, %v2146_v62, %v5312_v37  ;;  %7251 = vst [vmem:[#allocation99_spill] sm:$0xff] %v5502_v13  ;;  %v1219_v62 = vsel %vm662_vm0, 0.0, %v1218_v22 }
 0x199   :  { %7250 = vst [vmem:[#allocation98_spill] sm:$0xff] %v5482_v61  ;;  %v1257_v61 = vsel %vm662_vm0, %v1256_v19, %v450_v3  ;;  %v2151_v6 = vperm.slane %v2147_v51, %v4354_v9  ;;  %v5518_v5 = vsel %vm662_vm0, %v2381_v53, %v2384_v52  ;;  %v689_v51 = vsel %vm662_vm0, 0.0, %v688_v11 }
 0x19a   :  { %2849 = vst [vmem:[#allocation1] ss:$2 sm:$0xff] %v5471_v45  ;;  %v1261_v39 = vperm.slane %v1257_v61, %v4354_v9  ;;  %v716_v61 = vrot.slane %v5333_v10, 4  ;;  %v1414_v53 = vrot.slane %v5354_v47, 4  ;;  %v1442_v52 = vrot.slane %v5363_v23, 4 }
 0x19b   :  { %2850 = vst [vmem:[#allocation1 + $0x1] ss:$2 sm:$0xff] %v5476_v33  ;;  %v5513_v37 = vsel %vm662_vm0, %v2158_v36, %v2151_v6  ;;  %v2160_v18 = vrot.slane %v2151_v6, 4  ;;  %v474_v29 = vpop.permute.xlu0 %473 }
 0x19c   :  { %v1262_v3 = vrot.slane %v1261_v39, 4  ;;  %v5506_v19 = vsel %vm662_vm0, %v1261_v39, %v1264_v30  ;;  %7252 = vst [vmem:[#allocation100_spill] sm:$0xff] %v5518_v5  ;;  %v476_v30 = vpop.permute.xlu1 %475  ;;  %v2174_v39 = vrot.slane %v492_v21, 4  ;;  %v1443_v47 = vsel %vm662_vm0, 0.0, %v1442_v52 }
 0x19d   :  { %v5510_v59 = vld.sshfl [vmem:[#allocation1 + $0x10] sm:$0xff pattern:$0x75316420]  ;;  %v5527_v22 = vsel %vm662_vm0, %v2157_v40, %v2160_v18  ;;  %v478_v6 = vrot.slane %v476_v30, 4  ;;  %v912_v40 = vrot.slane %v5376_v38, 4  ;;  %v1415_v18 = vsel %vm662_vm0, 0.0, %v1414_v53 }
 0x19e   :  { %2791 = vst [vmem:[#allocation1 + $0x10] ss:$2 sm:$0xff] %v1191_v8  ;;  %v1263_v27 = vsel %vm662_vm0, %v1262_v3, %v1255_v1  ;;  %v5529_v8 = vpop.permute.xlu2 %505  ;;  %v717_v1 = vsel %vm662_vm0, 0.0, %v716_v61  ;;  %v1458_v3 = vrot.slane %v5369_v58, 4  ;;  %v2175_v11 = vsel %vm662_vm0, %v2174_v39, %v476_v30 }
 0x19f   :  { %2792 = vst [vmem:[#allocation1 + $0x11] ss:$2 sm:$0xff] %v1219_v62  ;;  %v5521_v10 = vperm.slane %v1263_v27, %v4370_v24  ;;  %v940_v62 = vrot.slane %v5380_v55, 4  ;;  %v1486_v27 = vrot.slane %v1485_v35, 4  ;;  %v2399_v61 = vsel %vm662_vm0, %v492_v21, %v478_v6 }
 0x1a0   :  { %7253 = vst [vmem:[#allocation101_spill] sm:$0xff] %v5527_v22  ;;  %v1459_v23 = vsel %vm662_vm0, %v1458_v3, %v5360_v50  ;;  %v913_v30 = vsel %vm662_vm0, 0.0, %v912_v40  ;;  %v798_v35 = vrot.slane %v4762_v20, 4  ;;  %v826_v39 = vrot.slane %v4800_v60, 4 }
 0x1a1   :  { %2746 = vst [vmem:[#allocation1 + $0x21] ss:$2 sm:$0xff] %v5521_v10  ;;  %v941_v38 = vsel %vm662_vm0, 0.0, %v940_v62  ;;  %v1487_v55 = vsel %vm662_vm0, %v1486_v27, %v5466_v43  ;;  %v477_v6 = vrot.slane %v474_v29, 4  ;;  %v1136_v50 = vrot.slane %v5436_v4, 4 }
 0x1a2   :  { %v5524_v36 = vld.sshfl [vmem:[#allocation1] sm:$0xff pattern:$0x75316420]  ;;  %v5556_v52 = vperm.slane %v1459_v23, %v4370_v24  ;;  %v1164_v62 = vrot.slane %v5440_v2, 4  ;;  %v5562_v43 = vperm.slane %v1487_v55, %v4370_v24  ;;  %v5570_v27 = vperm.slane %v4571_v41, %v4370_v24 }
 0x1a3   :  { %2861 = vst [vmem:[#allocation1] ss:$2 sm:$0xff] %v689_v51  ;;  %v5574_v2 = vperm.slane %v4644_v42, %v4370_v24  ;;  %v485_v23 = vrot.slane %v5449_v17, 4  ;;  %v827_v41 = vsel %vm662_vm0, 0.0, %v826_v39 }
 0x1a4   :  { %2862 = vst [vmem:[#allocation1 + $0x1] ss:$2 sm:$0xff] %v717_v1  ;;  %v490_v58 = vpop.permute.xlu1 %489  ;;  %v484_v1 = vpop.permute.xlu0 %483  ;;  %v1165_v42 = vsel %vm662_vm0, 0.0, %v1164_v62 }
 0x1a5   :  { %v1278_v21 = vrot.slane %v490_v58, 4  ;;  %v1503_v20 = vsel %vm662_vm0, %v490_v58, %v477_v6  ;;  %v2179_v58 = vperm.slane %v2175_v11, %v4354_v9 }
 0x1a6   :  { %v5541_v51 = vld.sshfl [vmem:[#allocation1 + $0x10] sm:$0xff pattern:$0x75316420]  ;;  %v5558_v40 = vpop.permute.xlu2 %515 }
 0x1a7   :  { %2803 = vst [vmem:[#allocation1 + $0x10] ss:$2 sm:$0xff] %v1415_v18  ;;  %v1279_v4 = vsel %vm662_vm0, %v1278_v21, %v474_v29  ;;  %v799_v18 = vsel %vm662_vm0, 0.0, %v798_v35  ;;  %v5582_v29 = vperm.slane %v1503_v20, %v4354_v9  ;;  %v2188_v5 = vrot.slane %v2179_v58, 4 }
 0x1a8   :  { %2804 = vst [vmem:[#allocation1 + $0x11] ss:$2 sm:$0xff] %v1443_v47  ;;  %v2751_v3 = vld.sshfl [vmem:[#allocation1 + $0x20] sm:$0xff pattern:$0x75316420]  ;;  %v2403_v47 = vperm.slane %v2399_v61, %v4354_v9  ;;  %v1283_v21 = vperm.slane %v1279_v4, %v4354_v9 }
 0x1a9   :  { %v3260_v60 = vsel %vm3229_vm1, %v2751_v3, -inf  ;;  %2757 = vst [vmem:[#allocation1 + $0x20] ss:$2 sm:$0xff] %v5556_v52  ;;  %v1516_v22 = vrot.slane %v5582_v29, 4 }
 0x1aa   :  { %3261 = vmax.xlane.f32.xlu1 %v3260_v60  ;;  %2758 = vst [vmem:[#allocation1 + $0x21] ss:$2 sm:$0xff] %v5562_v43  ;;  %v2412_v39 = vrot.slane %v2403_v47, 4  ;;  %v3269_v60 = vsel %vm3229_vm1, %v5420_v15, -inf  ;;  %v1292_v13 = vrot.slane %v1283_v21, 4 }
 0x1ab   :  { %v5552_v53 = vld.sshfl [vmem:[#allocation1] sm:$0xff pattern:$0x75316420] }
 0x1ac   :  { %2873 = vst [vmem:[#allocation1] ss:$2 sm:$0xff] %v913_v30  ;;  %v486_v30 = vrot.slane %v484_v1, 4  ;;  %v500_v35 = vpop.permute.xlu1 %499  ;;  %v498_v61 = vpop.permute.xlu0 %497 }
 0x1ad   :  { %2874 = vst [vmem:[#allocation1 + $0x1] ss:$2 sm:$0xff] %v941_v38  ;;  %v1137_v38 = vsel %vm662_vm0, 0.0, %v1136_v50  ;;  %v2180_v6 = vrot.slane %v500_v35, 4  ;;  %v1284_v3 = vrot.slane %v498_v61, 4  ;;  %v1509_v20 = vsel %vm662_vm0, %v498_v61, %v485_v23 }
 0x1ae   :  { %v2405_v11 = vsel %vm662_vm0, %v500_v35, %v486_v30  ;;  %v5596_v62 = vperm.slane %v1509_v20, %v4354_v9 }
 0x1af   :  { %v5587_v55 = vld.sshfl [vmem:[#allocation1 + $0x10] sm:$0xff pattern:$0x75316420]  ;;  %v2409_v50 = vperm.slane %v2405_v11, %v4354_v9  ;;  %v2181_v30 = vsel %vm662_vm0, %v2180_v6, %v484_v1  ;;  %v1285_v23 = vsel %vm662_vm0, %v1284_v3, %v5449_v17  ;;  %v530_v1 = vpop.permute.xlu2 %529 }
 0x1b0   :  { %2815 = vst [vmem:[#allocation1 + $0x10] ss:$2 sm:$0xff] %v5570_v27  ;;  %v2185_v35 = vperm.slane %v2181_v30, %v4354_v9  ;;  %v1289_v20 = vperm.slane %v1285_v23, %v4354_v9  ;;  %v1598_v23 = vrot.slane %v4473_v28, 4 }
 0x1b1   :  { %2816 = vst [vmem:[#allocation1 + $0x11] ss:$2 sm:$0xff] %v5574_v2  ;;  %v2410_v61 = vrot.slane %v2409_v50, 4  ;;  %v5608_v11 = vsel %vm662_vm0, %v2409_v50, %v2412_v39  ;;  %v5611_v15 = vld.sshfl [vmem:[#allocation1 + $0x20] sm:$0xff pattern:$0x75316420]  ;;  %v5628_v39 = vperm.slane %v4557_v25, %v4370_v24 }
 0x1b2   :  { %7255 = vst [vmem:[#allocation103_spill] sm:$0xff] %v5608_v11  ;;  %3270 = vmax.xlane.f32.xlu1 %v3269_v60  ;;  %v2186_v17 = vrot.slane %v2185_v35, 4  ;;  %v1290_v3 = vrot.slane %v1289_v20, 4  ;;  %v1312_v60 = vrot.slane %v530_v1, 4 }
 0x1b3   :  { %2769 = vst [vmem:[#allocation1 + $0x20] ss:$2 sm:$0xff] %v799_v18  ;;  %v5621_v6 = vsel %vm662_vm0, %v2410_v61, %v2403_v47  ;;  %v5636_v47 = vperm.slane %v4631_v7, %v4370_v24 }
 0x1b4   :  { %v5600_v4 = vld.sshfl [vmem:[#allocation1] sm:$0xff pattern:$0x75316420]  ;;  %7257 = vst [vmem:[#allocation105_spill] sm:$0xff] %v5621_v6  ;;  %v5632_v18 = vsel %vm662_vm0, %v2186_v17, %v2179_v58  ;;  %v514_v50 = vpop.permute.xlu1 %513  ;;  %v1291_v25 = vsel %vm662_vm0, %v1290_v3, %v1283_v21  ;;  %v1050_v58 = vrot.slane %v4847_v46, 4  ;;  %v7259_v3 = vld [vmem:[#allocation13_spill] sm:$0xff] }
 0x1b5   :  { %7254 = vst [vmem:[#allocation102_spill] sm:$0xff] %v5600_v4  ;;  %v5615_v4 = vsel %vm662_vm0, %v5596_v62, %v1516_v22  ;;  %v1360_v22 = vrot.slane %v5471_v45, 4  ;;  %v1570_v45 = vrot.slane %v4411_v48, 4  ;;  %v5657_v48 = vperm.slane %v1291_v25, %v4370_v24 }
 0x1b6   :  { %2885 = vst [vmem:[#allocation1] ss:$2 sm:$0xff] %v1137_v38  ;;  %v5618_v38 = vsel %vm662_vm0, %v2185_v35, %v2188_v5  ;;  %v508_v5 = vpop.permute.xlu0 %507  ;;  %v517_v46 = vrot.slane %v514_v50, 4  ;;  %v1051_v17 = vsel %vm662_vm0, 0.0, %v1050_v58  ;;  %v5674_v25 = vperm.slane %v5315_v56, %v4370_v24 }
 0x1b7   :  { %2886 = vst [vmem:[#allocation1 + $0x1] ss:$2 sm:$0xff] %v1165_v42  ;;  %v5624_v42 = vsel %vm662_vm0, %v1289_v20, %v1292_v13  ;;  %v1388_v13 = vrot.slane %v5476_v33, 4  ;;  %v1361_v7 = vsel %vm662_vm0, 0.0, %v1360_v22  ;;  %v1313_v33 = vsel %vm662_vm0, %v1312_v60, %v514_v50 }
 0x1b8   :  { %7256 = vst [vmem:[#allocation104_spill] sm:$0xff] %v5618_v38  ;;  %v5640_v30 = vld.sshfl [vmem:[#allocation1 + $0x10] sm:$0xff pattern:$0x75316420]  ;;  %v1317_v20 = vperm.slane %v1313_v33, %v4354_v9  ;;  %v1599_v22 = vsel %vm662_vm0, %v1598_v23, %v7259_v3  ;;  %v5669_v60 = vperm.slane %v5221_v49, %v4370_v24  ;;  %v510_v58 = vrot.slane %v508_v5, 4 }
 0x1b9   :  { %2770 = vst [vmem:[#allocation1 + $0x21] ss:$2 sm:$0xff] %v827_v41  ;;  %v1022_v41 = vrot.slane %v4838_v32, 4  ;;  %v3278_v32 = vsel %vm3229_vm1, %v5244_v26, -inf  ;;  %v1389_v21 = vsel %vm662_vm0, 0.0, %v1388_v13  ;;  %v1571_v26 = vsel %vm662_vm0, %v1570_v45, %v4405_v44 }
 0x1ba   :  { %7258 = vst [vmem:[#allocation106_spill] sm:$0xff] %v5632_v18  ;;  %3279 = vmax.xlane.f32.xlu1 %v3278_v32  ;;  %v1246_v23 = vrot.slane %v5398_v16, 4  ;;  %v1318_v49 = vrot.slane %v1317_v20, 4  ;;  %v1537_v32 = vsel %vm662_vm0, %v530_v1, %v517_v46  ;;  %v5689_v11 = vperm.slane %v1571_v26, %v4370_v24  ;;  %v7261_v16 = vld [vmem:[#allocation14_spill] sm:$0xff] }
 0x1bb   :  { %2827 = vst [vmem:[#allocation1 + $0x10] ss:$2 sm:$0xff] %v5628_v39  ;;  %v1023_v61 = vsel %vm662_vm0, 0.0, %v1022_v41  ;;  %v509_v41 = vrot.slane %v5529_v8, 4  ;;  %v1822_v38 = vrot.slane %v7261_v16, 4  ;;  %v1274_v1 = vrot.slane %v5521_v10, 4 }
 0x1bc   :  { %2828 = vst [vmem:[#allocation1 + $0x11] ss:$2 sm:$0xff] %v5636_v47  ;;  %v524_v13 = vpop.permute.xlu1 %523  ;;  %v1247_v26 = vsel %vm662_vm0, 0.0, %v1246_v23  ;;  %v7264_v18 = vld [vmem:[#allocation78_spill] sm:$0xff] }
 0x1bd   :  { %2747 = vst [vmem:[#allocation1 + $0x30] ss:$2 sm:$0xff] %v5657_v48  ;;  %v2202_v44 = vrot.slane %v524_v13, 4  ;;  %v2427_v56 = vsel %vm662_vm0, %v524_v13, %v510_v58 }
 0x1be   :  { %v5649_v35 = vld.sshfl [vmem:[#allocation1] sm:$0xff pattern:$0x75316420]  ;;  %v522_v50 = vpop.permute.xlu0 %521 }
 0x1bf   :  { %2897 = vst [vmem:[#allocation1] ss:$2 sm:$0xff] %v1361_v7  ;;  %v1306_v45 = vrot.slane %v522_v50, 4  ;;  %v1531_v33 = vsel %vm662_vm0, %v522_v50, %v509_v41  ;;  %v5696_v41 = vperm.slane %v1599_v22, %v4370_v24  ;;  %v2203_v50 = vsel %vm662_vm0, %v2202_v44, %v508_v5 }
 0x1c0   :  { %2898 = vst [vmem:[#allocation1 + $0x1] ss:$2 sm:$0xff] %v1389_v21  ;;  %v5659_v28 = vld.sshfl [vmem:[#allocation1 + $0x20] sm:$0xff pattern:$0x75316420]  ;;  %v1535_v3 = vperm.slane %v1531_v33, %v4354_v9  ;;  %v1275_v44 = vsel %vm662_vm0, 0.0, %v1274_v1  ;;  %v2207_v23 = vperm.slane %v2203_v50, %v4354_v9  ;;  %v5728_v1 = vperm.slane %v7264_v18, %v4370_v24 }
 0x1c1   :  { %2781 = vst [vmem:[#allocation1 + $0x20] ss:$2 sm:$0xff] %v1023_v61  ;;  %v7260_v61 = vld [vmem:[#allocation9_spill] sm:$0xff]  ;;  %v1514_v50 = vrot.slane %v5596_v62, 4 }
 0x1c2   :  { %2782 = vst [vmem:[#allocation1 + $0x21] ss:$2 sm:$0xff] %v1051_v17  ;;  %v1794_v21 = vrot.slane %v7260_v61, 4  ;;  %v1307_v17 = vsel %vm662_vm0, %v1306_v45, %v5529_v8  ;;  %v1541_v8 = vperm.slane %v1537_v32, %v4354_v9  ;;  %v1544_v58 = vrot.slane %v1535_v3, 4 }
 0x1c3   :  { %v5677_v7 = vld.sshfl [vmem:[#allocation1 + $0x10] sm:$0xff pattern:$0x75316420]  ;;  %v1311_v46 = vperm.slane %v1307_v17, %v4354_v9  ;;  %v2431_v45 = vperm.slane %v2427_v56, %v4354_v9  ;;  %v518_v61 = vrot.slane %v5558_v40, 4  ;;  %v2216_v62 = vrot.slane %v2207_v23, 4 }
 0x1c4   :  { %2839 = vst [vmem:[#allocation1 + $0x10] ss:$2 sm:$0xff] %v5669_v60  ;;  %v5714_v5 = vsel %vm662_vm0, %v1541_v8, %v1544_v58  ;;  %v7262_v17 = vld [vmem:[#allocation8_spill] sm:$0xff] }
 0x1c5   :  { %2840 = vst [vmem:[#allocation1 + $0x11] ss:$2 sm:$0xff] %v5674_v25  ;;  %v1319_v10 = vsel %vm662_vm0, %v1318_v49, %v1311_v46  ;;  %v1320_v33 = vrot.slane %v1311_v46, 4  ;;  %v1795_v16 = vsel %vm662_vm0, %v1794_v21, %v7262_v17  ;;  %v7263_v46 = vld [vmem:[#allocation12_spill] sm:$0xff]  ;;  %v5735_v21 = vperm.slane %v5303_v34, %v4370_v24 }
 0x1c6   :  { %v5711_v32 = vperm.slane %v1319_v10, %v4370_v24  ;;  %v532_v56 = vpop.permute.xlu0 %531  ;;  %v1823_v6 = vsel %vm662_vm0, %v1822_v38, %v7263_v46  ;;  %v5748_v34 = vperm.slane %v1795_v16, %v4370_v24 }
 0x1c7   :  { %v5698_v13 = vld.sshfl [vmem:[#allocation1] sm:$0xff pattern:$0x75316420]  ;;  %v5719_v49 = vsel %vm662_vm0, %v1317_v20, %v1320_v33  ;;  %v2208_v10 = vrot.slane %v532_v56, 4  ;;  %v2433_v58 = vsel %vm662_vm0, %v532_v56, %v518_v61  ;;  %v1470_v33 = vrot.slane %v5556_v52, 4 }
 0x1c8   :  { %2909 = vst [vmem:[#allocation1] ss:$2 sm:$0xff] %v5689_v11  ;;  %v2437_v20 = vperm.slane %v2433_v58, %v4354_v9  ;;  %v1542_v61 = vrot.slane %v1541_v8, 4  ;;  %v5751_v46 = vperm.slane %v1823_v6, %v4370_v24  ;;  %v744_v52 = vrot.slane %v5570_v27, 4 }
 0x1c9   :  { %2910 = vst [vmem:[#allocation1 + $0x1] ss:$2 sm:$0xff] %v5696_v41  ;;  %v5707_v22 = vld.sshfl [vmem:[#allocation1 + $0x20] sm:$0xff pattern:$0x75316420]  ;;  %v2209_v18 = vsel %vm662_vm0, %v2208_v10, %v5558_v40  ;;  %v1498_v40 = vrot.slane %v5562_v43, 4 }
 0x1ca   :  { %2793 = vst [vmem:[#allocation1 + $0x20] ss:$2 sm:$0xff] %v1247_v26  ;;  %v2440_v26 = vrot.slane %v2431_v45, 4  ;;  %v2438_v56 = vrot.slane %v2437_v20, 4  ;;  %v772_v6 = vrot.slane %v5574_v2, 4 }
 0x1cb   :  { %2794 = vst [vmem:[#allocation1 + $0x21] ss:$2 sm:$0xff] %v1275_v44  ;;  %v2213_v44 = vperm.slane %v2209_v18, %v4354_v9  ;;  %v1515_v9 = vsel %vm662_vm0, %v1514_v50, %v5582_v29  ;;  %v1543_v18 = vsel %vm662_vm0, %v1542_v61, %v1535_v3  ;;  %v1471_v29 = vsel %vm662_vm0, 0.0, %v1470_v33  ;;  %v7271_v61 = vld [vmem:[#allocation64_spill] sm:$0xff] }
 0x1cc   :  { %2748 = vst [vmem:[#allocation1 + $0x31] ss:$2 sm:$0xff] %v5711_v32  ;;  %v5737_v38 = vld.sshfl [vmem:[#allocation1 + $0x10] sm:$0xff pattern:$0x75316420]  ;;  %v5745_v17 = vsel %vm662_vm0, %v2437_v20, %v2440_v26  ;;  %v5764_v16 = vsel %vm662_vm0, %v2438_v56, %v2431_v45  ;;  %v7270_v20 = vld [vmem:[#allocation74_spill] sm:$0xff]  ;;  %v5780_v2 = vperm.slane %v1515_v9, %v4370_v24  ;;  %v5783_v56 = vperm.slane %v1543_v18, %v4370_v24 }
 0x1cd   :  { %2851 = vst [vmem:[#allocation1 + $0x10] ss:$2 sm:$0xff] %v5728_v1  ;;  %v2214_v10 = vrot.slane %v2213_v44, 4  ;;  %v5761_v58 = vsel %vm662_vm0, %v2213_v44, %v2216_v62  ;;  %v7269_v26 = vld [vmem:[#allocation68_spill] sm:$0xff]  ;;  %v2046_v43 = vrot.slane %v7270_v20, 4  ;;  %v1499_v45 = vsel %vm662_vm0, 0.0, %v1498_v40 }
 0x1ce   :  { %7265 = vst [vmem:[#allocation13_spill] sm:$0xff] %v5745_v17  ;;  %v2018_v27 = vrot.slane %v7269_v26, 4  ;;  %v7272_v40 = vld [vmem:[#allocation72_spill] sm:$0xff]  ;;  %v773_v26 = vsel %vm662_vm0, 0.0, %v772_v6 }
 0x1cf   :  { %2852 = vst [vmem:[#allocation1 + $0x11] ss:$2 sm:$0xff] %v5735_v21  ;;  %v5776_v62 = vsel %vm662_vm0, %v2214_v10, %v2207_v23  ;;  %v745_v23 = vsel %vm662_vm0, 0.0, %v744_v52  ;;  %v2047_v10 = vsel %vm662_vm0, %v2046_v43, %v7272_v40  ;;  %v968_v43 = vrot.slane %v5628_v39, 4 }
 0x1d0   :  { %v5756_v8 = vld.sshfl [vmem:[#allocation1] sm:$0xff pattern:$0x75316420]  ;;  %7267 = vst [vmem:[#allocation14_spill] sm:$0xff] %v5761_v58  ;;  %v2019_v33 = vsel %vm662_vm0, %v2018_v27, %v7271_v61  ;;  %v7273_v27 = vld [vmem:[#allocation52_spill] sm:$0xff]  ;;  %v996_v39 = vrot.slane %v5636_v47, 4 }
 0x1d1   :  { %7266 = vst [vmem:[#allocation9_spill] sm:$0xff] %v5756_v8  ;;  %v5797_v20 = vperm.slane %v2019_v33, %v4370_v24  ;;  %v854_v18 = vrot.slane %v7273_v27, 4  ;;  %v7277_v61 = vld [vmem:[#allocation66_spill] sm:$0xff]  ;;  %v7278_v33 = vld [vmem:[#allocation39_spill] sm:$0xff]  ;;  %v969_v47 = vsel %vm662_vm0, 0.0, %v968_v43 }
 0x1d2   :  { %7268 = vst [vmem:[#allocation8_spill] sm:$0xff] %v5764_v16  ;;  %v5773_v50 = vld.sshfl [vmem:[#allocation1 + $0x20] sm:$0xff pattern:$0x75316420]  ;;  %v5815_v40 = vperm.slane %v7278_v33, %v4370_v24 }
 0x1d3   :  { %2921 = vst [vmem:[#allocation1] ss:$2 sm:$0xff] %v5748_v34  ;;  %v2752_v44 = vld.sshfl [vmem:[#allocation1 + $0x30] sm:$0xff pattern:$0x75316420] }
 0x1d4   :  { %2922 = vst [vmem:[#allocation1 + $0x1] ss:$2 sm:$0xff] %v5751_v46  ;;  %v3263_v3 = vsel %vm3229_vm1, %v2752_v44, -inf }
 0x1d5   :  { %2805 = vst [vmem:[#allocation1 + $0x20] ss:$2 sm:$0xff] %v1471_v29  ;;  %3264 = vmax.xlane.f32.xlu2 %v3263_v3  ;;  %v5801_v29 = vperm.slane %v2047_v10, %v4370_v24  ;;  %v7276_v3 = vld [vmem:[#allocation62_spill] sm:$0xff]  ;;  %v7279_v10 = vld [vmem:[#allocation73_spill] sm:$0xff] }
 0x1d6   :  { %2806 = vst [vmem:[#allocation1 + $0x21] ss:$2 sm:$0xff] %v1499_v45  ;;  %v5792_v9 = vld.sshfl [vmem:[#allocation1 + $0x10] sm:$0xff pattern:$0x75316420]  ;;  %v882_v6 = vrot.slane %v7276_v3, 4 }
 0x1d7   :  { %2759 = vst [vmem:[#allocation1 + $0x30] ss:$2 sm:$0xff] %v5780_v2  ;;  %v7275_v45 = vld [vmem:[#allocation36_spill] sm:$0xff]  ;;  %v855_v3 = vsel %vm662_vm0, 0.0, %v854_v18  ;;  %v997_v18 = vsel %vm662_vm0, 0.0, %v996_v39  ;;  %v1192_v39 = vrot.slane %v5669_v60, 4 }
 0x1d8   :  { %2760 = vst [vmem:[#allocation1 + $0x31] ss:$2 sm:$0xff] %v5783_v56  ;;  %v5808_v44 = vperm.slane %v7275_v45, %v4370_v24  ;;  %v3272_v45 = vsel %vm3229_vm1, %v5611_v15, -inf  ;;  %v883_v33 = vsel %vm662_vm0, 0.0, %v882_v6  ;;  %v7282_v6 = vld [vmem:[#allocation65_spill] sm:$0xff]  ;;  %v3284_v60 = vsel %vm3229_vm1, %v5659_v28, -inf }
 0x1d9   :  { %2863 = vst [vmem:[#allocation1 + $0x10] ss:$2 sm:$0xff] %v745_v23  ;;  %v2242_v23 = vrot.slane %v7277_v61, 4  ;;  %v1078_v8 = vrot.slane %v7282_v6, 4  ;;  %v1220_v6 = vrot.slane %v5674_v25, 4 }
 0x1da   :  { %2864 = vst [vmem:[#allocation1 + $0x11] ss:$2 sm:$0xff] %v773_v26  ;;  %v2270_v26 = vrot.slane %v7279_v10, 4  ;;  %v7280_v10 = vld [vmem:[#allocation63_spill] sm:$0xff] }
 0x1db   :  { %v5803_v52 = vld.sshfl [vmem:[#allocation1] sm:$0xff pattern:$0x75316420]  ;;  %v2243_v17 = vsel %vm662_vm0, %v2242_v23, %v7280_v10 }
 0x1dc   :  { %7274 = vst [vmem:[#allocation12_spill] sm:$0xff] %v5803_v52  ;;  %v7281_v52 = vld [vmem:[#allocation71_spill] sm:$0xff]  ;;  %v5839_v23 = vperm.slane %v2243_v17, %v4370_v24  ;;  %v7286_v17 = vld [vmem:[#allocation37_spill] sm:$0xff] }
 0x1dd   :  { %2933 = vst [vmem:[#allocation1] ss:$2 sm:$0xff] %v5797_v20  ;;  %v5818_v27 = vld.sshfl [vmem:[#allocation1 + $0x20] sm:$0xff pattern:$0x75316420]  ;;  %3273 = vmax.xlane.f32.xlu2 %v3272_v45  ;;  %v2271_v16 = vsel %vm662_vm0, %v2270_v26, %v7281_v52  ;;  %v3742_v45 = vlaneseq  ;;  %v5857_v10 = vperm.slane %v7286_v17, %v4370_v24  ;;  %v1221_v17 = vsel %vm662_vm0, 0.0, %v1220_v6 }
 0x1de   :  { %2934 = vst [vmem:[#allocation1 + $0x1] ss:$2 sm:$0xff] %v5801_v29  ;;  %v7284_v52 = vld [vmem:[#allocation34_spill] sm:$0xff]  ;;  %v7288_v6 = vld [vmem:[#allocation84_spill] sm:$0xff] }
 0x1df   :  { %2817 = vst [vmem:[#allocation1 + $0x20] ss:$2 sm:$0xff] %v5808_v44  ;;  %v2764_v61 = vld.sshfl [vmem:[#allocation1 + $0x30] sm:$0xff pattern:$0x75316420]  ;;  %v5848_v26 = vperm.slane %v7284_v52, %v4370_v24  ;;  %v1582_v52 = vrot.slane %v5689_v11, 4 }
 0x1e0   :  { %2818 = vst [vmem:[#allocation1 + $0x21] ss:$2 sm:$0xff] %v5815_v40  ;;  %v3275_v58 = vsel %vm3229_vm1, %v2764_v61, -inf  ;;  %v1302_v11 = vrot.slane %v5657_v48, 4  ;;  %v1610_v48 = vrot.slane %v5696_v41, 4  ;;  %v3293_v41 = vsel %vm3229_vm1, %v5510_v59, -inf }
 0x1e1   :  { %2771 = vst [vmem:[#allocation1 + $0x30] ss:$2 sm:$0xff] %v855_v3  ;;  %v5834_v15 = vld.sshfl [vmem:[#allocation1 + $0x10] sm:$0xff pattern:$0x75316420]  ;;  %3276 = vmax.xlane.f32.xlu0 %v3275_v58  ;;  %v5842_v3 = vperm.slane %v2271_v16, %v4370_v24  ;;  %v7285_v58 = vld [vmem:[#allocation67_spill] sm:$0xff] }
 0x1e2   :  { %2772 = vst [vmem:[#allocation1 + $0x31] ss:$2 sm:$0xff] %v883_v33  ;;  %v1106_v61 = vrot.slane %v7285_v58, 4  ;;  %v3281_v33 = vsel %vm3229_vm1, %v5463_v12, -inf  ;;  %v1193_v58 = vsel %vm662_vm0, 0.0, %v1192_v39  ;;  %v1583_v28 = vsel %vm662_vm0, 0.0, %v1582_v52 }
 0x1e3   :  { %2875 = vst [vmem:[#allocation1 + $0x10] ss:$2 sm:$0xff] %v969_v47  ;;  %v5861_v47 = vand.u32 127, %v3742_v45  ;;  %v1416_v52 = vrot.slane %v5728_v1, 4 }
 0x1e4   :  { %2876 = vst [vmem:[#allocation1 + $0x11] ss:$2 sm:$0xff] %v997_v18  ;;  %v1079_v18 = vsel %vm662_vm0, 0.0, %v1078_v8  ;;  %v1107_v45 = vsel %vm662_vm0, 0.0, %v1106_v61  ;;  %v1806_v61 = vrot.slane %v5748_v34, 4  ;;  %v3235_v39 = vpop.xlane.xlu2 %3234  ;;  %v5897_v34 = vperm.slane %v5506_v19, %v4370_v24 }
 0x1e5   :  { %v5844_v43 = vld.sshfl [vmem:[#allocation1] sm:$0xff pattern:$0x75316420]  ;;  %3282 = vmax.xlane.f32.xlu2 %v3281_v33  ;;  %v5877_v33 = vadd.s32 4294967288, %v5861_v47  ;;  %v1417_v59 = vsel %vm662_vm0, 0.0, %v1416_v52  ;;  %v1526_v52 = vrot.slane %v5780_v2, 4  ;;  %v5942_v2 = vperm.slane %v5391_v31, %v4370_v24 }
 0x1e6   :  { %7283 = vst [vmem:[#allocation78_spill] sm:$0xff] %v5844_v43  ;;  %v5936_v43 = vadd.s32 4294967264, %v5861_v47 }
 0x1e7   :  { %2945 = vst [vmem:[#allocation1] ss:$2 sm:$0xff] %v5839_v23  ;;  %v5859_v16 = vld.sshfl [vmem:[#allocation1 + $0x20] sm:$0xff pattern:$0x75316420]  ;;  %v1527_v31 = vsel %vm662_vm0, 0.0, %v1526_v52 }
 0x1e8   :  { %2946 = vst [vmem:[#allocation1 + $0x1] ss:$2 sm:$0xff] %v5842_v3  ;;  %v5966_v52 = vadd.s32 4294967256, %v5861_v47 }
 0x1e9   :  { %2829 = vst [vmem:[#allocation1 + $0x20] ss:$2 sm:$0xff] %v5848_v26  ;;  %v2776_v12 = vld.sshfl [vmem:[#allocation1 + $0x30] sm:$0xff pattern:$0x75316420]  ;;  %3285 = vmax.xlane.f32.xlu0 %v3284_v60  ;;  %v1330_v60 = vrot.slane %v5711_v32, 4 }
 0x1ea   :  { %2830 = vst [vmem:[#allocation1 + $0x21] ss:$2 sm:$0xff] %v5857_v10  ;;  %v3287_v8 = vsel %vm3229_vm1, %v2776_v12, -inf  ;;  %v5887_v12 = vperm.slane %v5407_v63, %v4370_v24  ;;  %v3232_v63 = vpop.xlane.xlu1 %3231  ;;  %v1444_v32 = vrot.slane %v5735_v21, 4 }
 0x1eb   :  { %2783 = vst [vmem:[#allocation1 + $0x30] ss:$2 sm:$0xff] %v1079_v18  ;;  %v5874_v25 = vld.sshfl [vmem:[#allocation1 + $0x10] sm:$0xff pattern:$0x75316420]  ;;  %3288 = vmax.xlane.f32.xlu1 %v3287_v8  ;;  %v3744_v1 = vperm.slane %v3232_v63, %v5861_v47 }
 0x1ec   :  { %2784 = vst [vmem:[#allocation1 + $0x31] ss:$2 sm:$0xff] %v1107_v45  ;;  %v3746_v45 = vperm.slane %v3235_v39, %v5877_v33  ;;  %v7289_v39 = vld [vmem:[#allocation20_spill] sm:$0xff] }
 0x1ed   :  { %2887 = vst [vmem:[#allocation1 + $0x10] ss:$2 sm:$0xff] %v1193_v58  ;;  %v3290_v58 = vsel %vm3229_vm1, %v7288_v6, -inf  ;;  %v1626_v6 = vrot.slane %v7289_v39, 4  ;;  %v1445_v39 = vsel %vm662_vm0, 0.0, %v1444_v32 }
 0x1ee   :  { %2888 = vst [vmem:[#allocation1 + $0x11] ss:$2 sm:$0xff] %v1221_v17  ;;  %3291 = vmax.xlane.f32.xlu2 %v3290_v58  ;;  %v1303_v17 = vsel %vm662_vm0, 0.0, %v1302_v11  ;;  %v7290_v58 = vld [vmem:[#allocation26_spill] sm:$0xff]  ;;  %v3748_v11 = vsel %vm3747_vm2, %v3746_v45, %v3744_v1 }
 0x1ef   :  { %v5883_v18 = vld.sshfl [vmem:[#allocation1] sm:$0xff pattern:$0x75316420]  ;;  %v1654_v21 = vrot.slane %v7290_v58, 4  ;;  %v5923_v58 = vadd.s32 4294967280, %v5861_v47  ;;  %7296 = vst [vmem:[#allocation64_spill] sm:$0xff] %v5966_v52 }
 0x1f0   :  { %7287 = vst [vmem:[#allocation68_spill] sm:$0xff] %v5883_v18  ;;  %v1331_v18 = vsel %vm662_vm0, 0.0, %v1330_v60  ;;  %v1611_v60 = vsel %vm662_vm0, 0.0, %v1610_v48  ;;  %v7293_v1 = vld [vmem:[#allocation18_spill] sm:$0xff]  ;;  %v7295_v48 = vld [vmem:[#allocation24_spill] sm:$0xff] }
 0x1f1   :  { %2957 = vst [vmem:[#allocation1] ss:$2 sm:$0xff] %v1583_v28  ;;  %v5899_v8 = vld.sshfl [vmem:[#allocation1 + $0x20] sm:$0xff pattern:$0x75316420]  ;;  %3294 = vmax.xlane.f32.xlu0 %v3293_v41  ;;  %v3296_v28 = vsel %vm3229_vm1, %v5707_v22, -inf }
 0x1f2   :  { %2841 = vst [vmem:[#allocation1 + $0x20] ss:$2 sm:$0xff] %v5887_v12  ;;  %v5918_v41 = vsel %vm662_vm0, 0.0, %v1806_v61  ;;  %v1834_v22 = vrot.slane %v5751_v46, 4  ;;  %v3241_v61 = vpop.xlane.xlu2 %3240  ;;  %v1627_v46 = vsel %vm662_vm0, %v1626_v6, %v7293_v1  ;;  %v3238_v6 = vpop.xlane.xlu0 %3237 }
 0x1f3   :  { %2842 = vst [vmem:[#allocation1 + $0x21] ss:$2 sm:$0xff] %v5897_v34  ;;  %v2788_v19 = vld.sshfl [vmem:[#allocation1 + $0x30] sm:$0xff pattern:$0x75316420]  ;;  %3297 = vmax.xlane.f32.xlu1 %v3296_v28  ;;  %v7294_v28 = vld [vmem:[#allocation25_spill] sm:$0xff]  ;;  %v3244_v1 = vpop.xlane.xlu1 %3243 }
 0x1f4   :  { %2795 = vst [vmem:[#allocation1 + $0x30] ss:$2 sm:$0xff] %v1303_v17  ;;  %v7291_v17 = vld [vmem:[#allocation19_spill] sm:$0xff]  ;;  %v1878_v32 = vrot.slane %v7294_v28, 4 }
 0x1f5   :  { %v5915_v63 = vld.sshfl [vmem:[#allocation1 + $0x10] sm:$0xff pattern:$0x75316420]  ;;  %2796 = vst [vmem:[#allocation1 + $0x31] ss:$2 sm:$0xff] %v1331_v18  ;;  %v1850_v45 = vrot.slane %v7291_v17, 4 }
 0x1f6   :  { %2899 = vst [vmem:[#allocation1 + $0x10] ss:$2 sm:$0xff] %v1417_v59  ;;  %v5929_v18 = vadd.s32 4294967272, %v5861_v47  ;;  %v3299_v59 = vsel %vm3229_vm1, %v2788_v19, -inf  ;;  %v1554_v17 = vrot.slane %v5783_v56, 4  ;;  %v5947_v19 = vperm.slane %v5496_v0, %v4370_v24 }
 0x1f7   :  { %2900 = vst [vmem:[#allocation1 + $0x11] ss:$2 sm:$0xff] %v1445_v39  ;;  %v1655_v39 = vsel %vm662_vm0, %v1654_v21, %v7295_v48  ;;  %3300 = vmax.xlane.f32.xlu2 %v3299_v59  ;;  %v3750_v21 = vperm.slane %v3238_v6, %v5923_v58  ;;  %v3305_v59 = vsel %vm3229_vm1, %v5541_v51, -inf  ;;  %v5960_v0 = vperm.slane %v1627_v46, %v4370_v24 }
 0x1f8   :  { %7292 = vst [vmem:[#allocation74_spill] sm:$0xff] %v5929_v18  ;;  %v3754_v56 = vperm.slane %v3241_v61, %v5929_v18  ;;  %v3758_v6 = vperm.slane %v3244_v1, %v5936_v43  ;;  %v800_v61 = vrot.slane %v5808_v44, 4  ;;  %v1555_v51 = vsel %vm662_vm0, 0.0, %v1554_v17 }
 0x1f9   :  { %2958 = vst [vmem:[#allocation1 + $0x1] ss:$2 sm:$0xff] %v1611_v60  ;;  %v3302_v60 = vsel %vm3229_vm1, %v5299_v14, -inf  ;;  %v3752_v48 = vsel %vm3751_vm3, %v3750_v21, %v3748_v11  ;;  %v5972_v46 = vadd.s32 4294967248, %v5861_v47  ;;  %v5975_v18 = vperm.slane %v1655_v39, %v4370_v24 }
 0x1fa   :  { %v5949_v28 = vld.sshfl [vmem:[#allocation1 + $0x20] sm:$0xff pattern:$0x75316420]  ;;  %3303 = vmax.xlane.f32.xlu0 %v3302_v60  ;;  %v3756_v60 = vsel %vm3755_vm4, %v3754_v56, %v3752_v48  ;;  %v5981_v1 = vadd.s32 4294967240, %v5861_v47  ;;  %v3247_v44 = vpop.xlane.xlu2 %3246  ;;  %v1835_v21 = vsel %vm662_vm0, 0.0, %v1834_v22  ;;  %v3308_v56 = vsel %vm3229_vm1, %v5773_v50, -inf }
 0x1fb   :  { %2853 = vst [vmem:[#allocation1 + $0x20] ss:$2 sm:$0xff] %v5942_v2  ;;  %3306 = vmax.xlane.f32.xlu1 %v3305_v59  ;;  %v3760_v11 = vsel %vm3759_vm5, %v3758_v6, %v3756_v60  ;;  %v3762_v39 = vperm.slane %v3247_v44, %v5966_v52  ;;  %v7298_v48 = vld [vmem:[#allocation17_spill] sm:$0xff]  ;;  %v3250_v60 = vpop.xlane.xlu0 %3249  ;;  %v7299_v52 = vld [vmem:[#allocation23_spill] sm:$0xff] }
 0x1fc   :  { %2854 = vst [vmem:[#allocation1 + $0x21] ss:$2 sm:$0xff] %v5947_v19  ;;  %v2800_v14 = vld.sshfl [vmem:[#allocation1 + $0x30] sm:$0xff pattern:$0x75316420]  ;;  %v1851_v6 = vsel %vm662_vm0, %v1850_v45, %v7298_v48  ;;  %v3766_v44 = vperm.slane %v3250_v60, %v5972_v46  ;;  %v1879_v45 = vsel %vm662_vm0, %v1878_v32, %v7299_v52  ;;  %v6014_v32 = vadd.s32 4294967232, %v5861_v47 }
 0x1fd   :  { %2807 = vst [vmem:[#allocation1 + $0x30] ss:$2 sm:$0xff] %v1527_v31  ;;  %v828_v31 = vrot.slane %v5815_v40, 4  ;;  %v3764_v40 = vsel %vm3763_vm6, %v3762_v39, %v3760_v11  ;;  %v3311_v22 = vsel %vm3229_vm1, %v2800_v14, -inf  ;;  %v7300_v14 = vld [vmem:[#allocation49_spill] sm:$0xff]  ;;  %v6017_v52 = vperm.slane %v1851_v6, %v4370_v24 }
 0x1fe   :  { %v5977_v59 = vld.sshfl [vmem:[#allocation1 + $0x10] sm:$0xff pattern:$0x75316420]  ;;  %2808 = vst [vmem:[#allocation1 + $0x31] ss:$2 sm:$0xff] %v1555_v51  ;;  %v2030_v51 = vrot.slane %v5797_v20, 4  ;;  %v6010_v39 = vperm.slane %v7300_v14, %v4370_v24 }
 0x1ff   :  { %2911 = vst [vmem:[#allocation1 + $0x10] ss:$2 sm:$0xff] %v5960_v0  ;;  %3309 = vmax.xlane.f32.xlu2 %v3308_v56  ;;  %v801_v20 = vsel %vm662_vm0, 0.0, %v800_v61  ;;  %v829_v11 = vsel %vm662_vm0, 0.0, %v828_v31  ;;  %v1024_v61 = vrot.slane %v5848_v26, 4  ;;  %v1052_v60 = vrot.slane %v5857_v10, 4 }
 0x200   :  { %v5984_v17 = vld.sshfl [vmem:[#allocation1] sm:$0xff pattern:$0x75316420]  ;;  %2912 = vst [vmem:[#allocation1 + $0x11] ss:$2 sm:$0xff] %v5975_v18  ;;  %v6030_v6 = vadd.s32 4294967224, %v5861_v47  ;;  %v6033_v26 = vperm.slane %v1879_v45, %v4370_v24 }
 0x201   :  { %7297 = vst [vmem:[#allocation72_spill] sm:$0xff] %v5984_v17  ;;  %v3253_v17 = vpop.xlane.xlu1 %3252 }
 0x202   :  { %2969 = vst [vmem:[#allocation1] ss:$2 sm:$0xff] %v5918_v41  ;;  %v3770_v50 = vperm.slane %v3253_v17, %v5981_v1  ;;  %3312 = vmax.xlane.f32.xlu0 %v3311_v22  ;;  %v3314_v41 = vsel %vm3229_vm1, %v5335_v57, -inf  ;;  %v3768_v17 = vsel %vm3767_vm7, %v3766_v44, %v3764_v40  ;;  %v7301_v57 = vld [vmem:[#allocation61_spill] sm:$0xff]  ;;  %v2031_v40 = vsel %vm662_vm0, 0.0, %v2030_v51 }
 0x203   :  { %2970 = vst [vmem:[#allocation1 + $0x1] ss:$2 sm:$0xff] %v1835_v21  ;;  %v6003_v56 = vld.sshfl [vmem:[#allocation1 + $0x20] sm:$0xff pattern:$0x75316420]  ;;  %3315 = vmax.xlane.f32.xlu1 %v3314_v41  ;;  %v6022_v21 = vperm.slane %v7301_v57, %v4370_v24  ;;  %v2058_v22 = vrot.slane %v5801_v29, 4  ;;  %v3259_v45 = vpop.xlane.xlu0 %3258 }
 0x204   :  { %2865 = vst [vmem:[#allocation1 + $0x20] ss:$2 sm:$0xff] %v801_v20  ;;  %v3772_v48 = vsel %vm3771_vm8, %v3770_v50, %v3768_v17  ;;  %v3256_v50 = vpop.xlane.xlu2 %3255  ;;  %v7302_v20 = vld [vmem:[#allocation81_spill] sm:$0xff]  ;;  %v2102_v51 = vrot.slane %v5290_v54, 4  ;;  %v3317_v41 = vsel %vm3229_vm1, %v5587_v55, -inf  ;;  %v3320_v54 = vsel %vm3229_vm1, %v5818_v27, -inf }
 0x205   :  { %2866 = vst [vmem:[#allocation1 + $0x21] ss:$2 sm:$0xff] %v829_v11  ;;  %v2812_v31 = vld.sshfl [vmem:[#allocation1 + $0x30] sm:$0xff pattern:$0x75316420]  ;;  %v2074_v10 = vrot.slane %v7302_v20, 4  ;;  %v3774_v29 = vperm.slane %v3256_v50, %v6014_v32  ;;  %v3778_v57 = vperm.slane %v3259_v45, %v6030_v6 }
 0x206   :  { %2819 = vst [vmem:[#allocation1 + $0x30] ss:$2 sm:$0xff] %v6010_v39  ;;  %v2059_v14 = vsel %vm662_vm0, 0.0, %v2058_v22  ;;  %v2254_v50 = vrot.slane %v5839_v23, 4  ;;  %v3323_v55 = vsel %vm3229_vm1, %v2812_v31, -inf  ;;  %v1025_v20 = vsel %vm662_vm0, 0.0, %v1024_v61 }
 0x207   :  { %v6035_v44 = vld.sshfl [vmem:[#allocation1 + $0x10] sm:$0xff pattern:$0x75316420]  ;;  %2820 = vst [vmem:[#allocation1 + $0x31] ss:$2 sm:$0xff] %v6022_v21  ;;  %3318 = vmax.xlane.f32.xlu2 %v3317_v41  ;;  %v3776_v17 = vsel %vm3775_vm9, %v3774_v29, %v3772_v48  ;;  %v7304_v41 = vld [vmem:[#allocation79_spill] sm:$0xff] }
 0x208   :  { %2923 = vst [vmem:[#allocation1 + $0x10] ss:$2 sm:$0xff] %v6017_v52  ;;  %v6060_v48 = vsel %vm3779_vm10, %v3778_v57, %v3776_v17  ;;  %v1053_v27 = vsel %vm662_vm0, 0.0, %v1052_v60  ;;  %v7306_v29 = vld [vmem:[#allocation86_spill] sm:$0xff]  ;;  %v7307_v61 = vld [vmem:[#allocation59_spill] sm:$0xff]  ;;  %v2282_v17 = vrot.slane %v5842_v3, 4 }
 0x209   :  { %2924 = vst [vmem:[#allocation1 + $0x11] ss:$2 sm:$0xff] %v6033_v26  ;;  %v2103_v31 = vsel %vm662_vm0, %v2102_v51, %v7306_v29  ;;  %v6071_v45 = vperm.slane %v7307_v61, %v4370_v24  ;;  %v7308_v51 = vld [vmem:[#allocation90_spill] sm:$0xff]  ;;  %v1248_v3 = vrot.slane %v5887_v12, 4  ;;  %v3332_v61 = vsel %vm3229_vm1, %v5859_v16, -inf  ;;  %v7312_v12 = vld [vmem:[#allocation77_spill] sm:$0xff] }
 0x20a   :  { %v6045_v11 = vld.sshfl [vmem:[#allocation1] sm:$0xff pattern:$0x75316420]  ;;  %3321 = vmax.xlane.f32.xlu0 %v3320_v54  ;;  %v6080_v54 = vperm.slane %v2103_v31, %v4370_v24  ;;  %v3326_v57 = vsel %vm3229_vm1, %v7308_v51, -inf  ;;  %v2283_v31 = vsel %vm662_vm0, 0.0, %v2282_v17  ;;  %v6110_v17 = vperm.slane %v5624_v42, %v4370_v24 }
 0x20b   :  { %7303 = vst [vmem:[#allocation52_spill] sm:$0xff] %v6045_v11  ;;  %v2075_v11 = vsel %vm662_vm0, %v2074_v10, %v7304_v41  ;;  %3324 = vmax.xlane.f32.xlu1 %v3323_v55  ;;  %v1249_v51 = vsel %vm662_vm0, 0.0, %v1248_v3  ;;  %v6114_v16 = vperm.slane %v5719_v49, %v4370_v24 }
 0x20c   :  { %2981 = vst [vmem:[#allocation1] ss:$2 sm:$0xff] %v2031_v40  ;;  %v6057_v22 = vld.sshfl [vmem:[#allocation1 + $0x20] sm:$0xff pattern:$0x75316420]  ;;  %v6076_v60 = vperm.slane %v2075_v11, %v4370_v24  ;;  %v1276_v11 = vrot.slane %v5897_v34, 4 }
 0x20d   :  { %2982 = vst [vmem:[#allocation1 + $0x1] ss:$2 sm:$0xff] %v2059_v14  ;;  %v7305_v40 = vld [vmem:[#allocation46_spill] sm:$0xff]  ;;  %v2255_v14 = vsel %vm662_vm0, 0.0, %v2254_v50  ;;  %v7310_v50 = vld [vmem:[#allocation87_spill] sm:$0xff] }
 0x20e   :  { %v6065_v23 = vperm.slane %v7305_v40, %v4370_v24  ;;  %2877 = vst [vmem:[#allocation1 + $0x20] ss:$2 sm:$0xff] %v1025_v20  ;;  %v2824_v10 = vld.sshfl [vmem:[#allocation1 + $0x30] sm:$0xff pattern:$0x75316420]  ;;  %v3329_v40 = vsel %vm3229_vm1, %v5640_v30, -inf }
 0x20f   :  { %2878 = vst [vmem:[#allocation1 + $0x21] ss:$2 sm:$0xff] %v1053_v27  ;;  %v7309_v20 = vld [vmem:[#allocation80_spill] sm:$0xff]  ;;  %v2326_v27 = vrot.slane %v7310_v50, 4  ;;  %3327 = vmax.xlane.f32.xlu2 %v3326_v57  ;;  %v7313_v30 = vld [vmem:[#allocation85_spill] sm:$0xff]  ;;  %v1277_v50 = vsel %vm662_vm0, 0.0, %v1276_v11 }
 0x210   :  { %2831 = vst [vmem:[#allocation1 + $0x30] ss:$2 sm:$0xff] %v6065_v23  ;;  %v6085_v55 = vld.sshfl [vmem:[#allocation1 + $0x10] sm:$0xff pattern:$0x75316420]  ;;  %v2298_v41 = vrot.slane %v7309_v20, 4 }
 0x211   :  { %2832 = vst [vmem:[#allocation1 + $0x31] ss:$2 sm:$0xff] %v6071_v45  ;;  %v2327_v20 = vsel %vm662_vm0, %v2326_v27, %v7313_v30  ;;  %v3335_v27 = vsel %vm3229_vm1, %v2824_v10, -inf  ;;  %v7315_v11 = vld [vmem:[#allocation10_spill] sm:$0xff]  ;;  %v7317_v10 = vld [vmem:[#allocation16_spill] sm:$0xff] }
 0x212   :  { %2935 = vst [vmem:[#allocation1 + $0x10] ss:$2 sm:$0xff] %v6076_v60  ;;  %3330 = vmax.xlane.f32.xlu0 %v3329_v40  ;;  %v2299_v34 = vsel %vm662_vm0, %v2298_v41, %v7312_v12  ;;  %v6122_v3 = vperm.slane %v2327_v20, %v4370_v24  ;;  %v6129_v49 = vperm.slane %v7315_v11, %v4370_v24  ;;  %v1472_v40 = vrot.slane %v5942_v2, 4  ;;  %v7320_v11 = vld [vmem:[#allocation42_spill] sm:$0xff] }
 0x213   :  { %2936 = vst [vmem:[#allocation1 + $0x11] ss:$2 sm:$0xff] %v6080_v54  ;;  %3333 = vmax.xlane.f32.xlu1 %v3332_v61  ;;  %v6117_v41 = vperm.slane %v2299_v34, %v4370_v24  ;;  %v7316_v61 = vld [vmem:[#allocation96_spill] sm:$0xff]  ;;  %v6138_v34 = vperm.slane %v7317_v10, %v4370_v24  ;;  %v1638_v2 = vrot.slane %v5960_v0, 4  ;;  %v6157_v10 = vperm.slane %v5615_v4, %v4370_v24 }
 0x214   :  { %v6095_v29 = vld.sshfl [vmem:[#allocation1] sm:$0xff pattern:$0x75316420]  ;;  %v3338_v12 = vsel %vm3229_vm1, %v7316_v61, -inf  ;;  %v1473_v20 = vsel %vm662_vm0, 0.0, %v1472_v40  ;;  %v1710_v61 = vrot.slane %v7320_v11, 4  ;;  %v6161_v0 = vperm.slane %v5714_v5, %v4370_v24 }
 0x215   :  { %7311 = vst [vmem:[#allocation36_spill] sm:$0xff] %v6095_v29  ;;  %v3344_v40 = vsel %vm3229_vm1, %v5899_v8, -inf  ;;  %v7323_v11 = vld [vmem:[#allocation30_spill] sm:$0xff] }
 0x216   :  { %2993 = vst [vmem:[#allocation1] ss:$2 sm:$0xff] %v2255_v14  ;;  %v6103_v57 = vld.sshfl [vmem:[#allocation1 + $0x20] sm:$0xff pattern:$0x75316420] }
 0x217   :  { %2994 = vst [vmem:[#allocation1 + $0x1] ss:$2 sm:$0xff] %v2283_v31  ;;  %3336 = vmax.xlane.f32.xlu2 %v3335_v27  ;;  %v1500_v31 = vrot.slane %v5947_v19, 4  ;;  %v1666_v19 = vrot.slane %v5975_v18, 4  ;;  %v7319_v27 = vld [vmem:[#allocation32_spill] sm:$0xff] }
 0x218   :  { %2889 = vst [vmem:[#allocation1 + $0x20] ss:$2 sm:$0xff] %v1249_v51  ;;  %v2836_v14 = vld.sshfl [vmem:[#allocation1 + $0x30] sm:$0xff pattern:$0x75316420]  ;;  %v3341_v51 = vsel %vm3229_vm1, %v5677_v7, -inf }
 0x219   :  { %2890 = vst [vmem:[#allocation1 + $0x21] ss:$2 sm:$0xff] %v1277_v50  ;;  %v1682_v7 = vrot.slane %v7319_v27, 4  ;;  %v3347_v4 = vsel %vm3229_vm1, %v2836_v14, -inf  ;;  %v1667_v5 = vsel %vm662_vm0, 0.0, %v1666_v19  ;;  %v7326_v14 = vld [vmem:[#allocation40_spill] sm:$0xff] }
 0x21a   :  { %2843 = vst [vmem:[#allocation1 + $0x30] ss:$2 sm:$0xff] %v6110_v17  ;;  %v6125_v42 = vld.sshfl [vmem:[#allocation1 + $0x10] sm:$0xff pattern:$0x75316420]  ;;  %3339 = vmax.xlane.f32.xlu0 %v3338_v12  ;;  %v1501_v12 = vsel %vm662_vm0, 0.0, %v1500_v31  ;;  %v1711_v29 = vsel %vm662_vm0, %v1710_v61, %v7326_v14 }
 0x21b   :  { %2844 = vst [vmem:[#allocation1 + $0x31] ss:$2 sm:$0xff] %v6114_v16  ;;  %3342 = vmax.xlane.f32.xlu1 %v3341_v51  ;;  %v1639_v51 = vsel %vm662_vm0, 0.0, %v1638_v2  ;;  %v7321_v31 = vld [vmem:[#allocation11_spill] sm:$0xff]  ;;  %v1683_v8 = vsel %vm662_vm0, %v1682_v7, %v7323_v11  ;;  %v7324_v2 = vld [vmem:[#allocation98_spill] sm:$0xff]  ;;  %v856_v7 = vrot.slane %v6010_v39, 4  ;;  %v6200_v61 = vperm.slane %v1711_v29, %v4370_v24 }
 0x21c   :  { %7314 = vst [vmem:[#allocation62_spill] sm:$0xff] %v6125_v42  ;;  %v6195_v11 = vperm.slane %v1683_v8, %v4370_v24  ;;  %v7329_v14 = vld [vmem:[#allocation41_spill] sm:$0xff] }
 0x21d   :  { %2947 = vst [vmem:[#allocation1 + $0x10] ss:$2 sm:$0xff] %v6117_v41  ;;  %v1934_v8 = vrot.slane %v7329_v14, 4  ;;  %v7330_v42 = vld [vmem:[#allocation29_spill] sm:$0xff] }
 0x21e   :  { %2948 = vst [vmem:[#allocation1 + $0x11] ss:$2 sm:$0xff] %v6122_v3  ;;  %v6143_v30 = vld.sshfl [vmem:[#allocation1] sm:$0xff pattern:$0x75316420] }
 0x21f   :  { %7318 = vst [vmem:[#allocation66_spill] sm:$0xff] %v6143_v30  ;;  %3345 = vmax.xlane.f32.xlu2 %v3344_v40  ;;  %v6181_v40 = vadd.s32 4294967216, %v5861_v47 }
 0x220   :  { %3005 = vst [vmem:[#allocation1] ss:$2 sm:$0xff] %v6129_v49  ;;  %v6150_v50 = vld.sshfl [vmem:[#allocation1 + $0x20] sm:$0xff pattern:$0x75316420] }
 0x221   :  { %3006 = vst [vmem:[#allocation1 + $0x1] ss:$2 sm:$0xff] %v6138_v34 }
 0x222   :  { %2901 = vst [vmem:[#allocation1 + $0x20] ss:$2 sm:$0xff] %v1473_v20  ;;  %v2848_v18 = vld.sshfl [vmem:[#allocation1 + $0x30] sm:$0xff pattern:$0x75316420]  ;;  %v6169_v20 = vperm.slane %v7321_v31, %v4370_v24  ;;  %3348 = vmax.xlane.f32.xlu0 %v3347_v4  ;;  %v7325_v31 = vld [vmem:[#allocation15_spill] sm:$0xff] }
 0x223   :  { %2902 = vst [vmem:[#allocation1 + $0x21] ss:$2 sm:$0xff] %v1501_v12  ;;  %v3350_v12 = vsel %vm3229_vm1, %v7324_v2, -inf  ;;  %v6185_v30 = vperm.slane %v7325_v31, %v4370_v24  ;;  %v1862_v4 = vrot.slane %v6017_v52, 4  ;;  %v3262_v2 = vpop.xlane.xlu1 %3261  ;;  %v7328_v31 = vld [vmem:[#allocation31_spill] sm:$0xff] }
 0x224   :  { %2855 = vst [vmem:[#allocation1 + $0x30] ss:$2 sm:$0xff] %v6157_v10  ;;  %3351 = vmax.xlane.f32.xlu1 %v3350_v12  ;;  %v3782_v39 = vperm.slane %v3262_v2, %v6181_v40  ;;  %v1890_v12 = vrot.slane %v6033_v26, 4  ;;  %v1906_v52 = vrot.slane %v7328_v31, 4  ;;  %v3356_v31 = vsel %vm3229_vm1, %v5949_v28, -inf }
 0x225   :  { %2856 = vst [vmem:[#allocation1 + $0x31] ss:$2 sm:$0xff] %v6161_v0  ;;  %v6173_v27 = vld.sshfl [vmem:[#allocation1 + $0x10] sm:$0xff pattern:$0x75316420]  ;;  %v1863_v26 = vsel %vm662_vm0, 0.0, %v1862_v4 }
 0x226   :  { %7322 = vst [vmem:[#allocation39_spill] sm:$0xff] %v6173_v27  ;;  %v6215_v27 = vsel %vm7158_vm11, %v3782_v39, %v6060_v48  ;;  %v1891_v14 = vsel %vm662_vm0, 0.0, %v1890_v12  ;;  %v1907_v48 = vsel %vm662_vm0, %v1906_v52, %v7330_v42  ;;  %v7331_v39 = vld [vmem:[#allocation70_spill] sm:$0xff]  ;;  %v1108_v52 = vrot.slane %v6071_v45, 4 }
 0x227   :  { %2959 = vst [vmem:[#allocation1 + $0x10] ss:$2 sm:$0xff] %v1639_v51  ;;  %v884_v51 = vrot.slane %v6022_v21, 4  ;;  %v3353_v21 = vsel %vm3229_vm1, %v5737_v38, -inf  ;;  %v3359_v38 = vsel %vm3229_vm1, %v2848_v18, -inf  ;;  %v6229_v4 = vperm.slane %v7331_v39, %v4370_v24  ;;  %v7333_v18 = vld [vmem:[#allocation76_spill] sm:$0xff] }
 0x228   :  { %2960 = vst [vmem:[#allocation1 + $0x11] ss:$2 sm:$0xff] %v1667_v5  ;;  %v6189_v19 = vld.sshfl [vmem:[#allocation1] sm:$0xff pattern:$0x75316420]  ;;  %3354 = vmax.xlane.f32.xlu2 %v3353_v21  ;;  %v6236_v21 = vperm.slane %v7333_v18, %v4370_v24  ;;  %v6242_v42 = vperm.slane %v1907_v48, %v4370_v24  ;;  %v1109_v39 = vsel %vm662_vm0, 0.0, %v1108_v52 }
 0x229   :  { %7327 = vst [vmem:[#allocation73_spill] sm:$0xff] %v6189_v19  ;;  %v857_v19 = vsel %vm662_vm0, 0.0, %v856_v7  ;;  %v885_v2 = vsel %vm662_vm0, 0.0, %v884_v51  ;;  %v1080_v51 = vrot.slane %v6065_v23, 4  ;;  %v2086_v23 = vrot.slane %v6076_v60, 4 }
 0x22a   :  { %3017 = vst [vmem:[#allocation1] ss:$2 sm:$0xff] %v6169_v20  ;;  %v6202_v5 = vld.sshfl [vmem:[#allocation1 + $0x20] sm:$0xff pattern:$0x75316420]  ;;  %3357 = vmax.xlane.f32.xlu0 %v3356_v31  ;;  %v3365_v60 = vsel %vm3229_vm1, %v5792_v9, -inf }
 0x22b   :  { %3018 = vst [vmem:[#allocation1 + $0x1] ss:$2 sm:$0xff] %v6185_v30  ;;  %v1081_v31 = vsel %vm662_vm0, 0.0, %v1080_v51  ;;  %v7337_v9 = vld [vmem:[#allocation75_spill] sm:$0xff] }
 0x22c   :  { %2913 = vst [vmem:[#allocation1 + $0x20] ss:$2 sm:$0xff] %v6195_v11  ;;  %v2860_v29 = vld.sshfl [vmem:[#allocation1 + $0x30] sm:$0xff pattern:$0x75316420]  ;;  %3360 = vmax.xlane.f32.xlu1 %v3359_v38  ;;  %v2114_v38 = vrot.slane %v6080_v54, 4  ;;  %v6274_v52 = vperm.slane %v7337_v9, %v4370_v24 }
 0x22d   :  { %2914 = vst [vmem:[#allocation1 + $0x21] ss:$2 sm:$0xff] %v6200_v61  ;;  %v2087_v54 = vsel %vm662_vm0, 0.0, %v2086_v23  ;;  %v1304_v23 = vrot.slane %v6110_v17, 4  ;;  %v7340_v9 = vld [vmem:[#allocation93_spill] sm:$0xff] }
 0x22e   :  { %2867 = vst [vmem:[#allocation1 + $0x30] ss:$2 sm:$0xff] %v857_v19  ;;  %v7332_v19 = vld [vmem:[#allocation38_spill] sm:$0xff]  ;;  %v2115_v18 = vsel %vm662_vm0, 0.0, %v2114_v38  ;;  %v2310_v38 = vrot.slane %v6117_v41, 4  ;;  %v1584_v41 = vrot.slane %v6129_v49, 4 }
 0x22f   :  { %2868 = vst [vmem:[#allocation1 + $0x31] ss:$2 sm:$0xff] %v885_v2  ;;  %v6222_v7 = vld.sshfl [vmem:[#allocation1 + $0x10] sm:$0xff pattern:$0x75316420]  ;;  %v1935_v28 = vsel %vm662_vm0, %v1934_v8, %v7332_v19  ;;  %v3362_v2 = vsel %vm3229_vm1, %v5524_v36, -inf }
 0x230   :  { %2971 = vst [vmem:[#allocation1 + $0x10] ss:$2 sm:$0xff] %v1863_v26  ;;  %v6247_v8 = vperm.slane %v1935_v28, %v4370_v24  ;;  %3363 = vmax.xlane.f32.xlu2 %v3362_v2  ;;  %v3368_v36 = vsel %vm3229_vm1, %v6003_v56, -inf  ;;  %v7336_v28 = vld [vmem:[#allocation69_spill] sm:$0xff]  ;;  %v7338_v2 = vld [vmem:[#allocation92_spill] sm:$0xff]  ;;  %v1305_v17 = vsel %vm662_vm0, 0.0, %v1304_v23 }
 0x231   :  { %2972 = vst [vmem:[#allocation1 + $0x11] ss:$2 sm:$0xff] %v1891_v14  ;;  %v7335_v14 = vld [vmem:[#allocation94_spill] sm:$0xff]  ;;  %v6269_v51 = vperm.slane %v7336_v28, %v4370_v24  ;;  %v1528_v23 = vrot.slane %v6157_v10, 4 }
 0x232   :  { %v6238_v12 = vld.sshfl [vmem:[#allocation1] sm:$0xff pattern:$0x75316420]  ;;  %v2130_v48 = vrot.slane %v7335_v14, 4  ;;  %3366 = vmax.xlane.f32.xlu0 %v3365_v60  ;;  %v1332_v14 = vrot.slane %v6114_v16, 4  ;;  %v3371_v60 = vsel %vm3229_vm1, %v2860_v29, -inf }
 0x233   :  { %7334 = vst [vmem:[#allocation63_spill] sm:$0xff] %v6238_v12  ;;  %v3377_v29 = vsel %vm3229_vm1, %v5834_v15, -inf  ;;  %v2311_v15 = vsel %vm662_vm0, 0.0, %v2310_v38  ;;  %v7342_v38 = vld [vmem:[#allocation91_spill] sm:$0xff] }
 0x234   :  { %3029 = vst [vmem:[#allocation1] ss:$2 sm:$0xff] %v6229_v4  ;;  %v6250_v26 = vld.sshfl [vmem:[#allocation1 + $0x20] sm:$0xff pattern:$0x75316420]  ;;  %3369 = vmax.xlane.f32.xlu1 %v3368_v36  ;;  %v2131_v56 = vsel %vm662_vm0, %v2130_v48, %v7338_v2  ;;  %v2338_v48 = vrot.slane %v6122_v3, 4  ;;  %v6303_v3 = vperm.slane %v5513_v37, %v4370_v24 }
 0x235   :  { %3030 = vst [vmem:[#allocation1 + $0x1] ss:$2 sm:$0xff] %v6236_v21  ;;  %v3374_v36 = vsel %vm3229_vm1, %v5552_v53, -inf  ;;  %v1333_v28 = vsel %vm662_vm0, 0.0, %v1332_v14  ;;  %v1612_v53 = vrot.slane %v6138_v34, 4  ;;  %v2354_v2 = vrot.slane %v7340_v9, 4 }
 0x236   :  { %2925 = vst [vmem:[#allocation1 + $0x20] ss:$2 sm:$0xff] %v6242_v42  ;;  %v2872_v45 = vld.sshfl [vmem:[#allocation1 + $0x30] sm:$0xff pattern:$0x75316420]  ;;  %v2339_v49 = vsel %vm662_vm0, 0.0, %v2338_v48 }
 0x237   :  { %2926 = vst [vmem:[#allocation1 + $0x21] ss:$2 sm:$0xff] %v6247_v8  ;;  %v3380_v34 = vsel %vm3229_vm1, %v6057_v22, -inf  ;;  %v1613_v14 = vsel %vm662_vm0, 0.0, %v1612_v53  ;;  %v2355_v48 = vsel %vm662_vm0, %v2354_v2, %v7342_v38  ;;  %v1529_v22 = vsel %vm662_vm0, 0.0, %v1528_v23  ;;  %v7345_v9 = vld [vmem:[#allocation57_spill] sm:$0xff] }
 0x238   :  { %2879 = vst [vmem:[#allocation1 + $0x30] ss:$2 sm:$0xff] %v1081_v31  ;;  %v6265_v19 = vld.sshfl [vmem:[#allocation1 + $0x10] sm:$0xff pattern:$0x75316420]  ;;  %3372 = vmax.xlane.f32.xlu2 %v3371_v60  ;;  %v1556_v60 = vrot.slane %v6161_v0, 4  ;;  %v6331_v0 = vperm.slane %v2355_v48, %v4370_v24 }
 0x239   :  { %2880 = vst [vmem:[#allocation1 + $0x31] ss:$2 sm:$0xff] %v1109_v39  ;;  %v6287_v39 = vperm.slane %v2131_v56, %v4370_v24  ;;  %v1585_v56 = vsel %vm662_vm0, 0.0, %v1584_v41  ;;  %v1766_v2 = vrot.slane %v7345_v9, 4  ;;  %v1836_v23 = vrot.slane %v6185_v30, 4  ;;  %v7348_v38 = vld [vmem:[#allocation28_spill] sm:$0xff] }
 0x23a   :  { %2983 = vst [vmem:[#allocation1 + $0x10] ss:$2 sm:$0xff] %v2087_v54  ;;  %3375 = vmax.xlane.f32.xlu0 %v3374_v36  ;;  %v7343_v36 = vld [vmem:[#allocation102_spill] sm:$0xff]  ;;  %v1557_v53 = vsel %vm662_vm0, 0.0, %v1556_v60  ;;  %v1694_v48 = vrot.slane %v6195_v11, 4  ;;  %v7349_v30 = vld [vmem:[#allocation47_spill] sm:$0xff] }
 0x23b   :  { %2984 = vst [vmem:[#allocation1 + $0x11] ss:$2 sm:$0xff] %v2115_v18  ;;  %v3386_v10 = vsel %vm3229_vm1, %v7343_v36, -inf  ;;  %v3392_v9 = vsel %vm3229_vm1, %v6103_v57, -inf  ;;  %v3271_v57 = vpop.xlane.xlu1 %3270 }
 0x23c   :  { %v6279_v31 = vld.sshfl [vmem:[#allocation1] sm:$0xff pattern:$0x75316420]  ;;  %3378 = vmax.xlane.f32.xlu1 %v3377_v29 }
 0x23d   :  { %7339 = vst [vmem:[#allocation71_spill] sm:$0xff] %v6279_v31  ;;  %v7344_v29 = vld [vmem:[#allocation50_spill] sm:$0xff] }
 0x23e   :  { %3041 = vst [vmem:[#allocation1] ss:$2 sm:$0xff] %v6269_v51  ;;  %v6293_v54 = vld.sshfl [vmem:[#allocation1 + $0x20] sm:$0xff pattern:$0x75316420]  ;;  %v1738_v41 = vrot.slane %v7344_v29, 4 }
 0x23f   :  { %3042 = vst [vmem:[#allocation1 + $0x1] ss:$2 sm:$0xff] %v6274_v52 }
 0x240   :  { %v6295_v16 = vld.sshfl [vmem:[#allocation1 + $0x30] sm:$0xff pattern:$0x75316420]  ;;  %2937 = vst [vmem:[#allocation1 + $0x20] ss:$2 sm:$0xff] %v6287_v39  ;;  %3381 = vmax.xlane.f32.xlu2 %v3380_v34  ;;  %v7347_v34 = vld [vmem:[#allocation22_spill] sm:$0xff]  ;;  %v1739_v36 = vsel %vm662_vm0, %v1738_v41, %v7349_v30 }
 0x241   :  { %2891 = vst [vmem:[#allocation1 + $0x30] ss:$2 sm:$0xff] %v1305_v17  ;;  %v3383_v17 = vsel %vm3229_vm1, %v2872_v45, -inf  ;;  %v1808_v45 = vrot.slane %v6169_v20, 4  ;;  %v6352_v20 = vperm.slane %v7348_v38, %v4370_v24  ;;  %v1837_v41 = vsel %vm662_vm0, 0.0, %v1836_v23 }
 0x242   :  { %2892 = vst [vmem:[#allocation1 + $0x31] ss:$2 sm:$0xff] %v1333_v28  ;;  %v6307_v18 = vld.sshfl [vmem:[#allocation1 + $0x10] sm:$0xff pattern:$0x75316420]  ;;  %3384 = vmax.xlane.f32.xlu0 %v3383_v17  ;;  %v3389_v17 = vsel %vm3229_vm1, %v5874_v25, -inf }
 0x243   :  { %2938 = vst [vmem:[#allocation1 + $0x21] ss:$2 sm:$0xff] %v6303_v3  ;;  %v6370_v25 = vadd.s32 4294967200, %v5861_v47  ;;  %v1722_v38 = vrot.slane %v6200_v61, 4  ;;  %v1695_v30 = vsel %vm662_vm0, 0.0, %v1694_v48 }
 0x244   :  { %2995 = vst [vmem:[#allocation1 + $0x10] ss:$2 sm:$0xff] %v2311_v15  ;;  %3387 = vmax.xlane.f32.xlu1 %v3386_v10  ;;  %v6361_v10 = vadd.s32 4294967208, %v5861_v47 }
 0x245   :  { %2996 = vst [vmem:[#allocation1 + $0x11] ss:$2 sm:$0xff] %v2339_v49  ;;  %v7346_v49 = vld [vmem:[#allocation99_spill] sm:$0xff] }
 0x246   :  { %v6313_v37 = vld.sshfl [vmem:[#allocation1] sm:$0xff pattern:$0x75316420] }
 0x247   :  { %7341 = vst [vmem:[#allocation65_spill] sm:$0xff] %v6313_v37 }
 0x248   :  { %3053 = vst [vmem:[#allocation1] ss:$2 sm:$0xff] %v1585_v56  ;;  %v6340_v56 = vperm.slane %v7346_v49, %v4370_v24  ;;  %3390 = vmax.xlane.f32.xlu2 %v3389_v17  ;;  %v3268_v49 = vpop.xlane.xlu0 %3267  ;;  %v6384_v17 = vperm.slane %v1739_v36, %v4370_v24  ;;  %v3265_v23 = vpop.xlane.xlu2 %3264  ;;  %v2032_v36 = vrot.slane %v6229_v4, 4  ;;  %v1723_v4 = vsel %vm662_vm0, 0.0, %v1722_v38 }
 0x249   :  { %3054 = vst [vmem:[#allocation1 + $0x1] ss:$2 sm:$0xff] %v1613_v14  ;;  %v6328_v28 = vld.sshfl [vmem:[#allocation1 + $0x30] sm:$0xff pattern:$0x75316420]  ;;  %v6345_v14 = vperm.slane %v7347_v34, %v4370_v24  ;;  %v6377_v34 = vadd.s32 4294967192, %v5861_v47 }
 0x24a   :  { %2903 = vst [vmem:[#allocation1 + $0x30] ss:$2 sm:$0xff] %v1529_v22  ;;  %v6334_v15 = vld.sshfl [vmem:[#allocation1 + $0x20] sm:$0xff pattern:$0x75316420]  ;;  %v1809_v22 = vsel %vm662_vm0, 0.0, %v1808_v45  ;;  %3393 = vmax.xlane.f32.xlu0 %v3392_v9 }
 0x24b   :  { %2904 = vst [vmem:[#allocation1 + $0x31] ss:$2 sm:$0xff] %v1557_v53  ;;  %v7351_v53 = vld [vmem:[#allocation55_spill] sm:$0xff]  ;;  %v3395_v45 = vsel %vm3229_vm1, %v6295_v16, -inf  ;;  %v7352_v16 = vld [vmem:[#allocation48_spill] sm:$0xff] }
 0x24c   :  { %2949 = vst [vmem:[#allocation1 + $0x20] ss:$2 sm:$0xff] %v6331_v0  ;;  %v6348_v60 = vld.sshfl [vmem:[#allocation1 + $0x10] sm:$0xff pattern:$0x75316420]  ;;  %v1767_v11 = vsel %vm662_vm0, %v1766_v2, %v7351_v53  ;;  %v1918_v2 = vrot.slane %v6242_v42, 4  ;;  %3396 = vmax.xlane.f32.xlu1 %v3395_v45  ;;  %v3786_v42 = vperm.slane %v3265_v23, %v6361_v10 }
 0x24d   :  { %2950 = vst [vmem:[#allocation1 + $0x21] ss:$2 sm:$0xff] %v6340_v56  ;;  %v6388_v53 = vperm.slane %v1767_v11, %v4370_v24  ;;  %v1962_v61 = vrot.slane %v7352_v16, 4  ;;  %v7354_v11 = vld [vmem:[#allocation56_spill] sm:$0xff] }
 0x24e   :  { %3007 = vst [vmem:[#allocation1 + $0x10] ss:$2 sm:$0xff] %v6345_v14  ;;  %v1990_v45 = vrot.slane %v7354_v11, 4  ;;  %v3788_v23 = vsel %vm7157_vm12, %v3786_v42, %v6215_v27  ;;  %v7355_v11 = vld [vmem:[#allocation27_spill] sm:$0xff] }
 0x24f   :  { %3008 = vst [vmem:[#allocation1 + $0x11] ss:$2 sm:$0xff] %v6352_v20  ;;  %v6415_v31 = vperm.slane %v7355_v11, %v4370_v24 }
 0x250   :  { %v6364_v29 = vld.sshfl [vmem:[#allocation1] sm:$0xff pattern:$0x75316420] }
 0x251   :  { %7350 = vst [vmem:[#allocation34_spill] sm:$0xff] %v6364_v29  ;;  %v3794_v29 = vperm.slane %v3271_v57, %v6377_v34  ;;  %v6418_v57 = vadd.s32 4294967184, %v5861_v47 }
 0x252   :  { %3065 = vst [vmem:[#allocation1] ss:$2 sm:$0xff] %v1809_v22  ;;  %v6390_v9 = vld.sshfl [vmem:[#allocation1 + $0x30] sm:$0xff pattern:$0x75316420]  ;;  %v3790_v22 = vperm.slane %v3268_v49, %v6370_v25  ;;  %v2060_v49 = vrot.slane %v6236_v21, 4 }
 0x253   :  { %3066 = vst [vmem:[#allocation1 + $0x1] ss:$2 sm:$0xff] %v1837_v41  ;;  %v7353_v41 = vld [vmem:[#allocation21_spill] sm:$0xff] }
 0x254   :  { %2915 = vst [vmem:[#allocation1 + $0x30] ss:$2 sm:$0xff] %v6384_v17  ;;  %v6399_v48 = vperm.slane %v7353_v41, %v4370_v24  ;;  %v6406_v16 = vld.sshfl [vmem:[#allocation1 + $0x20] sm:$0xff pattern:$0x75316420]  ;;  %v3792_v37 = vsel %vm7156_vm13, %v3790_v22, %v3788_v23  ;;  %v3398_v41 = vsel %vm3229_vm1, %v5649_v35, -inf }
 0x255   :  { %2916 = vst [vmem:[#allocation1 + $0x31] ss:$2 sm:$0xff] %v6388_v53  ;;  %3399 = vmax.xlane.f32.xlu2 %v3398_v41  ;;  %v3796_v27 = vsel %vm7155_vm14, %v3794_v29, %v3792_v37  ;;  %v7356_v21 = vld [vmem:[#allocation45_spill] sm:$0xff]  ;;  %v2033_v22 = vsel %vm662_vm0, 0.0, %v2032_v36  ;;  %v3401_v35 = vsel %vm3229_vm1, %v5915_v63, -inf  ;;  %v7357_v23 = vld [vmem:[#allocation54_spill] sm:$0xff]  ;;  %v3274_v63 = vpop.xlane.xlu2 %3273 }
 0x256   :  { %2961 = vst [vmem:[#allocation1 + $0x20] ss:$2 sm:$0xff] %v1695_v30  ;;  %v6421_v38 = vld.sshfl [vmem:[#allocation1 + $0x10] sm:$0xff pattern:$0x75316420]  ;;  %v1963_v42 = vsel %vm662_vm0, %v1962_v61, %v7356_v21  ;;  %v3404_v30 = vsel %vm3229_vm1, %v6150_v50, -inf  ;;  %v1991_v41 = vsel %vm662_vm0, %v1990_v45, %v7357_v23  ;;  %3402 = vmax.xlane.f32.xlu0 %v3401_v35  ;;  %v3798_v45 = vperm.slane %v3274_v63, %v6418_v57  ;;  %v3277_v21 = vpop.xlane.xlu0 %3276 }
 0x257   :  { %2962 = vst [vmem:[#allocation1 + $0x21] ss:$2 sm:$0xff] %v1723_v4  ;;  %v6434_v37 = vadd.s32 4294967176, %v5861_v47  ;;  %v2061_v61 = vsel %vm662_vm0, 0.0, %v2060_v49  ;;  %3405 = vmax.xlane.f32.xlu1 %v3404_v30  ;;  %v1946_v50 = vrot.slane %v6247_v8, 4  ;;  %v6442_v36 = vperm.slane %v1963_v42, %v4370_v24  ;;  %v3280_v8 = vpop.xlane.xlu1 %3279 }
 0x258   :  { %3019 = vst [vmem:[#allocation1 + $0x10] ss:$2 sm:$0xff] %v6399_v48  ;;  %v6446_v4 = vperm.slane %v1991_v41, %v4370_v24  ;;  %vm3803_vm14 = vcmask 1048512   ;;  %v1919_v49 = vsel %vm662_vm0, 0.0, %v1918_v2  ;;  %v2256_v35 = vrot.slane %v6269_v51, 4  ;;  %v7359_v51 = vld [vmem:[#allocation83_spill] sm:$0xff] }
 0x259   :  { %3020 = vst [vmem:[#allocation1 + $0x11] ss:$2 sm:$0xff] %v6415_v31  ;;  %v3800_v42 = vsel %vm3799_vm15, %v3798_v45, %v3796_v27  ;;  %v3407_v30 = vsel %vm3229_vm1, %v6328_v28, -inf  ;;  %v1947_v41 = vsel %vm662_vm0, 0.0, %v1946_v50  ;;  %v2284_v2 = vrot.slane %v6274_v52, 4  ;;  %v7360_v27 = vld [vmem:[#allocation89_spill] sm:$0xff] }
 0x25a   :  { %v6437_v29 = vld.sshfl [vmem:[#allocation1] sm:$0xff pattern:$0x75316420]  ;;  %v6471_v45 = vperm.slane %v7360_v27, %v4370_v24  ;;  %v3410_v28 = vsel %vm3229_vm1, %v5698_v13, -inf  ;;  %v3413_v52 = vsel %vm3229_vm1, %v5977_v59, -inf  ;;  %v2142_v13 = vrot.slane %v6287_v39, 4 }
 0x25b   :  { %7358 = vst [vmem:[#allocation67_spill] sm:$0xff] %v6437_v29  ;;  %v2170_v59 = vrot.slane %v6303_v3, 4  ;;  %v3416_v3 = vsel %vm3229_vm1, %v6202_v5, -inf  ;;  %v3419_v5 = vsel %vm3229_vm1, %v6390_v9, -inf  ;;  %v1640_v29 = vrot.slane %v6345_v14, 4 }
 0x25c   :  { %3077 = vst [vmem:[#allocation1] ss:$2 sm:$0xff] %v2033_v22  ;;  %v6448_v11 = vld.sshfl [vmem:[#allocation1 + $0x30] sm:$0xff pattern:$0x75316420]  ;;  %v3802_v22 = vperm.slane %v3277_v21, %v6434_v37  ;;  %v2257_v21 = vsel %vm662_vm0, 0.0, %v2256_v35 }
 0x25d   :  { %3078 = vst [vmem:[#allocation1 + $0x1] ss:$2 sm:$0xff] %v2061_v61  ;;  %v6464_v61 = vperm.slane %v7359_v51, %v4370_v24  ;;  %3408 = vmax.xlane.f32.xlu2 %v3407_v30  ;;  %v3805_v30 = vperm.slane %v3280_v8, %v5861_v47  ;;  %v7363_v51 = vld [vmem:[#allocation106_spill] sm:$0xff]  ;;  %v3428_v14 = vsel %vm3229_vm1, %v6250_v26, -inf  ;;  %v1750_v26 = vrot.slane %v6384_v17, 4 }
 0x25e   :  { %2927 = vst [vmem:[#allocation1 + $0x30] ss:$2 sm:$0xff] %v6442_v36  ;;  %v6458_v23 = vld.sshfl [vmem:[#allocation1 + $0x20] sm:$0xff pattern:$0x75316420]  ;;  %v6467_v63 = vsel %vm3803_vm14, %v3802_v22, %v3800_v42  ;;  %3411 = vmax.xlane.f32.xlu0 %v3410_v28  ;;  %v2285_v22 = vsel %vm662_vm0, 0.0, %v2284_v2  ;;  %v6491_v35 = vperm.slane %v7363_v51, %v4370_v24  ;;  %v3286_v27 = vpop.xlane.xlu0 %3285  ;;  %v6495_v28 = vperm.slane %v5776_v62, %v4370_v24 }
 0x25f   :  { %2928 = vst [vmem:[#allocation1 + $0x31] ss:$2 sm:$0xff] %v6446_v4  ;;  %3414 = vmax.xlane.f32.xlu1 %v3413_v52  ;;  %v3808_v39 = vperm.slane %v3286_v27, %v5923_v58  ;;  %v3289_v8 = vpop.xlane.xlu1 %3288  ;;  %v2171_v27 = vsel %vm662_vm0, 0.0, %v2170_v59  ;;  %v2366_v59 = vrot.slane %v6331_v0, 4  ;;  %v7371_v0 = vld [vmem:[#allocation8_spill] sm:$0xff]  ;;  %v1892_v17 = vrot.slane %v6415_v31, 4 }
 0x260   :  { %2973 = vst [vmem:[#allocation1 + $0x20] ss:$2 sm:$0xff] %v1919_v49  ;;  %v6475_v50 = vld.sshfl [vmem:[#allocation1 + $0x10] sm:$0xff pattern:$0x75316420]  ;;  %v3283_v49 = vpop.xlane.xlu2 %3282 }
 0x261   :  { %2974 = vst [vmem:[#allocation1 + $0x21] ss:$2 sm:$0xff] %v1947_v41  ;;  %v3806_v41 = vperm.slane %v3283_v49, %v5877_v33  ;;  %v7374_v31 = vld [vmem:[#allocation44_spill] sm:$0xff] }
 0x262   :  { %7361 = vst [vmem:[#allocation37_spill] sm:$0xff] %v6475_v50 }
 0x263   :  { %3031 = vst [vmem:[#allocation1 + $0x10] ss:$2 sm:$0xff] %v6464_v61  ;;  %v3807_v2 = vsel %vm3747_vm2, %v3806_v41, %v3805_v30  ;;  %v7365_v30 = vld [vmem:[#allocation82_spill] sm:$0xff] }
 0x264   :  { %3032 = vst [vmem:[#allocation1 + $0x11] ss:$2 sm:$0xff] %v6471_v45  ;;  %v6482_v42 = vld.sshfl [vmem:[#allocation1] sm:$0xff pattern:$0x75316420]  ;;  %v3809_v51 = vsel %vm3751_vm3, %v3808_v39, %v3807_v2  ;;  %v6512_v41 = vperm.slane %v7365_v30, %v4370_v24  ;;  %v7367_v39 = vld [vmem:[#allocation9_spill] sm:$0xff] }
 0x265   :  { %7362 = vst [vmem:[#allocation84_spill] sm:$0xff] %v6482_v42  ;;  %3417 = vmax.xlane.f32.xlu2 %v3416_v3  ;;  %v3422_v3 = vsel %vm3229_vm1, %v7367_v39, -inf }
 0x266   :  { %3089 = vst [vmem:[#allocation1] ss:$2 sm:$0xff] %v2257_v21  ;;  %v6499_v52 = vld.sshfl [vmem:[#allocation1 + $0x30] sm:$0xff pattern:$0x75316420]  ;;  %v7364_v21 = vld [vmem:[#allocation74_spill] sm:$0xff]  ;;  %3420 = vmax.xlane.f32.xlu0 %v3419_v5 }
 0x267   :  { %3090 = vst [vmem:[#allocation1 + $0x1] ss:$2 sm:$0xff] %v2285_v22  ;;  %v3810_v49 = vperm.slane %v3289_v8, %v7364_v21  ;;  %v2143_v22 = vsel %vm662_vm0, 0.0, %v2142_v13  ;;  %v7366_v13 = vld [vmem:[#allocation88_spill] sm:$0xff]  ;;  %3423 = vmax.xlane.f32.xlu1 %v3422_v3  ;;  %v3298_v39 = vpop.xlane.xlu1 %3297 }
 0x268   :  { %2939 = vst [vmem:[#allocation1 + $0x30] ss:$2 sm:$0xff] %v6491_v35  ;;  %v6508_v62 = vld.sshfl [vmem:[#allocation1 + $0x20] sm:$0xff pattern:$0x75316420]  ;;  %v6520_v2 = vperm.slane %v7366_v13, %v4370_v24  ;;  %v3292_v30 = vpop.xlane.xlu2 %3291 }
 0x269   :  { %2940 = vst [vmem:[#allocation1 + $0x31] ss:$2 sm:$0xff] %v6495_v28  ;;  %v3811_v8 = vsel %vm3755_vm4, %v3810_v49, %v3809_v51  ;;  %v3812_v9 = vperm.slane %v3292_v30, %v5936_v43  ;;  %v3295_v49 = vpop.xlane.xlu0 %3294  ;;  %v7369_v51 = vld [vmem:[#allocation105_spill] sm:$0xff]  ;;  %v3816_v30 = vperm.slane %v3298_v39, %v5972_v46 }
 0x26a   :  { %2985 = vst [vmem:[#allocation1 + $0x20] ss:$2 sm:$0xff] %v2143_v22  ;;  %v2394_v22 = vrot.slane %v6340_v56, 4  ;;  %v6533_v5 = vperm.slane %v7369_v51, %v4370_v24  ;;  %v3425_v56 = vsel %vm3229_vm1, %v6035_v44, -inf  ;;  %v1668_v51 = vrot.slane %v6352_v20, 4 }
 0x26b   :  { %2986 = vst [vmem:[#allocation1 + $0x21] ss:$2 sm:$0xff] %v2171_v27  ;;  %v6524_v42 = vld.sshfl [vmem:[#allocation1 + $0x10] sm:$0xff pattern:$0x75316420]  ;;  %v3813_v3 = vsel %vm3759_vm5, %v3812_v9, %v3811_v8  ;;  %v3431_v20 = vsel %vm3229_vm1, %v6448_v11, -inf }
 0x26c   :  { %7368 = vst [vmem:[#allocation20_spill] sm:$0xff] %v6524_v42  ;;  %v7370_v27 = vld [vmem:[#allocation64_spill] sm:$0xff]  ;;  %v6540_v42 = vperm.slane %v7371_v0, %v4370_v24  ;;  %v2395_v44 = vsel %vm662_vm0, 0.0, %v2394_v22  ;;  %v1778_v22 = vrot.slane %v6388_v53, 4 }
 0x26d   :  { %3043 = vst [vmem:[#allocation1 + $0x10] ss:$2 sm:$0xff] %v6512_v41  ;;  %v3814_v13 = vperm.slane %v3295_v49, %v7370_v27  ;;  %v2367_v49 = vsel %vm662_vm0, 0.0, %v2366_v59  ;;  %3426 = vmax.xlane.f32.xlu2 %v3425_v56  ;;  %v1641_v59 = vsel %vm662_vm0, 0.0, %v1640_v29 }
 0x26e   :  { %3044 = vst [vmem:[#allocation1 + $0x11] ss:$2 sm:$0xff] %v6520_v2  ;;  %3429 = vmax.xlane.f32.xlu0 %v3428_v14 }
 0x26f   :  { %v3815_v12 = vsel %vm3763_vm6, %v3814_v13, %v3813_v3  ;;  %3432 = vmax.xlane.f32.xlu1 %v3431_v20  ;;  %v3307_v11 = vpop.xlane.xlu1 %3306 }
 0x270   :  { %v6545_v50 = vld.sshfl [vmem:[#allocation1 + $0x30] sm:$0xff pattern:$0x75316420]  ;;  %v3817_v8 = vsel %vm3767_vm7, %v3816_v30, %v3815_v12  ;;  %v3301_v13 = vpop.xlane.xlu2 %3300  ;;  %v1669_v12 = vsel %vm662_vm0, 0.0, %v1668_v51  ;;  %v3822_v56 = vperm.slane %v3307_v11, %v6030_v6  ;;  %v1864_v51 = vrot.slane %v6399_v48, 4 }
 0x271   :  { %2951 = vst [vmem:[#allocation1 + $0x30] ss:$2 sm:$0xff] %v6533_v5  ;;  %v3818_v3 = vperm.slane %v3301_v13, %v5981_v1  ;;  %v3304_v0 = vpop.xlane.xlu0 %3303  ;;  %v1779_v13 = vsel %vm662_vm0, 0.0, %v1778_v22 }
 0x272   :  { %2952 = vst [vmem:[#allocation1 + $0x31] ss:$2 sm:$0xff] %v6540_v42  ;;  %v6555_v9 = vld.sshfl [vmem:[#allocation1 + $0x20] sm:$0xff pattern:$0x75316420]  ;;  %v3820_v29 = vperm.slane %v3304_v0, %v6014_v32 }
 0x273   :  { %2997 = vst [vmem:[#allocation1 + $0x20] ss:$2 sm:$0xff] %v2367_v49  ;;  %v3819_v30 = vsel %vm3771_vm8, %v3818_v3, %v3817_v8  ;;  %v7372_v49 = vld [vmem:[#allocation12_spill] sm:$0xff]  ;;  %v7373_v8 = vld [vmem:[#allocation35_spill] sm:$0xff]  ;;  %v3440_v3 = vsel %vm3229_vm1, %v6293_v54, -inf }
 0x274   :  { %2998 = vst [vmem:[#allocation1 + $0x21] ss:$2 sm:$0xff] %v2395_v44  ;;  %v3434_v14 = vsel %vm3229_vm1, %v7372_v49, -inf  ;;  %v1751_v44 = vsel %vm662_vm0, 0.0, %v1750_v26  ;;  %v3821_v53 = vsel %vm3775_vm9, %v3820_v29, %v3819_v30  ;;  %v6588_v26 = vperm.slane %v7374_v31, %v4370_v24 }
 0x275   :  { %v6561_v39 = vld.sshfl [vmem:[#allocation1 + $0x10] sm:$0xff pattern:$0x75316420]  ;;  %3435 = vmax.xlane.f32.xlu2 %v3434_v14  ;;  %v3823_v48 = vsel %vm3779_vm10, %v3822_v56, %v3821_v53  ;;  %v1893_v29 = vsel %vm662_vm0, 0.0, %v1892_v17  ;;  %v1974_v56 = vrot.slane %v6442_v36, 4  ;;  %v2002_v49 = vrot.slane %v6446_v4, 4 }
 0x276   :  { %3055 = vst [vmem:[#allocation1 + $0x10] ss:$2 sm:$0xff] %v1641_v59  ;;  %v6580_v59 = vperm.slane %v7373_v8, %v4370_v24  ;;  %v3443_v8 = vsel %vm3229_vm1, %v6499_v52, -inf  ;;  %v2088_v17 = vrot.slane %v6464_v61, 4  ;;  %v7378_v61 = vld [vmem:[#allocation43_spill] sm:$0xff] }
 0x277   :  { %3056 = vst [vmem:[#allocation1 + $0x11] ss:$2 sm:$0xff] %v1669_v12  ;;  %v3437_v12 = vsel %vm3229_vm1, %v6085_v55, -inf  ;;  %3441 = vmax.xlane.f32.xlu1 %v3440_v3  ;;  %v1865_v55 = vsel %vm662_vm0, 0.0, %v1864_v51  ;;  %v3316_v53 = vpop.xlane.xlu1 %3315  ;;  %v1975_v36 = vsel %vm662_vm0, 0.0, %v1974_v56  ;;  %v7376_v3 = vld [vmem:[#allocation33_spill] sm:$0xff]  ;;  %v6626_v56 = vperm.slane %v7378_v61, %v4370_v24 }
 0x278   :  { %3438 = vmax.xlane.f32.xlu0 %v3437_v12  ;;  %v3310_v11 = vpop.xlane.xlu2 %3309  ;;  %v3828_v51 = vperm.slane %v3316_v53, %v6370_v25  ;;  %v7375_v12 = vld [vmem:[#allocation78_spill] sm:$0xff]  ;;  %v2003_v52 = vsel %vm662_vm0, 0.0, %v2002_v49 }
 0x279   :  { %v6576_v20 = vld.sshfl [vmem:[#allocation1 + $0x30] sm:$0xff pattern:$0x75316420]  ;;  %v3824_v22 = vperm.slane %v3310_v11, %v6181_v40  ;;  %v3313_v54 = vpop.xlane.xlu0 %3312  ;;  %v6618_v11 = vperm.slane %v7376_v3, %v4370_v24  ;;  %v3452_v3 = vsel %vm3229_vm1, %v6334_v15, -inf }
 0x27a   :  { %2963 = vst [vmem:[#allocation1 + $0x30] ss:$2 sm:$0xff] %v1751_v44  ;;  %v3826_v44 = vperm.slane %v3313_v54, %v6361_v10 }
 0x27b   :  { %2964 = vst [vmem:[#allocation1 + $0x31] ss:$2 sm:$0xff] %v1779_v13  ;;  %v6592_v0 = vld.sshfl [vmem:[#allocation1 + $0x20] sm:$0xff pattern:$0x75316420]  ;;  %v3825_v14 = vsel %vm7158_vm11, %v3824_v22, %v3823_v48  ;;  %v3446_v48 = vsel %vm3229_vm1, %v7375_v12, -inf }
 0x27c   :  { %3009 = vst [vmem:[#allocation1 + $0x20] ss:$2 sm:$0xff] %v6580_v59  ;;  %v3827_v13 = vsel %vm7157_vm12, %v3826_v44, %v3825_v14  ;;  %v7377_v22 = vld [vmem:[#allocation62_spill] sm:$0xff]  ;;  %vm4022_vm12 = vcmask 1041409  }
 0x27d   :  { %3010 = vst [vmem:[#allocation1 + $0x21] ss:$2 sm:$0xff] %v6588_v26  ;;  %3444 = vmax.xlane.f32.xlu2 %v3443_v8  ;;  %v3829_v4 = vsel %vm7156_vm13, %v3828_v51, %v3827_v13  ;;  %v2198_v8 = vrot.slane %v6491_v35, 4  ;;  %vm7379_vm13 = vcmask 917312  }
 0x27e   :  { %v6598_v30 = vld.sshfl [vmem:[#allocation1 + $0x10] sm:$0xff pattern:$0x75316420] }
 0x27f   :  { %3067 = vst [vmem:[#allocation1 + $0x10] ss:$2 sm:$0xff] %v1865_v55  ;;  %v2116_v55 = vrot.slane %v6471_v45, 4  ;;  %v2089_v45 = vsel %vm662_vm0, 0.0, %v2088_v17  ;;  %v3325_v12 = vpop.xlane.xlu1 %3324 }
 0x280   :  { %3068 = vst [vmem:[#allocation1 + $0x11] ss:$2 sm:$0xff] %v1893_v29  ;;  %v3449_v29 = vsel %vm3229_vm1, %v7377_v22, -inf  ;;  %3447 = vmax.xlane.f32.xlu0 %v3446_v48  ;;  %v3319_v54 = vpop.xlane.xlu2 %3318  ;;  %v2226_v48 = vrot.slane %v6495_v28, 4  ;;  %v3834_v17 = vperm.slane %v3325_v12, %v6434_v37  ;;  %v2199_v22 = vsel %vm662_vm0, 0.0, %v2198_v8 }
 0x281   :  { %3450 = vmax.xlane.f32.xlu1 %v3449_v29  ;;  %v3830_v44 = vperm.slane %v3319_v54, %v6377_v34  ;;  %v3322_v49 = vpop.xlane.xlu0 %3321  ;;  %v2117_v51 = vsel %vm662_vm0, 0.0, %v2116_v55  ;;  %v2312_v55 = vrot.slane %v6512_v41, 4  ;;  %v7380_v29 = vld [vmem:[#allocation68_spill] sm:$0xff]  ;;  %v2340_v54 = vrot.slane %v6520_v2, 4 }
 0x282   :  { %v6614_v31 = vld.sshfl [vmem:[#allocation1 + $0x30] sm:$0xff pattern:$0x75316420]  ;;  %v3458_v15 = vsel %vm3229_vm1, %v7380_v29, -inf  ;;  %v3464_v29 = vsel %vm3229_vm1, %v6406_v16, -inf }
 0x283   :  { %2975 = vst [vmem:[#allocation1 + $0x30] ss:$2 sm:$0xff] %v1975_v36  ;;  %v3831_v13 = vsel %vm7379_vm13, %v3830_v44, %v3829_v4  ;;  %v3832_v36 = vperm.slane %v3322_v49, %v6418_v57  ;;  %v3455_v4 = vsel %vm3229_vm1, %v6545_v50, -inf  ;;  %v7381_v44 = vld [vmem:[#allocation97_spill] sm:$0xff]  ;;  %v2227_v50 = vsel %vm662_vm0, 0.0, %v2226_v48 }
 0x284   :  { %2976 = vst [vmem:[#allocation1 + $0x31] ss:$2 sm:$0xff] %v2003_v52  ;;  %v6628_v14 = vld.sshfl [vmem:[#allocation1 + $0x20] sm:$0xff pattern:$0x75316420]  ;;  %v2313_v2 = vsel %vm662_vm0, 0.0, %v2312_v55 }
 0x285   :  { %3021 = vst [vmem:[#allocation1 + $0x20] ss:$2 sm:$0xff] %v6618_v11  ;;  %v3833_v52 = vsel %vm3799_vm15, %v3832_v36, %v3831_v13  ;;  %3453 = vmax.xlane.f32.xlu2 %v3452_v3  ;;  %v2422_v3 = vrot.slane %v6533_v5, 4  ;;  %v3467_v5 = vsel %vm3229_vm1, %v6576_v20, -inf  ;;  %vm7396_vm13 = vcmask 851712  }
 0x286   :  { %3022 = vst [vmem:[#allocation1 + $0x21] ss:$2 sm:$0xff] %v6626_v56  ;;  %v3835_v35 = vsel %vm3803_vm14, %v3834_v17, %v3833_v52  ;;  %v2341_v17 = vsel %vm662_vm0, 0.0, %v2340_v54 }
 0x287   :  { %v6634_v53 = vld.sshfl [vmem:[#allocation1 + $0x10] sm:$0xff pattern:$0x75316420]  ;;  %v6651_v28 = vsel %vm4022_vm12, %v3835_v35, %v6467_v63  ;;  %v7382_v63 = vld [vmem:[#allocation101_spill] sm:$0xff]  ;;  %v3334_v12 = vpop.xlane.xlu1 %3333  ;;  %v7383_v35 = vld [vmem:[#allocation39_spill] sm:$0xff]  ;;  %v2423_v54 = vsel %vm662_vm0, 0.0, %v2422_v3 }
 0x288   :  { %3079 = vst [vmem:[#allocation1 + $0x10] ss:$2 sm:$0xff] %v2089_v45  ;;  %3456 = vmax.xlane.f32.xlu0 %v3455_v4  ;;  %v6660_v45 = vperm.slane %v7381_v44, %v4370_v24  ;;  %v3328_v41 = vpop.xlane.xlu2 %3327  ;;  %v6665_v49 = vperm.slane %v7382_v63, %v4370_v24  ;;  %v3839_v52 = vperm.slane %v3334_v12, %v5923_v58  ;;  %v3461_v4 = vsel %vm3229_vm1, %v7383_v35, -inf }
 0x289   :  { %3080 = vst [vmem:[#allocation1 + $0x11] ss:$2 sm:$0xff] %v2117_v51  ;;  %3459 = vmax.xlane.f32.xlu1 %v3458_v15  ;;  %v3836_v51 = vperm.slane %v3328_v41, %v5861_v47  ;;  %v3331_v13 = vpop.xlane.xlu0 %3330  ;;  %vm7392_vm12 = vcmask 786112  }
 0x28a   :  { %v3837_v36 = vperm.slane %v3331_v13, %v5877_v33 }
 0x28b   :  { %v6655_v61 = vld.sshfl [vmem:[#allocation1 + $0x30] sm:$0xff pattern:$0x75316420] }
 0x28c   :  { %2987 = vst [vmem:[#allocation1 + $0x30] ss:$2 sm:$0xff] %v2199_v22  ;;  %v2450_v22 = vrot.slane %v6540_v42, 4  ;;  %v3838_v55 = vsel %vm3747_vm2, %v3837_v36, %v3836_v51  ;;  %v7384_v42 = vld [vmem:[#allocation95_spill] sm:$0xff]  ;;  %v7385_v51 = vld [vmem:[#allocation100_spill] sm:$0xff] }
 0x28d   :  { %2988 = vst [vmem:[#allocation1 + $0x31] ss:$2 sm:$0xff] %v2227_v50  ;;  %v6668_v8 = vld.sshfl [vmem:[#allocation1 + $0x20] sm:$0xff pattern:$0x75316420]  ;;  %3462 = vmax.xlane.f32.xlu2 %v3461_v4  ;;  %v3840_v15 = vsel %vm3751_vm3, %v3839_v52, %v3838_v55  ;;  %v6693_v41 = vperm.slane %v7384_v42, %v4370_v24  ;;  %v6699_v13 = vperm.slane %v7385_v51, %v4370_v24  ;;  %v7386_v52 = vld [vmem:[#allocation72_spill] sm:$0xff] }
 0x28e   :  { %3033 = vst [vmem:[#allocation1 + $0x20] ss:$2 sm:$0xff] %v6660_v45  ;;  %v2451_v63 = vsel %vm662_vm0, 0.0, %v2450_v22  ;;  %v3470_v35 = vsel %vm3229_vm1, %v7386_v52, -inf  ;;  %v3473_v22 = vsel %vm3229_vm1, %v6222_v7, -inf  ;;  %v3479_v52 = vsel %vm3229_vm1, %v6614_v31, -inf }
 0x28f   :  { %3034 = vst [vmem:[#allocation1 + $0x21] ss:$2 sm:$0xff] %v6665_v49  ;;  %v3343_v36 = vpop.xlane.xlu1 %3342  ;;  %v1948_v31 = vrot.slane %v6626_v56, 4 }
 0x290   :  { %v6674_v48 = vld.sshfl [vmem:[#allocation1 + $0x10] sm:$0xff pattern:$0x75316420]  ;;  %3465 = vmax.xlane.f32.xlu0 %v3464_v29  ;;  %v3337_v44 = vpop.xlane.xlu2 %3336  ;;  %v3845_v3 = vperm.slane %v3343_v36, %v7370_v27  ;;  %v1696_v29 = vrot.slane %v6580_v59, 4 }
 0x291   :  { %3091 = vst [vmem:[#allocation1 + $0x10] ss:$2 sm:$0xff] %v2313_v2  ;;  %3468 = vmax.xlane.f32.xlu1 %v3467_v5  ;;  %v3841_v16 = vperm.slane %v3337_v44, %v7364_v21  ;;  %v3340_v20 = vpop.xlane.xlu0 %3339  ;;  %v1724_v5 = vrot.slane %v6588_v26, 4 }
 0x292   :  { %3092 = vst [vmem:[#allocation1 + $0x11] ss:$2 sm:$0xff] %v2341_v17  ;;  %v3843_v17 = vperm.slane %v3340_v20, %v5936_v43 }
 0x293   :  { %v3842_v12 = vsel %vm3755_vm4, %v3841_v16, %v3840_v15  ;;  %v3476_v15 = vsel %vm3229_vm1, %v6458_v23, -inf  ;;  %v1697_v23 = vsel %vm662_vm0, 0.0, %v1696_v29  ;;  %v1920_v29 = vrot.slane %v6618_v11, 4 }
 0x294   :  { %v6689_v50 = vld.sshfl [vmem:[#allocation1 + $0x30] sm:$0xff pattern:$0x75316420]  ;;  %v3844_v4 = vsel %vm3759_vm5, %v3843_v17, %v3842_v12  ;;  %v1725_v17 = vsel %vm662_vm0, 0.0, %v1724_v5 }
 0x295   :  { %2999 = vst [vmem:[#allocation1 + $0x30] ss:$2 sm:$0xff] %v2423_v54  ;;  %3471 = vmax.xlane.f32.xlu2 %v3470_v35  ;;  %v3846_v55 = vsel %vm3763_vm6, %v3845_v3, %v3844_v4  ;;  %v7387_v54 = vld [vmem:[#allocation53_spill] sm:$0xff] }
 0x296   :  { %3000 = vst [vmem:[#allocation1 + $0x31] ss:$2 sm:$0xff] %v2451_v63  ;;  %v6701_v2 = vld.sshfl [vmem:[#allocation1 + $0x20] sm:$0xff pattern:$0x75316420]  ;;  %v6720_v44 = vperm.slane %v7387_v54, %v4370_v24  ;;  %v7388_v63 = vld [vmem:[#allocation60_spill] sm:$0xff] }
 0x297   :  { %3045 = vst [vmem:[#allocation1 + $0x20] ss:$2 sm:$0xff] %v6693_v41  ;;  %v6724_v16 = vperm.slane %v7388_v63, %v4370_v24  ;;  %v3352_v36 = vpop.xlane.xlu1 %3351  ;;  %v7390_v54 = vld [vmem:[#allocation51_spill] sm:$0xff] }
 0x298   :  { %3046 = vst [vmem:[#allocation1 + $0x21] ss:$2 sm:$0xff] %v6699_v13  ;;  %3474 = vmax.xlane.f32.xlu0 %v3473_v22  ;;  %v3346_v42 = vpop.xlane.xlu2 %3345  ;;  %v3851_v3 = vperm.slane %v3352_v36, %v6014_v32  ;;  %v7389_v22 = vld [vmem:[#allocation52_spill] sm:$0xff] }
 0x299   :  { %3477 = vmax.xlane.f32.xlu1 %v3476_v15  ;;  %v3847_v7 = vperm.slane %v3346_v42, %v5972_v46  ;;  %v3349_v59 = vpop.xlane.xlu0 %3348  ;;  %v3485_v15 = vsel %vm3229_vm1, %v6265_v19, -inf  ;;  %v6750_v42 = vperm.slane %v7390_v54, %v4370_v24  ;;  %v1921_v19 = vsel %vm662_vm0, 0.0, %v1920_v29  ;;  %v7394_v54 = vld [vmem:[#allocation104_spill] sm:$0xff] }
 0x29a   :  { %v3849_v20 = vperm.slane %v3349_v59, %v5981_v1 }
 0x29b   :  { %v3848_v26 = vsel %vm3767_vm7, %v3847_v7, %v3846_v55  ;;  %v3482_v55 = vsel %vm3229_vm1, %v7389_v22, -inf  ;;  %v7391_v7 = vld [vmem:[#allocation58_spill] sm:$0xff]  ;;  %v3491_v22 = vsel %vm3229_vm1, %v6655_v61, -inf }
 0x29c   :  { %v3850_v35 = vsel %vm3771_vm8, %v3849_v20, %v3848_v26  ;;  %v6755_v59 = vperm.slane %v7391_v7, %v4370_v24  ;;  %v7395_v61 = vld [vmem:[#allocation14_spill] sm:$0xff] }
 0x29d   :  { %v6727_v51 = vld.sshfl [vmem:[#allocation1 + $0x30] sm:$0xff pattern:$0x75316420]  ;;  %3480 = vmax.xlane.f32.xlu2 %v3479_v52  ;;  %v3852_v4 = vsel %vm3775_vm9, %v3851_v3, %v3850_v35  ;;  %v1949_v52 = vsel %vm662_vm0, 0.0, %v1948_v31  ;;  %v2172_v31 = vrot.slane %v6665_v49, 4  ;;  %v3497_v49 = vsel %vm3229_vm1, %v6307_v18, -inf }
 0x29e   :  { %3011 = vst [vmem:[#allocation1 + $0x30] ss:$2 sm:$0xff] %v6720_v44  ;;  %v3503_v18 = vsel %vm3229_vm1, %v6689_v50, -inf }
 0x29f   :  { %3012 = vst [vmem:[#allocation1 + $0x31] ss:$2 sm:$0xff] %v6724_v16  ;;  %v6734_v12 = vld.sshfl [vmem:[#allocation1 + $0x20] sm:$0xff pattern:$0x75316420]  ;;  %v3361_v56 = vpop.xlane.xlu1 %3360 }
 0x2a0   :  { %3057 = vst [vmem:[#allocation1 + $0x20] ss:$2 sm:$0xff] %v1697_v23  ;;  %3483 = vmax.xlane.f32.xlu0 %v3482_v55  ;;  %v3355_v5 = vpop.xlane.xlu2 %3354  ;;  %v3857_v36 = vperm.slane %v3361_v56, %v6361_v10  ;;  %v7393_v55 = vld [vmem:[#allocation36_spill] sm:$0xff] }
 0x2a1   :  { %3058 = vst [vmem:[#allocation1 + $0x21] ss:$2 sm:$0xff] %v1725_v17  ;;  %3486 = vmax.xlane.f32.xlu1 %v3485_v15  ;;  %v3853_v63 = vperm.slane %v3355_v5, %v6030_v6  ;;  %v3358_v23 = vpop.xlane.xlu0 %3357  ;;  %v3488_v17 = vsel %vm3229_vm1, %v6508_v62, -inf  ;;  %v3494_v62 = vsel %vm3229_vm1, %v7393_v55, -inf  ;;  %v2144_v15 = vrot.slane %v6660_v45, 4 }
 0x2a2   :  { %v3855_v20 = vperm.slane %v3358_v23, %v6181_v40  ;;  %v6785_v23 = vperm.slane %v7395_v61, %v4370_v24  ;;  %v7399_v61 = vld [vmem:[#allocation13_spill] sm:$0xff] }
 0x2a3   :  { %v3854_v26 = vsel %vm3779_vm10, %v3853_v63, %v3852_v4  ;;  %v6781_v63 = vperm.slane %v7394_v54, %v4370_v24 }
 0x2a4   :  { %v3856_v35 = vsel %vm7158_vm11, %v3855_v20, %v3854_v26 }
 0x2a5   :  { %3489 = vmax.xlane.f32.xlu2 %v3488_v17  ;;  %v3858_v4 = vsel %vm7392_vm12, %v3857_v36, %v3856_v35  ;;  %v2145_v36 = vsel %vm662_vm0, 0.0, %v2144_v15  ;;  %vm7397_vm12 = vcmask 917312   ;;  %v2173_v35 = vsel %vm662_vm0, 0.0, %v2172_v31 }
 0x2a6   :  { %v6757_v11 = vld.sshfl [vmem:[#allocation1 + $0x30] sm:$0xff pattern:$0x75316420] }
 0x2a7   :  { %3023 = vst [vmem:[#allocation1 + $0x30] ss:$2 sm:$0xff] %v6750_v42  ;;  %v3370_v26 = vpop.xlane.xlu1 %3369 }
 0x2a8   :  { %3024 = vst [vmem:[#allocation1 + $0x31] ss:$2 sm:$0xff] %v6755_v59  ;;  %v6767_v3 = vld.sshfl [vmem:[#allocation1 + $0x20] sm:$0xff pattern:$0x75316420]  ;;  %3492 = vmax.xlane.f32.xlu0 %v3491_v22  ;;  %v3364_v29 = vpop.xlane.xlu2 %3363  ;;  %v3863_v45 = vperm.slane %v3370_v26, %v6418_v57 }
 0x2a9   :  { %3069 = vst [vmem:[#allocation1 + $0x20] ss:$2 sm:$0xff] %v1921_v19  ;;  %3495 = vmax.xlane.f32.xlu1 %v3494_v62  ;;  %v3859_v5 = vperm.slane %v3364_v29, %v6370_v25  ;;  %v3367_v7 = vpop.xlane.xlu0 %3366  ;;  %v2368_v62 = vrot.slane %v6693_v41, 4 }
 0x2aa   :  { %3070 = vst [vmem:[#allocation1 + $0x21] ss:$2 sm:$0xff] %v1949_v52  ;;  %v3861_v19 = vperm.slane %v3367_v7, %v6377_v34 }
 0x2ab   :  { %v3860_v20 = vsel %vm7396_vm13, %v3859_v5, %v3858_v4  ;;  %v3500_v4 = vsel %vm3229_vm1, %v6555_v9, -inf  ;;  %vm4024_vm13 = vcmask 1042434   ;;  %v2396_v5 = vrot.slane %v6699_v13, 4  ;;  %v7398_v9 = vld [vmem:[#allocation103_spill] sm:$0xff] }
 0x2ac   :  { %v3862_v17 = vsel %vm7397_vm12, %v3861_v19, %v3860_v20  ;;  %v6811_v31 = vperm.slane %v7398_v9, %v4370_v24  ;;  %v6817_v19 = vperm.slane %v7399_v61, %v4370_v24  ;;  %v7400_v20 = vld [vmem:[#allocation66_spill] sm:$0xff]  ;;  %v3509_v24 = vsel %vm3229_vm1, %v6348_v60, -inf }
 0x2ad   :  { %3498 = vmax.xlane.f32.xlu2 %v3497_v49  ;;  %v3864_v22 = vsel %vm3799_vm15, %v3863_v45, %v3862_v17  ;;  %v3506_v13 = vsel %vm3229_vm1, %v7400_v20, -inf  ;;  %v2369_v49 = vsel %vm662_vm0, 0.0, %v2368_v62  ;;  %v1780_v60 = vrot.slane %v6724_v16, 4 }
 0x2ae   :  { %vm7404_vm12 = vcmask 786112  }
 0x2af   :  { %v6789_v56 = vld.sshfl [vmem:[#allocation1 + $0x30] sm:$0xff pattern:$0x75316420]  ;;  %v3379_v54 = vpop.xlane.xlu1 %3378  ;;  %v1781_v16 = vsel %vm662_vm0, 0.0, %v1780_v60 }
 0x2b0   :  { %3035 = vst [vmem:[#allocation1 + $0x30] ss:$2 sm:$0xff] %v6781_v63  ;;  %3501 = vmax.xlane.f32.xlu0 %v3500_v4  ;;  %v3373_v55 = vpop.xlane.xlu2 %3372  ;;  %v3868_v41 = vperm.slane %v3379_v54, %v5877_v33 }
 0x2b1   :  { %3036 = vst [vmem:[#allocation1 + $0x31] ss:$2 sm:$0xff] %v6785_v23  ;;  %v6798_v52 = vld.sshfl [vmem:[#allocation1 + $0x20] sm:$0xff pattern:$0x75316420]  ;;  %3504 = vmax.xlane.f32.xlu1 %v3503_v18  ;;  %v3865_v29 = vperm.slane %v3373_v55, %v6434_v37  ;;  %v3376_v15 = vpop.xlane.xlu0 %3375 }
 0x2b2   :  { %3081 = vst [vmem:[#allocation1 + $0x20] ss:$2 sm:$0xff] %v2145_v36  ;;  %v3867_v50 = vperm.slane %v3376_v15, %v5861_v47 }
 0x2b3   :  { %3082 = vst [vmem:[#allocation1 + $0x21] ss:$2 sm:$0xff] %v2173_v35  ;;  %v3866_v7 = vsel %vm3803_vm14, %v3865_v29, %v3864_v22  ;;  %v3512_v35 = vsel %vm3229_vm1, %v6592_v0, -inf  ;;  %v1752_v22 = vrot.slane %v6720_v44, 4  ;;  %v3515_v0 = vsel %vm3229_vm1, %v6727_v51, -inf }
 0x2b4   :  { %v6821_v26 = vsel %vm4024_vm13, %v3866_v7, %v6651_v28  ;;  %v3869_v36 = vsel %vm3747_vm2, %v3868_v41, %v3867_v50  ;;  %v2397_v28 = vsel %vm662_vm0, 0.0, %v2396_v5  ;;  %v7401_v50 = vld [vmem:[#allocation73_spill] sm:$0xff]  ;;  %v3521_v41 = vsel %vm3229_vm1, %v6421_v38, -inf }
 0x2b5   :  { %3507 = vmax.xlane.f32.xlu2 %v3506_v13  ;;  %v1753_v9 = vsel %vm662_vm0, 0.0, %v1752_v22  ;;  %v3518_v61 = vsel %vm3229_vm1, %v7401_v50, -inf  ;;  %v1976_v13 = vrot.slane %v6750_v42, 4  ;;  %v3524_v38 = vsel %vm3229_vm1, %v6628_v14, -inf  ;;  %v7403_v50 = vld [vmem:[#allocation37_spill] sm:$0xff] }
 0x2b6   :  { %vm7406_vm13 = vcmask 851712  }
 0x2b7   :  { %v3388_v15 = vpop.xlane.xlu1 %3387 }
 0x2b8   :  { %v6825_v45 = vld.sshfl [vmem:[#allocation1 + $0x30] sm:$0xff pattern:$0x75316420]  ;;  %3510 = vmax.xlane.f32.xlu0 %v3509_v24  ;;  %v3382_v4 = vpop.xlane.xlu2 %3381  ;;  %v3874_v5 = vperm.slane %v3388_v15, %v5936_v43 }
 0x2b9   :  { %3047 = vst [vmem:[#allocation1 + $0x30] ss:$2 sm:$0xff] %v6811_v31  ;;  %3513 = vmax.xlane.f32.xlu1 %v3512_v35  ;;  %v3870_v18 = vperm.slane %v3382_v4, %v5923_v58  ;;  %v3385_v55 = vpop.xlane.xlu0 %3384 }
 0x2ba   :  { %3048 = vst [vmem:[#allocation1 + $0x31] ss:$2 sm:$0xff] %v6817_v19  ;;  %v6833_v17 = vld.sshfl [vmem:[#allocation1 + $0x20] sm:$0xff pattern:$0x75316420]  ;;  %v3872_v29 = vperm.slane %v3385_v55, %v7364_v21 }
 0x2bb   :  { %3093 = vst [vmem:[#allocation1 + $0x20] ss:$2 sm:$0xff] %v2369_v49  ;;  %v3871_v62 = vsel %vm3751_vm3, %v3870_v18, %v3869_v36  ;;  %v2004_v36 = vrot.slane %v6755_v59, 4  ;;  %v1977_v18 = vsel %vm662_vm0, 0.0, %v1976_v13  ;;  %v3527_v59 = vsel %vm3229_vm1, %v6757_v11, -inf }
 0x2bc   :  { %3094 = vst [vmem:[#allocation1 + $0x21] ss:$2 sm:$0xff] %v2397_v28  ;;  %v3873_v54 = vsel %vm3755_vm4, %v3872_v29, %v3871_v62  ;;  %v7402_v62 = vld [vmem:[#allocation63_spill] sm:$0xff]  ;;  %v3539_v13 = vsel %vm3229_vm1, %v6789_v56, -inf }
 0x2bd   :  { %3516 = vmax.xlane.f32.xlu2 %v3515_v0  ;;  %v3875_v7 = vsel %vm3759_vm5, %v3874_v5, %v3873_v54  ;;  %v2005_v55 = vsel %vm662_vm0, 0.0, %v2004_v36  ;;  %v3530_v29 = vsel %vm3229_vm1, %v7402_v62, -inf  ;;  %v2200_v0 = vrot.slane %v6781_v63, 4 }
 0x2bf   :  { %v3397_v35 = vpop.xlane.xlu1 %3396 }
 0x2c0   :  { %3519 = vmax.xlane.f32.xlu0 %v3518_v61  ;;  %v3391_v51 = vpop.xlane.xlu2 %3390  ;;  %v3880_v4 = vperm.slane %v3397_v35, %v5981_v1  ;;  %v3533_v61 = vsel %vm3229_vm1, %v7403_v50, -inf }
 0x2c1   :  { %v6848_v44 = vld.sshfl [vmem:[#allocation1 + $0x30] sm:$0xff pattern:$0x75316420]  ;;  %3522 = vmax.xlane.f32.xlu1 %v3521_v41  ;;  %v3876_v20 = vperm.slane %v3391_v51, %v7370_v27  ;;  %v3394_v49 = vpop.xlane.xlu0 %3393  ;;  %v3536_v51 = vsel %vm3229_vm1, %v6668_v8, -inf }
 0x2c2   :  { %3059 = vst [vmem:[#allocation1 + $0x30] ss:$2 sm:$0xff] %v1753_v9  ;;  %v3878_v28 = vperm.slane %v3394_v49, %v5972_v46 }
 0x2c3   :  { %3060 = vst [vmem:[#allocation1 + $0x31] ss:$2 sm:$0xff] %v1781_v16  ;;  %v3877_v24 = vsel %vm3763_vm6, %v3876_v20, %v3875_v7  ;;  %v2228_v16 = vrot.slane %v6785_v23, 4  ;;  %v2201_v20 = vsel %vm662_vm0, 0.0, %v2200_v0 }
 0x2c4   :  { %v3879_v22 = vsel %vm3767_vm7, %v3878_v28, %v3877_v24 }
 0x2c5   :  { %3525 = vmax.xlane.f32.xlu2 %v3524_v38  ;;  %v3881_v42 = vsel %vm3771_vm8, %v3880_v4, %v3879_v22  ;;  %v2229_v49 = vsel %vm662_vm0, 0.0, %v2228_v16  ;;  %v2424_v38 = vrot.slane %v6811_v31, 4  ;;  %v7405_v22 = vld [vmem:[#allocation71_spill] sm:$0xff] }
 0x2c7   :  { %v2425_v31 = vsel %vm662_vm0, 0.0, %v2424_v38  ;;  %v3572_v38 = vsel %vm3229_vm1, %v6767_v3, -inf }
 0x2c8   :  { %3528 = vmax.xlane.f32.xlu0 %v3527_v59  ;;  %v3400_v14 = vpop.xlane.xlu2 %3399 }
 0x2c9   :  { %3531 = vmax.xlane.f32.xlu1 %v3530_v29  ;;  %v3882_v15 = vperm.slane %v3400_v14, %v6014_v32  ;;  %v3403_v5 = vpop.xlane.xlu0 %3402  ;;  %v3548_v14 = vsel %vm3229_vm1, %v6701_v2, -inf  ;;  %v3551_v2 = vsel %vm3229_vm1, %v6825_v45, -inf }
 0x2ca   :  { %v6869_v60 = vld.sshfl [vmem:[#allocation1 + $0x30] sm:$0xff pattern:$0x75316420]  ;;  %v3884_v9 = vperm.slane %v3403_v5, %v6030_v6  ;;  %v3406_v11 = vpop.xlane.xlu1 %3405 }
 0x2cb   :  { %3071 = vst [vmem:[#allocation1 + $0x30] ss:$2 sm:$0xff] %v1977_v18  ;;  %v3883_v54 = vsel %vm3775_vm9, %v3882_v15, %v3881_v42  ;;  %v3886_v7 = vperm.slane %v3406_v11, %v6181_v40  ;;  %v3542_v18 = vsel %vm3229_vm1, %v7405_v22, -inf  ;;  %v2452_v42 = vrot.slane %v6817_v19, 4 }
 0x2cc   :  { %3072 = vst [vmem:[#allocation1 + $0x31] ss:$2 sm:$0xff] %v2005_v55  ;;  %v3885_v41 = vsel %vm3779_vm10, %v3884_v9, %v3883_v54  ;;  %v7407_v55 = vld [vmem:[#allocation20_spill] sm:$0xff] }
 0x2cd   :  { %3534 = vmax.xlane.f32.xlu2 %v3533_v61  ;;  %v3887_v63 = vsel %vm7158_vm11, %v3886_v7, %v3885_v41  ;;  %v3545_v62 = vsel %vm3229_vm1, %v7407_v55, -inf  ;;  %vm7408_vm11 = vcmask 917312   ;;  %v2453_v19 = vsel %vm662_vm0, 0.0, %v2452_v42  ;;  %v7409_v61 = vld [vmem:[#allocation65_spill] sm:$0xff] }
 0x2ce   :  { %v3554_v41 = vsel %vm3229_vm1, %v7409_v61, -inf  ;;  %v7412_v61 = vld [vmem:[#allocation84_spill] sm:$0xff]  ;;  %vm7413_vm0 = vcmask 720512  }
 0x2d0   :  { %3537 = vmax.xlane.f32.xlu0 %v3536_v51  ;;  %v3409_v36 = vpop.xlane.xlu2 %3408  ;;  %v7410_v51 = vld [vmem:[#allocation34_spill] sm:$0xff] }
 0x2d1   :  { %3540 = vmax.xlane.f32.xlu1 %v3539_v13  ;;  %v3888_v24 = vperm.slane %v3409_v36, %v6361_v10  ;;  %v3412_v28 = vpop.xlane.xlu0 %3411 }
 0x2d2   :  { %v3415_v8 = vpop.xlane.xlu1 %3414  ;;  %v3890_v4 = vperm.slane %v3412_v28, %v6370_v25 }
 0x2d3   :  { %v6889_v23 = vld.sshfl [vmem:[#allocation1 + $0x30] sm:$0xff pattern:$0x75316420]  ;;  %v3889_v35 = vsel %vm7404_vm12, %v3888_v24, %v3887_v63  ;;  %v3892_v56 = vperm.slane %v3415_v8, %v6377_v34  ;;  %v3566_v63 = vsel %vm3229_vm1, %v7410_v51, -inf  ;;  %v3569_v8 = vsel %vm3229_vm1, %v6598_v30, -inf }
 0x2d4   :  { %3083 = vst [vmem:[#allocation1 + $0x30] ss:$2 sm:$0xff] %v2201_v20  ;;  %v3891_v59 = vsel %vm7406_vm13, %v3890_v4, %v3889_v35  ;;  %v3593_v51 = vsel %vm3229_vm1, %v6674_v48, -inf }
 0x2d5   :  { %3084 = vst [vmem:[#allocation1 + $0x31] ss:$2 sm:$0xff] %v2229_v49  ;;  %3543 = vmax.xlane.f32.xlu2 %v3542_v18  ;;  %v3893_v29 = vsel %vm7408_vm11, %v3892_v56, %v3891_v59  ;;  %vm4026_vm11 = vcmask 1043459   ;;  %v3575_v56 = vsel %vm3229_vm1, %v6869_v60, -inf  ;;  %v3581_v60 = vsel %vm3229_vm1, %v6634_v53, -inf }
 0x2d6   :  { %v3587_v53 = vsel %vm3229_vm1, %v6889_v23, -inf }
 0x2d8   :  { %3546 = vmax.xlane.f32.xlu0 %v3545_v62  ;;  %v3418_v15 = vpop.xlane.xlu2 %3417 }
 0x2d9   :  { %3549 = vmax.xlane.f32.xlu1 %v3548_v14  ;;  %v3894_v0 = vperm.slane %v3418_v15, %v6418_v57  ;;  %v3421_v9 = vpop.xlane.xlu0 %3420  ;;  %v3584_v15 = vsel %vm3229_vm1, %v6798_v52, -inf  ;;  %v3590_v52 = vsel %vm3229_vm1, %v7412_v61, -inf }
 0x2da   :  { %v3896_v54 = vperm.slane %v3421_v9, %v6434_v37  ;;  %v3424_v16 = vpop.xlane.xlu1 %3423 }
 0x2db   :  { %v3895_v11 = vsel %vm3799_vm15, %v3894_v0, %v3893_v29  ;;  %v3898_v13 = vperm.slane %v3424_v16, %v5861_v47  ;;  %v7411_v29 = vld [vmem:[#allocation67_spill] sm:$0xff] }
 0x2dc   :  { %v6907_v5 = vld.sshfl [vmem:[#allocation1 + $0x30] sm:$0xff pattern:$0x75316420]  ;;  %v3897_v7 = vsel %vm3803_vm14, %v3896_v54, %v3895_v11  ;;  %v3578_v14 = vsel %vm3229_vm1, %v7411_v29, -inf }
 0x2dd   :  { %3095 = vst [vmem:[#allocation1 + $0x30] ss:$2 sm:$0xff] %v2425_v31  ;;  %3552 = vmax.xlane.f32.xlu2 %v3551_v2  ;;  %v6917_v50 = vsel %vm4026_vm11, %v3897_v7, %v6821_v26  ;;  %vm7414_vm11 = vcmask 917312  }
 0x2de   :  { %3096 = vst [vmem:[#allocation1 + $0x31] ss:$2 sm:$0xff] %v2453_v19 }
 0x2e0   :  { %3555 = vmax.xlane.f32.xlu0 %v3554_v41  ;;  %v3427_v20 = vpop.xlane.xlu2 %3426 }
 0x2e1   :  { %3567 = vmax.xlane.f32.xlu1 %v3566_v63  ;;  %v3899_v49 = vperm.slane %v3427_v20, %v5877_v33  ;;  %v3430_v45 = vpop.xlane.xlu0 %3429 }
 0x2e2   :  { %v3901_v24 = vperm.slane %v3430_v45, %v5923_v58  ;;  %v3433_v26 = vpop.xlane.xlu1 %3432 }
 0x2e3   :  { %v3900_v36 = vsel %vm3747_vm2, %v3899_v49, %v3898_v13  ;;  %v3903_v28 = vperm.slane %v3433_v26, %v7364_v21 }
 0x2e4   :  { %v3902_v35 = vsel %vm3751_vm3, %v3901_v24, %v3900_v36  ;;  %v3596_v24 = vsel %vm3229_vm1, %v6833_v17, -inf }
 0x2e5   :  { %3570 = vmax.xlane.f32.xlu2 %v3569_v8  ;;  %v3904_v4 = vsel %vm3755_vm4, %v3903_v28, %v3902_v35  ;;  %v3599_v28 = vsel %vm3229_vm1, %v6907_v5, -inf  ;;  %v3557_v8 = vsel %vm3229_vm1, %v6561_v39, -inf }
 0x2e8   :  { %3573 = vmax.xlane.f32.xlu0 %v3572_v38  ;;  %v3436_v22 = vpop.xlane.xlu2 %3435  ;;  %v3097_v38 = vld.sshfl [vmem:[#allocation1] sm:$0xff pattern:$0x75316420] }
 0x2e9   :  { %3576 = vmax.xlane.f32.xlu1 %v3575_v56  ;;  %v3905_v18 = vperm.slane %v3436_v22, %v5936_v43  ;;  %v3602_v5 = vsel %vm3229_vm1, %v3097_v38, -inf }
 0x2ea   :  { %v3442_v30 = vpop.xlane.xlu1 %3441 }
 0x2eb   :  { %v3439_v42 = vpop.xlane.xlu0 %3438  ;;  %v3906_v55 = vsel %vm3759_vm5, %v3905_v18, %v3904_v4  ;;  %v3909_v62 = vperm.slane %v3442_v30, %v5972_v46 }
 0x2ec   :  { %v3907_v59 = vperm.slane %v3439_v42, %v7370_v27 }
 0x2ed   :  { %3579 = vmax.xlane.f32.xlu2 %v3578_v14 }
 0x2ee   :  { %v3908_v3 = vsel %vm3763_vm6, %v3907_v59, %v3906_v55  ;;  %v3098_v59 = vld.sshfl [vmem:[#allocation1 + $0x10] sm:$0xff pattern:$0x75316420]  ;;  %v3560_v55 = vsel %vm3229_vm1, %v6734_v12, -inf  ;;  %v3563_v12 = vsel %vm3229_vm1, %v6848_v44, -inf }
 0x2ef   :  { %v3910_v31 = vsel %vm3767_vm7, %v3909_v62, %v3908_v3  ;;  %v3605_v29 = vsel %vm3229_vm1, %v3098_v59, -inf }
 0x2f0   :  { %3582 = vmax.xlane.f32.xlu0 %v3581_v60  ;;  %v3445_v19 = vpop.xlane.xlu2 %3444 }
 0x2f1   :  { %3585 = vmax.xlane.f32.xlu1 %v3584_v15  ;;  %v3911_v0 = vperm.slane %v3445_v19, %v5981_v1  ;;  %v3099_v19 = vld.sshfl [vmem:[#allocation1 + $0x20] sm:$0xff pattern:$0x75316420] }
 0x2f3   :  { %v3448_v9 = vpop.xlane.xlu0 %3447  ;;  %v3912_v54 = vsel %vm3771_vm8, %v3911_v0, %v3910_v31 }
 0x2f4   :  { %v3451_v11 = vpop.xlane.xlu1 %3450  ;;  %v3913_v16 = vperm.slane %v3448_v9, %v6014_v32  ;;  %v3100_v9 = vld.sshfl [vmem:[#allocation1 + $0x30] sm:$0xff pattern:$0x75316420] }
 0x2f5   :  { %v3915_v2 = vperm.slane %v3451_v11, %v6030_v6  ;;  %3588 = vmax.xlane.f32.xlu2 %v3587_v53  ;;  %v3608_v11 = vsel %vm3229_vm1, %v3099_v19, -inf }
 0x2f6   :  { %v3914_v7 = vsel %vm3775_vm9, %v3913_v16, %v3912_v54  ;;  %v3611_v16 = vsel %vm3229_vm1, %v3100_v9, -inf  ;;  %vm7415_vm1 = vcmask 720512  }
 0x2f7   :  { %v3916_v41 = vsel %vm3779_vm10, %v3915_v2, %v3914_v7 }
 0x2f8   :  { %3591 = vmax.xlane.f32.xlu0 %v3590_v52  ;;  %v3454_v63 = vpop.xlane.xlu2 %3453 }
 0x2f9   :  { %3594 = vmax.xlane.f32.xlu1 %v3593_v51  ;;  %v3917_v20 = vperm.slane %v3454_v63, %v6181_v40 }
 0x2fb   :  { %v3457_v13 = vpop.xlane.xlu0 %3456  ;;  %v3918_v49 = vsel %vm7413_vm0, %v3917_v20, %v3916_v41  ;;  %vm4028_vm0 = vcmask 1044484  }
 0x2fc   :  { %v3919_v23 = vperm.slane %v3457_v13, %v6361_v10  ;;  %v3460_v45 = vpop.xlane.xlu1 %3459 }
 0x2fd   :  { %v3921_v36 = vperm.slane %v3460_v45, %v6370_v25  ;;  %3597 = vmax.xlane.f32.xlu2 %v3596_v24 }
 0x2fe   :  { %v3920_v26 = vsel %vm7404_vm12, %v3919_v23, %v3918_v49 }
 0x2ff   :  { %v3922_v48 = vsel %vm7406_vm13, %v3921_v36, %v3920_v26 }
 0x300   :  { %3600 = vmax.xlane.f32.xlu0 %v3599_v28  ;;  %v3463_v35 = vpop.xlane.xlu2 %3462 }
 0x301   :  { %3558 = vmax.xlane.f32.xlu1 %v3557_v8  ;;  %v3923_v4 = vperm.slane %v3463_v35, %v6377_v34 }
 0x303   :  { %v3466_v56 = vpop.xlane.xlu0 %3465  ;;  %v3924_v17 = vsel %vm7414_vm11, %v3923_v4, %v3922_v48 }
 0x304   :  { %v3925_v22 = vperm.slane %v3466_v56, %v6418_v57  ;;  %v3469_v18 = vpop.xlane.xlu1 %3468 }
 0x305   :  { %v3927_v42 = vperm.slane %v3469_v18, %v6434_v37  ;;  %3603 = vmax.xlane.f32.xlu2 %v3602_v5 }
 0x306   :  { %v3926_v39 = vsel %vm3799_vm15, %v3925_v22, %v3924_v17 }
 0x307   :  { %v3928_v30 = vsel %vm3803_vm14, %v3927_v42, %v3926_v39 }
 0x308   :  { %v6982_v62 = vsel %vm4028_vm0, %v3928_v30, %v6917_v50  ;;  %3561 = vmax.xlane.f32.xlu0 %v3560_v55  ;;  %v3472_v14 = vpop.xlane.xlu2 %3471  ;;  %vm4030_vm0 = vcmask 1045509  }
 0x309   :  { %3606 = vmax.xlane.f32.xlu1 %v3605_v29  ;;  %v3929_v3 = vperm.slane %v3472_v14, %v5861_v47 }
 0x30b   :  { %v3475_v60 = vpop.xlane.xlu0 %3474 }
 0x30c   :  { %v3930_v31 = vperm.slane %v3475_v60, %v5877_v33  ;;  %v3478_v15 = vpop.xlane.xlu1 %3477 }
 0x30d   :  { %v3932_v0 = vperm.slane %v3478_v15, %v5923_v58  ;;  %3564 = vmax.xlane.f32.xlu2 %v3563_v12 }
 0x30e   :  { %v3931_v50 = vsel %vm3747_vm2, %v3930_v31, %v3929_v3 }
 0x30f   :  { %v3933_v54 = vsel %vm3751_vm3, %v3932_v0, %v3931_v50 }
 0x310   :  { %3609 = vmax.xlane.f32.xlu0 %v3608_v11  ;;  %v3481_v2 = vpop.xlane.xlu2 %3480 }
 0x311   :  { %3612 = vmax.xlane.f32.xlu1 %v3611_v16  ;;  %v3934_v53 = vperm.slane %v3481_v2, %v7364_v21 }
 0x313   :  { %v3484_v7 = vpop.xlane.xlu0 %3483  ;;  %v3935_v52 = vsel %vm3755_vm4, %v3934_v53, %v3933_v54 }
 0x314   :  { %v3487_v61 = vpop.xlane.xlu1 %3486  ;;  %v3936_v44 = vperm.slane %v3484_v7, %v5936_v43 }
 0x315   :  { %v3938_v41 = vperm.slane %v3487_v61, %v7370_v27 }
 0x316   :  { %v3937_v51 = vsel %vm3759_vm5, %v3936_v44, %v3935_v52 }
 0x317   :  { %v3939_v63 = vsel %vm3763_vm6, %v3938_v41, %v3937_v51 }
 0x318   :  { %v3490_v20 = vpop.xlane.xlu2 %3489 }
 0x319   :  { %v3940_v13 = vperm.slane %v3490_v20, %v5972_v46 }
 0x31b   :  { %v3493_v49 = vpop.xlane.xlu0 %3492  ;;  %v3941_v23 = vsel %vm3767_vm7, %v3940_v13, %v3939_v63 }
 0x31c   :  { %v3942_v45 = vperm.slane %v3493_v49, %v5981_v1  ;;  %v3496_v36 = vpop.xlane.xlu1 %3495 }
 0x31d   :  { %v3944_v24 = vperm.slane %v3496_v36, %v6014_v32 }
 0x31e   :  { %v3943_v26 = vsel %vm3771_vm8, %v3942_v45, %v3941_v23 }
 0x31f   :  { %v3945_v48 = vsel %vm3775_vm9, %v3944_v24, %v3943_v26 }
 0x320   :  { %v3499_v28 = vpop.xlane.xlu2 %3498 }
 0x321   :  { %v3946_v8 = vperm.slane %v3499_v28, %v6030_v6 }
 0x323   :  { %v3502_v35 = vpop.xlane.xlu0 %3501  ;;  %v3947_v4 = vsel %vm3779_vm10, %v3946_v8, %v3945_v48 }
 0x324   :  { %v3948_v38 = vperm.slane %v3502_v35, %v6181_v40  ;;  %v3505_v56 = vpop.xlane.xlu1 %3504 }
 0x325   :  { %v3950_v17 = vperm.slane %v3505_v56, %v6361_v10 }
 0x326   :  { %v3949_v22 = vsel %vm7415_vm1, %v3948_v38, %v3947_v4 }
 0x327   :  { %v3951_v18 = vsel %vm7404_vm12, %v3950_v17, %v3949_v22 }
 0x328   :  { %v3508_v42 = vpop.xlane.xlu2 %3507 }
 0x329   :  { %v3952_v59 = vperm.slane %v3508_v42, %v6370_v25 }
 0x32b   :  { %v3511_v5 = vpop.xlane.xlu0 %3510  ;;  %v3953_v55 = vsel %vm7406_vm13, %v3952_v59, %v3951_v18 }
 0x32c   :  { %v3954_v39 = vperm.slane %v3511_v5, %v6377_v34  ;;  %v3514_v30 = vpop.xlane.xlu1 %3513 }
 0x32d   :  { %v3956_v29 = vperm.slane %v3514_v30, %v6418_v57 }
 0x32e   :  { %v3955_v14 = vsel %vm7414_vm11, %v3954_v39, %v3953_v55 }
 0x32f   :  { %v3957_v3 = vsel %vm3799_vm15, %v3956_v29, %v3955_v14 }
 0x330   :  { %v3517_v60 = vpop.xlane.xlu2 %3516 }
 0x331   :  { %v3958_v31 = vperm.slane %v3517_v60, %v6434_v37 }
 0x333   :  { %v3520_v15 = vpop.xlane.xlu0 %3519  ;;  %v3959_v0 = vsel %vm3803_vm14, %v3958_v31, %v3957_v3 }
 0x334   :  { %v3523_v19 = vpop.xlane.xlu1 %3522  ;;  %v3960_v9 = vperm.slane %v3520_v15, %v5861_v47  ;;  %v7023_v50 = vsel %vm4030_vm0, %v3959_v0, %v6982_v62 }
 0x335   :  { %v3961_v12 = vperm.slane %v3523_v19, %v5877_v33 }
 0x337   :  { %v3962_v11 = vsel %vm3747_vm2, %v3961_v12, %v3960_v9 }
 0x338   :  { %v3526_v54 = vpop.xlane.xlu2 %3525 }
 0x339   :  { %v3963_v24 = vperm.slane %v3526_v54, %v5923_v58 }
 0x33b   :  { %v3529_v16 = vpop.xlane.xlu0 %3528  ;;  %v3964_v35 = vsel %vm3751_vm3, %v3963_v24, %v3962_v11 }
 0x33c   :  { %v3532_v2 = vpop.xlane.xlu1 %3531  ;;  %v3965_v28 = vperm.slane %v3529_v16, %v7364_v21 }
 0x33e   :  { %v3966_v17 = vsel %vm3755_vm4, %v3965_v28, %v3964_v35 }
 0x340   :  { %v3535_v53 = vpop.xlane.xlu2 %3534 }
 0x341   :  { %v3969_v22 = vperm.slane %v3535_v53, %v7370_v27 }
 0x343   :  { %v3538_v7 = vpop.xlane.xlu0 %3537 }
 0x344   :  { %v3541_v61 = vpop.xlane.xlu1 %3540  ;;  %v3971_v5 = vperm.slane %v3538_v7, %v5972_v46 }
 0x345   :  { %v3973_v15 = vperm.slane %v3541_v61, %v5981_v1 }
 0x348   :  { %v3544_v52 = vpop.xlane.xlu2 %3543 }
 0x349   :  { %v3975_v60 = vperm.slane %v3544_v52, %v6014_v32 }
 0x34b   :  { %v3547_v44 = vpop.xlane.xlu0 %3546 }
 0x34c   :  { %v3550_v41 = vpop.xlane.xlu1 %3549  ;;  %v3977_v9 = vperm.slane %v3547_v44, %v6030_v6 }
 0x34d   :  { %v3979_v61 = vperm.slane %v3550_v41, %v6181_v40 }
 0x350   :  { %v3553_v51 = vpop.xlane.xlu2 %3552 }
 0x353   :  { %v7026_v63 = vpop.xlane.xlu0 %3555 }
 0x354   :  { %v3568_v20 = vpop.xlane.xlu1 %3567 }
 0x355   :  { %v3991_v48 = vperm.slane %v3568_v20, %v5861_v47  ;;  %v3967_v47 = vperm.slane %v3532_v2, %v5936_v43 }
 0x358   :  { %v3571_v13 = vpop.xlane.xlu2 %3570 }
 0x359   :  { %v3992_v26 = vperm.slane %v3571_v13, %v5877_v33  ;;  %v3983_v13 = vperm.slane %v7026_v63, %v6370_v25 }
 0x35b   :  { %v3574_v49 = vpop.xlane.xlu0 %3573  ;;  %v3993_v4 = vsel %vm3747_vm2, %v3992_v26, %v3991_v48  ;;  %vm7416_vm2 = vmmov %vm7415_vm1 }
 0x35c   :  { %v3577_v23 = vpop.xlane.xlu1 %3576  ;;  %v3994_v8 = vperm.slane %v3574_v49, %v5923_v58  ;;  %v3968_v58 = vsel %vm3759_vm5, %v3967_v47, %v3966_v17 }
 0x35d   :  { %v3996_v59 = vperm.slane %v3577_v23, %v7364_v21  ;;  %v3970_v55 = vsel %vm3763_vm6, %v3969_v22, %v3968_v58 }
 0x35e   :  { %v3995_v18 = vsel %vm3751_vm3, %v3994_v8, %v3993_v4  ;;  %v3972_v3 = vsel %vm3767_vm7, %v3971_v5, %v3970_v55  ;;  %vm7417_vm3 = vmmov %vm7404_vm12 }
 0x35f   :  { %v3997_v39 = vsel %vm3755_vm4, %v3996_v59, %v3995_v18  ;;  %vm7418_vm4 = vmmov %vm7415_vm1  ;;  %vm4034_vm1 = vcmask 1047559  }
 0x360   :  { %v3580_v62 = vpop.xlane.xlu2 %3579 }
 0x361   :  { %v3998_v33 = vperm.slane %v3580_v62, %v5936_v43 }
 0x363   :  { %v3583_v45 = vpop.xlane.xlu0 %3582  ;;  %v3999_v29 = vsel %vm3759_vm5, %v3998_v33, %v3997_v39  ;;  %vm7419_vm5 = vmmov %vm7406_vm13 }
 0x364   :  { %v3586_v36 = vpop.xlane.xlu1 %3585  ;;  %v4000_v30 = vperm.slane %v3583_v45, %v7370_v27  ;;  %v3974_v27 = vsel %vm3771_vm8, %v3973_v15, %v3972_v3 }
 0x365   :  { %v4002_v19 = vperm.slane %v3586_v36, %v5972_v46  ;;  %v3976_v54 = vsel %vm3775_vm9, %v3975_v60, %v3974_v27 }
 0x366   :  { %v4001_v43 = vsel %vm3763_vm6, %v4000_v30, %v3999_v29  ;;  %v3978_v53 = vsel %vm3779_vm10, %v3977_v9, %v3976_v54  ;;  %vm7420_vm6 = vmmov %vm7417_vm3 }
 0x367   :  { %v4003_v12 = vsel %vm3767_vm7, %v4002_v19, %v4001_v43  ;;  %vm7421_vm7 = vmmov %vm7414_vm11 }
 0x368   :  { %v3589_v38 = vpop.xlane.xlu2 %3588 }
 0x369   :  { %v4004_v21 = vperm.slane %v3589_v38, %v5981_v1  ;;  %v3981_v1 = vperm.slane %v3553_v51, %v6361_v10 }
 0x36b   :  { %v3592_v56 = vpop.xlane.xlu0 %3591  ;;  %v4005_v16 = vsel %vm3771_vm8, %v4004_v21, %v4003_v12  ;;  %vm7422_vm8 = vmmov %vm7419_vm5 }
 0x36c   :  { %v3595_v42 = vpop.xlane.xlu1 %3594  ;;  %v4006_v11 = vperm.slane %v3592_v56, %v6014_v32  ;;  %v3980_v32 = vsel %vm7416_vm2, %v3979_v61, %v3978_v53 }
 0x36d   :  { %v4008_v52 = vperm.slane %v3595_v42, %v6030_v6  ;;  %v3982_v51 = vsel %vm7417_vm3, %v3981_v1, %v3980_v32 }
 0x36e   :  { %v4007_v46 = vsel %vm3775_vm9, %v4006_v11, %v4005_v16  ;;  %v3984_v41 = vsel %vm7419_vm5, %v3983_v13, %v3982_v51  ;;  %vm4032_vm9 = vcmask 1046534  }
 0x36f   :  { %v4009_v49 = vsel %vm3779_vm10, %v4008_v52, %v4007_v46  ;;  %vm7423_vm10 = vmmov %vm7421_vm7 }
 0x370   :  { %v3598_v14 = vpop.xlane.xlu2 %3597 }
 0x371   :  { %v4010_v7 = vperm.slane %v3598_v14, %v6181_v40 }
 0x373   :  { %v3601_v31 = vpop.xlane.xlu0 %3600  ;;  %v4011_v45 = vsel %vm7418_vm4, %v4010_v7, %v4009_v49 }
 0x374   :  { %v3559_v0 = vpop.xlane.xlu1 %3558  ;;  %v4012_v23 = vperm.slane %v3601_v31, %v6361_v10 }
 0x375   :  { %v3985_v62 = vperm.slane %v3559_v0, %v6377_v34 }
 0x376   :  { %v4013_v36 = vsel %vm7420_vm6, %v4012_v23, %v4011_v45 }
 0x377   :  { %v3986_v26 = vsel %vm7421_vm7, %v3985_v62, %v3984_v41 }
 0x378   :  { %v3604_v2 = vpop.xlane.xlu2 %3603 }
 0x379   :  { %v4014_v40 = vperm.slane %v3604_v2, %v6370_v25 }
 0x37b   :  { %v3562_v44 = vpop.xlane.xlu0 %3561  ;;  %v4015_v10 = vsel %vm7422_vm8, %v4014_v40, %v4013_v36 }
 0x37c   :  { %v3607_v20 = vpop.xlane.xlu1 %3606  ;;  %v3987_v6 = vperm.slane %v3562_v44, %v6418_v57 }
 0x37d   :  { %v4016_v63 = vperm.slane %v3607_v20, %v6377_v34 }
 0x37e   :  { %v3988_v28 = vsel %vm3799_vm15, %v3987_v6, %v3986_v26 }
 0x37f   :  { %v4017_v34 = vsel %vm7423_vm10, %v4016_v63, %v4015_v10 }
 0x380   :  { %v3565_v24 = vpop.xlane.xlu2 %3564 }
 0x381   :  { %v3989_v48 = vperm.slane %v3565_v24, %v6434_v37 }
 0x383   :  { %v3610_v8 = vpop.xlane.xlu0 %3609  ;;  %v3990_v4 = vsel %vm3803_vm14, %v3989_v48, %v3988_v28 }
 0x384   :  { %v3613_v25 = vpop.xlane.xlu1 %3612  ;;  %v4018_v35 = vperm.slane %v3610_v8, %v6418_v57  ;;  %v4033_v56 = vsel %vm4032_vm9, %v3990_v4, %v7023_v50 }
 0x385   :  { %v4020_v38 = vperm.slane %v3613_v25, %v6434_v37 }
 0x386   :  { %v4019_v17 = vsel %vm3799_vm15, %v4018_v35, %v4017_v34 }
 0x387   :  { %v4021_v22 = vsel %vm3803_vm14, %v4020_v38, %v4019_v17 }
 0x388   :  { %v4035_v18 = vsel %vm4034_vm1, %v4021_v22, %v4033_v56 }
 0x389   :  { %4037 = vst [vmem:[#allocation5] sm:$0xff] %v4035_v18 }
 0x38a   :  { %4041 = vsyncadd [#allocation4], 64  ;;  %s4044_s0 = sshll.u32 %s7096_s1, 4  ;;  %s4244_s15 = smov [#allocation5]   ;;  %s4045_s0 = int_to_ptr.hbm [resolvable:$true] %s4044_s0 }
 0x38b   :  { %s4042_s16 = sshll.u32 %s4244_s15, 4  ;;  %s4043_s16 = int_to_ptr.vmem [resolvable:$true] %s4042_s16 }
 0x38c   :  { %4050 = dma.vmem_to_hbm [thread:$0]  %s4043_s16, 64, %s4045_s0, [#allocation4], %s4228_s28, %s4228_s28, %s4243_s11  }
 0x38d   :  { %4207 = dma.done.wait [#allocation4], 128  }
 0x38e   :  { %4208 = vsyncadd [#allocation4], 4294967168 }
 0x38f   :  { %4055 = vsyncpa [#allocation3], 1 }
 0x390   :  { %4056 = vsyncpa [#allocation4], 1 }

</bundles_post_ra>
